<compile_context>
chip_gen: v6e
topology: v6e:2x2x1
jax: 0.10.0
libtpu: 0.0.40
codegen_flags: <defaults>
</compile_context>

<pallas_src>
import functools
import math

import jax
import jax.numpy as jnp
from jax import lax
from jax.experimental import pallas as pl
from jax.experimental.pallas import tpu as pltpu


def _round_up(x, m):
    return (x + m - 1) // m * m


def _cdiv(a, b):
    return -(-a // b)


def _fused_p6p7_kernel(x_ref, w6_ref, b6_ref, w7_ref, b7_ref,
                       o6_ref, o7_ref, q_ref, *,
                       ho6, wo6, ho7, wo7, he, we):
    """One batch element: conv3x3/s2 (p6) -> relu -> conv3x3/s2 (p7), fully in VMEM.

    x_ref  : (1, 4, 4, Ht, Wt, Cin) bf16  stride-4 phases of the pad-1 padded input
    w6_ref : (9, Cin, Cout) bf16          w7_ref : (9, Cout, Cout) bf16
    b6_ref : (1, Cout) f32                b7_ref : (1, Cout) f32
    o6_ref : (1, 2, 2, he, we, Cout)      p6 in output-parity-split layout
    o7_ref : (1, ho7, wo7, Cout)          p7 in plain NHWC
    q_ref  : (2, 2, ho7+1, wo7+1, Cout)   scratch: stride-2 phases of pad-1 relu(p6)
    """
    cin = x_ref.shape[-1]
    cout = o6_ref.shape[-1]
    cdt = q_ref.dtype

    # conv2-input scratch: zero once (unwritten border == the pad=1 zero ring)
    q_ref[...] = jnp.zeros_like(q_ref)

    bias6 = b6_ref[...]            # (1, Cout) f32, hoisted
    bias7 = b7_ref[...]

    n_valid_rows = (he, ho6 // 2)  # valid p6 rows per output-row parity (even, odd)
    n_valid_cols = (we, wo6 // 2)

    # bound each f32 accumulator to ~ (128, Cout) => <= 16 live vregs per 128 lanes
    tm6 = max(1, 128 // we)
    tm7 = max(1, 128 // wo7)

    # hoist the bias broadcasts for the (common) full-size chunks; remainder chunks
    # get their own (cheap) broadcast below.
    tm6_full = min(tm6, he)
    tm7_full = min(tm7, ho7)
    acc6_init = jnp.broadcast_to(bias6, (tm6_full * we, cout))
    acc7_init = jnp.broadcast_to(bias7, (tm7_full * wo7, cout))

    # ---------------- conv1 (p6): 2x2 output-parity blocks ----------------
    for rho in range(2):           # output-row parity of p6
        for sig in range(2):       # output-col parity of p6
            for m0 in range(0, he, tm6):
                rows = min(tm6, he - m0)
                acc = (acc6_init if rows == tm6_full
                       else jnp.broadcast_to(bias6, (rows * we, cout)))
                for kh in range(3):
                    for kw in range(3):
                        rr = 2 * rho + kh          # offset into the padded input rows
                        ss = 2 * sig + kw          # offset into the padded input cols
                        patch = x_ref[0, rr % 4, ss % 4,
                                      rr // 4 + m0: rr // 4 + m0 + rows,
                                      ss // 4: ss // 4 + we, :]
                        acc = acc + jnp.dot(patch.reshape(rows * we, cin),
                                            w6_ref[kh * 3 + kw],
                                            preferred_element_type=jnp.float32)
                blk = acc.reshape(rows, we, cout)

                # p6 output (parity-split layout; re-interleaved by the glue)
                o6_ref[0, rho, sig, m0:m0 + rows, :, :] = blk.astype(o6_ref.dtype)

                # relu + stage the valid part into conv2's phase scratch
                vr = max(0, min(rows, n_valid_rows[rho] - m0))
                vc = n_valid_cols[sig]
                if vr > 0 and vc > 0:
                    q_ref[1 - rho, 1 - sig,
                          rho + m0: rho + m0 + vr,
                          sig: sig + vc, :] = jnp.maximum(
                              blk[:vr, :vc, :], 0.0).astype(cdt)

    # ---------------- conv2 (p7): reads the staged relu(p6) phases ----------------
    for a0 in range(0, ho7, tm7):
        rows = min(tm7, ho7 - a0)
        acc = (acc7_init if rows == tm7_full
               else jnp.broadcast_to(bias7, (rows * wo7, cout)))
        for kh in range(3):
            for kw in range(3):
                patch = q_ref[kh % 2, kw % 2,
                              kh // 2 + a0: kh // 2 + a0 + rows,
                              kw // 2: kw // 2 + wo7, :]
                acc = acc + jnp.dot(patch.reshape(rows * wo7, cout),
                                    w7_ref[kh * 3 + kw],
                                    preferred_element_type=jnp.float32)
        o7_ref[0, a0:a0 + rows, :, :] = acc.reshape(rows, wo7, cout).astype(o7_ref.dtype)


def fpn_top_p6p7_pallas(x_nhwc, w_p6, b_p6, w_p7, b_p7, *,
                        compute_dtype=jnp.bfloat16,
                        vmem_limit_bytes=48 * 1024 * 1024):
    """Fused p6/p7 head: returns (p6_nhwc, p7_nhwc) with PyTorch conv semantics."""
    n, h, w, cin = x_nhwc.shape
    cout = w_p6.shape[0]
    out_dtype = x_nhwc.dtype

    # conv output sizes (kernel 3, stride 2, pad 1)
    ho6, wo6 = (h - 1) // 2 + 1, (w - 1) // 2 + 1
    ho7, wo7 = (ho6 - 1) // 2 + 1, (wo6 - 1) // 2 + 1
    he, we = _cdiv(ho6, 2), _cdiv(wo6, 2)      # parity-block (max) extents

    # pad channels to full 128-lane tiles (lane-dense loads / unmasked stores)
    cin_p, cout_p = _round_up(cin, 128), _round_up(cout, 128)

    # spatial pad: 1 on the left (the conv pad) + enough zeros on the right so every
    # parity-block tap slice stays in bounds; total is a multiple of 4.
    hp4, wp4 = 4 * (he + 1), 4 * (we + 1)
    x_pad = jnp.pad(x_nhwc.astype(compute_dtype),
                    ((0, 0), (1, hp4 - h - 1), (1, wp4 - w - 1), (0, cin_p - cin)))

    # glue-only layout transform: stride-4 phase planes of the padded input
    x16 = jnp.transpose(
        x_pad.reshape(n, hp4 // 4, 4, wp4 // 4, 4, cin_p), (0, 2, 4, 1, 3, 5))

    def prep_w(w_oihw, ci, ci_p):
        wr = jnp.transpose(w_oihw, (2, 3, 1, 0))                       # (3,3,Cin,Cout)
        wr = jnp.pad(wr, ((0, 0), (0, 0), (0, ci_p - ci), (0, cout_p - cout)))
        return wr.reshape(9, ci_p, cout_p).astype(compute_dtype)

    w6r = prep_w(w_p6, cin, cin_p)
    w7r = prep_w(w_p7, cout, cout_p)
    b6r = jnp.pad(b_p6, (0, cout_p - cout)).reshape(1, cout_p).astype(jnp.float32)
    b7r = jnp.pad(b_p7, (0, cout_p - cout)).reshape(1, cout_p).astype(jnp.float32)

    kernel = functools.partial(_fused_p6p7_kernel, ho6=ho6, wo6=wo6,
                               ho7=ho7, wo7=wo7, he=he, we=we)

    o6_ph, o7 = pl.pallas_call(
        kernel,
        out_shape=(jax.ShapeDtypeStruct((n, 2, 2, he, we, cout_p), out_dtype),
                   jax.ShapeDtypeStruct((n, ho7, wo7, cout_p), out_dtype)),
        grid=(n,),
        in_specs=[
            pl.BlockSpec((1, 4, 4, he + 1, we + 1, cin_p),
                         lambda i: (i, 0, 0, 0, 0, 0)),
            pl.BlockSpec((9, cin_p, cout_p), lambda i: (0, 0, 0)),
            pl.BlockSpec((1, cout_p), lambda i: (0, 0)),
            pl.BlockSpec((9, cout_p, cout_p), lambda i: (0, 0, 0)),
            pl.BlockSpec((1, cout_p), lambda i: (0, 0)),
        ],
        out_specs=(
            pl.BlockSpec((1, 2, 2, he, we, cout_p), lambda i: (i, 0, 0, 0, 0, 0)),
            pl.BlockSpec((1, ho7, wo7, cout_p), lambda i: (i, 0, 0, 0)),
        ),
        scratch_shapes=[pltpu.VMEM((2, 2, ho7 + 1, wo7 + 1, cout_p), compute_dtype)],
        compiler_params=pltpu.CompilerParams(
            dimension_semantics=("parallel",),
            vmem_limit_bytes=vmem_limit_bytes),
    )(x16, w6r, b6r, w7r, b7r)

    # re-interleave p6's parity blocks back to NHWC (cheap glue transpose on a small map)
    p6 = jnp.transpose(o6_ph, (0, 3, 1, 4, 2, 5)).reshape(n, 2 * he, 2 * we, cout_p)
    p6 = p6[:, :ho6, :wo6, :cout]
    p7 = o7[:, :, :, :cout]
    return p6, p7


class FPNTopP6P7:
    """JAX/Pallas port of the PyTorch FPNTopP6P7 module (NCHW interface)."""

    def __init__(self, in_channel, out_channel, use_p5=True, *, key,
                 compute_dtype=jnp.bfloat16):
        k6, k7 = jax.random.split(key)
        # kaiming_uniform_(a=1): bound = sqrt(3 / fan_in), fan_in = Cin * 3 * 3
        bound6 = math.sqrt(3.0 / (in_channel * 9))
        bound7 = math.sqrt(3.0 / (out_channel * 9))
        self.w6 = jax.random.uniform(k6, (out_channel, in_channel, 3, 3),
                                     jnp.float32, -bound6, bound6)
        self.b6 = jnp.zeros((out_channel,), jnp.float32)
        self.w7 = jax.random.uniform(k7, (out_channel, out_channel, 3, 3),
                                     jnp.float32, -bound7, bound7)
        self.b7 = jnp.zeros((out_channel,), jnp.float32)
        self.use_p5 = use_p5
        self.compute_dtype = compute_dtype

    def __call__(self, f5, p5):
        x = p5 if self.use_p5 else f5                       # NCHW
        x_nhwc = jnp.transpose(x, (0, 2, 3, 1))
        p6, p7 = fpn_top_p6p7_pallas(x_nhwc, self.w6, self.b6, self.w7, self.b7,
                                     compute_dtype=self.compute_dtype)
        # back to NCHW to match PyTorch
        return (jnp.transpose(p6, (0, 3, 1, 2)), jnp.transpose(p7, (0, 3, 1, 2)))


# ------------------------- pure-JAX reference (same bf16 policy) -------------------------

def _ref_conv(x, w, b, compute_dtype):
    out = lax.conv_general_dilated(
        x.astype(compute_dtype), w.astype(compute_dtype),
        window_strides=(2, 2), padding=((1, 1), (1, 1)),
        dimension_numbers=("NCHW", "OIHW", "NCHW"),
        preferred_element_type=jnp.float32)
    return out + b[None, :, None, None]


def _ref_forward(f5, p5, module):
    x = p5 if module.use_p5 else f5
    p6 = _ref_conv(x, module.w6, module.b6, module.compute_dtype)
    p7 = _ref_conv(jnp.maximum(p6, 0.0), module.w7, module.b7, module.compute_dtype)
    return p6, p7


if __name__ == "__main__":
    key = jax.random.PRNGKey(0)

    def run_case(case_key, batch, cin, cout, height, width):
        k_f5, k_p5, k_params = jax.random.split(case_key, 3)
        f5 = jax.random.normal(k_f5, (batch, cin, height, width), jnp.float32)
        p5 = jax.random.normal(k_p5, (batch, cin, height, width), jnp.float32)
        module = FPNTopP6P7(cin, cout, use_p5=True, key=k_params)

        p6, p7 = module(f5, p5)
        jax.block_until_ready((p6, p7))

        p6_ref, p7_ref = _ref_forward(f5, p5, module)
        assert p6.shape == p6_ref.shape and p7.shape == p7_ref.shape
        assert jnp.allclose(p6, p6_ref, atol=1e-2, rtol=1e-2), \
            f"p6 mismatch: {jnp.max(jnp.abs(p6 - p6_ref))}"
        assert jnp.allclose(p7, p7_ref, atol=1e-2, rtol=1e-2), \
            f"p7 mismatch: {jnp.max(jnp.abs(p7 - p7_ref))}"

    k1, k2 = jax.random.split(key)
    # primary small case (shapes implied by the module)
    run_case(k1, batch=2, cin=4, cout=8, height=16, width=16)
    # odd spatial sizes + multi-chunk accumulators exercised
    run_case(k2, batch=1, cin=4, cout=8, height=61, width=45)

    print("KERNEL_OK")
</pallas_src>

<mosaic_0001>
module attributes {stable_mosaic.version = 11 : i64} {
  func.func @_fused_p6p7_kernel(%arg0: i32, %arg1: memref<1x4x4x5x5x128xbf16, #tpu.memory_space<vmem>>, %arg2: memref<9x128x128xbf16, #tpu.memory_space<vmem>>, %arg3: memref<1x128xf32, #tpu.memory_space<vmem>>, %arg4: memref<9x128x128xbf16, #tpu.memory_space<vmem>>, %arg5: memref<1x128xf32, #tpu.memory_space<vmem>>, %arg6: memref<1x2x2x4x4x128xf32, #tpu.memory_space<vmem>>, %arg7: memref<1x4x4x128xf32, #tpu.memory_space<vmem>>, %arg8: memref<2x2x5x5x128xbf16, #tpu.memory_space<vmem>>) attributes {dimension_semantics = [#tpu.dimension_semantics<parallel>], iteration_bounds = array<i64: 2>, scalar_prefetch = 0 : i64, scratch_operands = 1 : i64, tpu.core_type = #tpu.core_type<tc>, window_params = [{transform_indices = @transform_0, window_bounds = array<i64: 1, 4, 4, 5, 5, 128>}, {pipeline_mode = #tpu.pipeline_mode<synchronous>, transform_indices = @transform_1, window_bounds = array<i64: 9, 128, 128>}, {pipeline_mode = #tpu.pipeline_mode<synchronous>, transform_indices = @transform_2, window_bounds = array<i64: 1, 128>}, {pipeline_mode = #tpu.pipeline_mode<synchronous>, transform_indices = @transform_3, window_bounds = array<i64: 9, 128, 128>}, {pipeline_mode = #tpu.pipeline_mode<synchronous>, transform_indices = @transform_4, window_bounds = array<i64: 1, 128>}, {transform_indices = @transform_5, window_bounds = array<i64: 1, 2, 2, 4, 4, 128>}, {transform_indices = @transform_6, window_bounds = array<i64: 1, 4, 4, 128>}]} {
    %cst = arith.constant 0.000000e+00 : bf16
    %0 = vector.broadcast %cst : bf16 to vector<2x2x5x5x128xbf16>
    %c0 = arith.constant 0 : index
    %c0_0 = arith.constant 0 : index
    %c0_1 = arith.constant 0 : index
    %c0_2 = arith.constant 0 : index
    %c0_3 = arith.constant 0 : index
    %1 = vector.load %arg8[%c0, %c0_0, %c0_1, %c0_2, %c0_3] : memref<2x2x5x5x128xbf16, #tpu.memory_space<vmem>>, vector<2x2x5x5x128xbf16>
    tpu.vector_store %arg8[%c0, %c0_0, %c0_1, %c0_2, %c0_3], %0 {strides = array<i32>} : memref<2x2x5x5x128xbf16, #tpu.memory_space<vmem>>, vector<2x2x5x5x128xbf16>,
    %c0_4 = arith.constant 0 : index
    %c0_5 = arith.constant 0 : index
    %2 = vector.load %arg3[%c0_4, %c0_5] : memref<1x128xf32, #tpu.memory_space<vmem>>, vector<1x128xf32>
    %c0_6 = arith.constant 0 : index
    %c0_7 = arith.constant 0 : index
    %3 = vector.load %arg5[%c0_6, %c0_7] : memref<1x128xf32, #tpu.memory_space<vmem>>, vector<1x128xf32>
    %4 = vector.shape_cast %2 : vector<1x128xf32> to vector<1x128xf32>
    %5 = vector.broadcast %4 : vector<1x128xf32> to vector<16x128xf32>
    %6 = vector.shape_cast %3 : vector<1x128xf32> to vector<1x128xf32>
    %7 = vector.broadcast %6 : vector<1x128xf32> to vector<16x128xf32>
    %c0_8 = arith.constant 0 : index
    %c0_9 = arith.constant 0 : index
    %c0_10 = arith.constant 0 : index
    %c0_11 = arith.constant 0 : index
    %c0_12 = arith.constant 0 : index
    %c0_13 = arith.constant 0 : index
    %8 = vector.load %arg1[%c0_8, %c0_9, %c0_10, %c0_11, %c0_12, %c0_13] : memref<1x4x4x5x5x128xbf16, #tpu.memory_space<vmem>>, vector<1x1x1x4x4x128xbf16>
    %9 = vector.shape_cast %8 : vector<1x1x1x4x4x128xbf16> to vector<4x4x128xbf16>
    %10 = vector.shape_cast %9 : vector<4x4x128xbf16> to vector<16x128xbf16>
    %c0_14 = arith.constant 0 : index
    %c0_15 = arith.constant 0 : index
    %c0_16 = arith.constant 0 : index
    %11 = vector.load %arg2[%c0_14, %c0_15, %c0_16] : memref<9x128x128xbf16, #tpu.memory_space<vmem>>, vector<1x128x128xbf16>
    %12 = vector.shape_cast %11 : vector<1x128x128xbf16> to vector<128x128xbf16>
    %cst_17 = arith.constant dense<0.000000e+00> : vector<16x128xf32>
    %13 = tpu.matmul %10, %12, %cst_17 {dimension_numbers = #tpu.dot_dimension_numbers<[1], [0], [0], [1], [0, 0, 1, 1], [], []>} : vector<16x128xbf16>, vector<128x128xbf16>, vector<16x128xf32> -> vector<16x128xf32>
    %14 = arith.addf %5, %13 : vector<16x128xf32>
    %c0_18 = arith.constant 0 : index
    %c0_19 = arith.constant 0 : index
    %c1 = arith.constant 1 : index
    %c0_20 = arith.constant 0 : index
    %c0_21 = arith.constant 0 : index
    %c0_22 = arith.constant 0 : index
    %15 = vector.load %arg1[%c0_18, %c0_19, %c1, %c0_20, %c0_21, %c0_22] : memref<1x4x4x5x5x128xbf16, #tpu.memory_space<vmem>>, vector<1x1x1x4x4x128xbf16>
    %16 = vector.shape_cast %15 : vector<1x1x1x4x4x128xbf16> to vector<4x4x128xbf16>
    %17 = vector.shape_cast %16 : vector<4x4x128xbf16> to vector<16x128xbf16>
    %c1_23 = arith.constant 1 : index
    %c0_24 = arith.constant 0 : index
    %c0_25 = arith.constant 0 : index
    %18 = vector.load %arg2[%c1_23, %c0_24, %c0_25] : memref<9x128x128xbf16, #tpu.memory_space<vmem>>, vector<1x128x128xbf16>
    %19 = vector.shape_cast %18 : vector<1x128x128xbf16> to vector<128x128xbf16>
    %cst_26 = arith.constant dense<0.000000e+00> : vector<16x128xf32>
    %20 = tpu.matmul %17, %19, %cst_26 {dimension_numbers = #tpu.dot_dimension_numbers<[1], [0], [0], [1], [0, 0, 1, 1], [], []>} : vector<16x128xbf16>, vector<128x128xbf16>, vector<16x128xf32> -> vector<16x128xf32>
    %21 = arith.addf %14, %20 : vector<16x128xf32>
    %c0_27 = arith.constant 0 : index
    %c0_28 = arith.constant 0 : index
    %c2 = arith.constant 2 : index
    %c0_29 = arith.constant 0 : index
    %c0_30 = arith.constant 0 : index
    %c0_31 = arith.constant 0 : index
    %22 = vector.load %arg1[%c0_27, %c0_28, %c2, %c0_29, %c0_30, %c0_31] : memref<1x4x4x5x5x128xbf16, #tpu.memory_space<vmem>>, vector<1x1x1x4x4x128xbf16>
    %23 = vector.shape_cast %22 : vector<1x1x1x4x4x128xbf16> to vector<4x4x128xbf16>
    %24 = vector.shape_cast %23 : vector<4x4x128xbf16> to vector<16x128xbf16>
    %c2_32 = arith.constant 2 : index
    %c0_33 = arith.constant 0 : index
    %c0_34 = arith.constant 0 : index
    %25 = vector.load %arg2[%c2_32, %c0_33, %c0_34] : memref<9x128x128xbf16, #tpu.memory_space<vmem>>, vector<1x128x128xbf16>
    %26 = vector.shape_cast %25 : vector<1x128x128xbf16> to vector<128x128xbf16>
    %cst_35 = arith.constant dense<0.000000e+00> : vector<16x128xf32>
    %27 = tpu.matmul %24, %26, %cst_35 {dimension_numbers = #tpu.dot_dimension_numbers<[1], [0], [0], [1], [0, 0, 1, 1], [], []>} : vector<16x128xbf16>, vector<128x128xbf16>, vector<16x128xf32> -> vector<16x128xf32>
    %28 = arith.addf %21, %27 : vector<16x128xf32>
    %c0_36 = arith.constant 0 : index
    %c1_37 = arith.constant 1 : index
    %c0_38 = arith.constant 0 : index
    %c0_39 = arith.constant 0 : index
    %c0_40 = arith.constant 0 : index
    %c0_41 = arith.constant 0 : index
    %29 = vector.load %arg1[%c0_36, %c1_37, %c0_38, %c0_39, %c0_40, %c0_41] : memref<1x4x4x5x5x128xbf16, #tpu.memory_space<vmem>>, vector<1x1x1x4x4x128xbf16>
    %30 = vector.shape_cast %29 : vector<1x1x1x4x4x128xbf16> to vector<4x4x128xbf16>
    %31 = vector.shape_cast %30 : vector<4x4x128xbf16> to vector<16x128xbf16>
    %c3 = arith.constant 3 : index
    %c0_42 = arith.constant 0 : index
    %c0_43 = arith.constant 0 : index
    %32 = vector.load %arg2[%c3, %c0_42, %c0_43] : memref<9x128x128xbf16, #tpu.memory_space<vmem>>, vector<1x128x128xbf16>
    %33 = vector.shape_cast %32 : vector<1x128x128xbf16> to vector<128x128xbf16>
    %cst_44 = arith.constant dense<0.000000e+00> : vector<16x128xf32>
    %34 = tpu.matmul %31, %33, %cst_44 {dimension_numbers = #tpu.dot_dimension_numbers<[1], [0], [0], [1], [0, 0, 1, 1], [], []>} : vector<16x128xbf16>, vector<128x128xbf16>, vector<16x128xf32> -> vector<16x128xf32>
    %35 = arith.addf %28, %34 : vector<16x128xf32>
    %c0_45 = arith.constant 0 : index
    %c1_46 = arith.constant 1 : index
    %c1_47 = arith.constant 1 : index
    %c0_48 = arith.constant 0 : index
    %c0_49 = arith.constant 0 : index
    %c0_50 = arith.constant 0 : index
    %36 = vector.load %arg1[%c0_45, %c1_46, %c1_47, %c0_48, %c0_49, %c0_50] : memref<1x4x4x5x5x128xbf16, #tpu.memory_space<vmem>>, vector<1x1x1x4x4x128xbf16>
    %37 = vector.shape_cast %36 : vector<1x1x1x4x4x128xbf16> to vector<4x4x128xbf16>
    %38 = vector.shape_cast %37 : vector<4x4x128xbf16> to vector<16x128xbf16>
    %c4 = arith.constant 4 : index
    %c0_51 = arith.constant 0 : index
    %c0_52 = arith.constant 0 : index
    %39 = vector.load %arg2[%c4, %c0_51, %c0_52] : memref<9x128x128xbf16, #tpu.memory_space<vmem>>, vector<1x128x128xbf16>
    %40 = vector.shape_cast %39 : vector<1x128x128xbf16> to vector<128x128xbf16>
    %cst_53 = arith.constant dense<0.000000e+00> : vector<16x128xf32>
    %41 = tpu.matmul %38, %40, %cst_53 {dimension_numbers = #tpu.dot_dimension_numbers<[1], [0], [0], [1], [0, 0, 1, 1], [], []>} : vector<16x128xbf16>, vector<128x128xbf16>, vector<16x128xf32> -> vector<16x128xf32>
    %42 = arith.addf %35, %41 : vector<16x128xf32>
    %c0_54 = arith.constant 0 : index
    %c1_55 = arith.constant 1 : index
    %c2_56 = arith.constant 2 : index
    %c0_57 = arith.constant 0 : index
    %c0_58 = arith.constant 0 : index
    %c0_59 = arith.constant 0 : index
    %43 = vector.load %arg1[%c0_54, %c1_55, %c2_56, %c0_57, %c0_58, %c0_59] : memref<1x4x4x5x5x128xbf16, #tpu.memory_space<vmem>>, vector<1x1x1x4x4x128xbf16>
    %44 = vector.shape_cast %43 : vector<1x1x1x4x4x128xbf16> to vector<4x4x128xbf16>
    %45 = vector.shape_cast %44 : vector<4x4x128xbf16> to vector<16x128xbf16>
    %c5 = arith.constant 5 : index
    %c0_60 = arith.constant 0 : index
    %c0_61 = arith.constant 0 : index
    %46 = vector.load %arg2[%c5, %c0_60, %c0_61] : memref<9x128x128xbf16, #tpu.memory_space<vmem>>, vector<1x128x128xbf16>
    %47 = vector.shape_cast %46 : vector<1x128x128xbf16> to vector<128x128xbf16>
    %cst_62 = arith.constant dense<0.000000e+00> : vector<16x128xf32>
    %48 = tpu.matmul %45, %47, %cst_62 {dimension_numbers = #tpu.dot_dimension_numbers<[1], [0], [0], [1], [0, 0, 1, 1], [], []>} : vector<16x128xbf16>, vector<128x128xbf16>, vector<16x128xf32> -> vector<16x128xf32>
    %49 = arith.addf %42, %48 : vector<16x128xf32>
    %c0_63 = arith.constant 0 : index
    %c2_64 = arith.constant 2 : index
    %c0_65 = arith.constant 0 : index
    %c0_66 = arith.constant 0 : index
    %c0_67 = arith.constant 0 : index
    %c0_68 = arith.constant 0 : index
    %50 = vector.load %arg1[%c0_63, %c2_64, %c0_65, %c0_66, %c0_67, %c0_68] : memref<1x4x4x5x5x128xbf16, #tpu.memory_space<vmem>>, vector<1x1x1x4x4x128xbf16>
    %51 = vector.shape_cast %50 : vector<1x1x1x4x4x128xbf16> to vector<4x4x128xbf16>
    %52 = vector.shape_cast %51 : vector<4x4x128xbf16> to vector<16x128xbf16>
    %c6 = arith.constant 6 : index
    %c0_69 = arith.constant 0 : index
    %c0_70 = arith.constant 0 : index
    %53 = vector.load %arg2[%c6, %c0_69, %c0_70] : memref<9x128x128xbf16, #tpu.memory_space<vmem>>, vector<1x128x128xbf16>
    %54 = vector.shape_cast %53 : vector<1x128x128xbf16> to vector<128x128xbf16>
    %cst_71 = arith.constant dense<0.000000e+00> : vector<16x128xf32>
    %55 = tpu.matmul %52, %54, %cst_71 {dimension_numbers = #tpu.dot_dimension_numbers<[1], [0], [0], [1], [0, 0, 1, 1], [], []>} : vector<16x128xbf16>, vector<128x128xbf16>, vector<16x128xf32> -> vector<16x128xf32>
    %56 = arith.addf %49, %55 : vector<16x128xf32>
    %c0_72 = arith.constant 0 : index
    %c2_73 = arith.constant 2 : index
    %c1_74 = arith.constant 1 : index
    %c0_75 = arith.constant 0 : index
    %c0_76 = arith.constant 0 : index
    %c0_77 = arith.constant 0 : index
    %57 = vector.load %arg1[%c0_72, %c2_73, %c1_74, %c0_75, %c0_76, %c0_77] : memref<1x4x4x5x5x128xbf16, #tpu.memory_space<vmem>>, vector<1x1x1x4x4x128xbf16>
    %58 = vector.shape_cast %57 : vector<1x1x1x4x4x128xbf16> to vector<4x4x128xbf16>
    %59 = vector.shape_cast %58 : vector<4x4x128xbf16> to vector<16x128xbf16>
    %c7 = arith.constant 7 : index
    %c0_78 = arith.constant 0 : index
    %c0_79 = arith.constant 0 : index
    %60 = vector.load %arg2[%c7, %c0_78, %c0_79] : memref<9x128x128xbf16, #tpu.memory_space<vmem>>, vector<1x128x128xbf16>
    %61 = vector.shape_cast %60 : vector<1x128x128xbf16> to vector<128x128xbf16>
    %cst_80 = arith.constant dense<0.000000e+00> : vector<16x128xf32>
    %62 = tpu.matmul %59, %61, %cst_80 {dimension_numbers = #tpu.dot_dimension_numbers<[1], [0], [0], [1], [0, 0, 1, 1], [], []>} : vector<16x128xbf16>, vector<128x128xbf16>, vector<16x128xf32> -> vector<16x128xf32>
    %63 = arith.addf %56, %62 : vector<16x128xf32>
    %c0_81 = arith.constant 0 : index
    %c2_82 = arith.constant 2 : index
    %c2_83 = arith.constant 2 : index
    %c0_84 = arith.constant 0 : index
    %c0_85 = arith.constant 0 : index
    %c0_86 = arith.constant 0 : index
    %64 = vector.load %arg1[%c0_81, %c2_82, %c2_83, %c0_84, %c0_85, %c0_86] : memref<1x4x4x5x5x128xbf16, #tpu.memory_space<vmem>>, vector<1x1x1x4x4x128xbf16>
    %65 = vector.shape_cast %64 : vector<1x1x1x4x4x128xbf16> to vector<4x4x128xbf16>
    %66 = vector.shape_cast %65 : vector<4x4x128xbf16> to vector<16x128xbf16>
    %c8 = arith.constant 8 : index
    %c0_87 = arith.constant 0 : index
    %c0_88 = arith.constant 0 : index
    %67 = vector.load %arg2[%c8, %c0_87, %c0_88] : memref<9x128x128xbf16, #tpu.memory_space<vmem>>, vector<1x128x128xbf16>
    %68 = vector.shape_cast %67 : vector<1x128x128xbf16> to vector<128x128xbf16>
    %cst_89 = arith.constant dense<0.000000e+00> : vector<16x128xf32>
    %69 = tpu.matmul %66, %68, %cst_89 {dimension_numbers = #tpu.dot_dimension_numbers<[1], [0], [0], [1], [0, 0, 1, 1], [], []>} : vector<16x128xbf16>, vector<128x128xbf16>, vector<16x128xf32> -> vector<16x128xf32>
    %70 = arith.addf %63, %69 : vector<16x128xf32>
    %71 = vector.shape_cast %70 : vector<16x128xf32> to vector<4x4x128xf32>
    %c0_90 = arith.constant 0 : index
    %c0_91 = arith.constant 0 : index
    %c0_92 = arith.constant 0 : index
    %c0_93 = arith.constant 0 : index
    %c0_94 = arith.constant 0 : index
    %c0_95 = arith.constant 0 : index
    %72 = vector.load %arg6[%c0_90, %c0_91, %c0_92, %c0_93, %c0_94, %c0_95] : memref<1x2x2x4x4x128xf32, #tpu.memory_space<vmem>>, vector<1x1x1x4x4x128xf32>
    %73 = vector.shape_cast %72 : vector<1x1x1x4x4x128xf32> to vector<4x4x128xf32>
    %74 = vector.shape_cast %71 : vector<4x4x128xf32> to vector<1x1x1x4x4x128xf32>
    tpu.vector_store %arg6[%c0_90, %c0_91, %c0_92, %c0_93, %c0_94, %c0_95], %74 {strides = array<i32>} : memref<1x2x2x4x4x128xf32, #tpu.memory_space<vmem>>, vector<1x1x1x4x4x128xf32>,
    %cst_96 = arith.constant 0.000000e+00 : f32
    %75 = vector.broadcast %cst_96 : f32 to vector<4x4x128xf32>
    %76 = arith.maximumf %71, %75 : vector<4x4x128xf32>
    %77 = arith.truncf %76 : vector<4x4x128xf32> to vector<4x4x128xbf16>
    %c1_97 = arith.constant 1 : index
    %c1_98 = arith.constant 1 : index
    %c0_99 = arith.constant 0 : index
    %c0_100 = arith.constant 0 : index
    %c0_101 = arith.constant 0 : index
    %78 = vector.load %arg8[%c1_97, %c1_98, %c0_99, %c0_100, %c0_101] : memref<2x2x5x5x128xbf16, #tpu.memory_space<vmem>>, vector<1x1x4x4x128xbf16>
    %79 = vector.shape_cast %78 : vector<1x1x4x4x128xbf16> to vector<4x4x128xbf16>
    %80 = vector.shape_cast %77 : vector<4x4x128xbf16> to vector<1x1x4x4x128xbf16>
    tpu.vector_store %arg8[%c1_97, %c1_98, %c0_99, %c0_100, %c0_101], %80 {strides = array<i32>} : memref<2x2x5x5x128xbf16, #tpu.memory_space<vmem>>, vector<1x1x4x4x128xbf16>,
    %c0_102 = arith.constant 0 : index
    %c0_103 = arith.constant 0 : index
    %c2_104 = arith.constant 2 : index
    %c0_105 = arith.constant 0 : index
    %c0_106 = arith.constant 0 : index
    %c0_107 = arith.constant 0 : index
    %81 = vector.load %arg1[%c0_102, %c0_103, %c2_104, %c0_105, %c0_106, %c0_107] : memref<1x4x4x5x5x128xbf16, #tpu.memory_space<vmem>>, vector<1x1x1x4x4x128xbf16>
    %82 = vector.shape_cast %81 : vector<1x1x1x4x4x128xbf16> to vector<4x4x128xbf16>
    %83 = vector.shape_cast %82 : vector<4x4x128xbf16> to vector<16x128xbf16>
    %c0_108 = arith.constant 0 : index
    %c0_109 = arith.constant 0 : index
    %c0_110 = arith.constant 0 : index
    %84 = vector.load %arg2[%c0_108, %c0_109, %c0_110] : memref<9x128x128xbf16, #tpu.memory_space<vmem>>, vector<1x128x128xbf16>
    %85 = vector.shape_cast %84 : vector<1x128x128xbf16> to vector<128x128xbf16>
    %cst_111 = arith.constant dense<0.000000e+00> : vector<16x128xf32>
    %86 = tpu.matmul %83, %85, %cst_111 {dimension_numbers = #tpu.dot_dimension_numbers<[1], [0], [0], [1], [0, 0, 1, 1], [], []>} : vector<16x128xbf16>, vector<128x128xbf16>, vector<16x128xf32> -> vector<16x128xf32>
    %87 = arith.addf %5, %86 : vector<16x128xf32>
    %c0_112 = arith.constant 0 : index
    %c0_113 = arith.constant 0 : index
    %c3_114 = arith.constant 3 : index
    %c0_115 = arith.constant 0 : index
    %c0_116 = arith.constant 0 : index
    %c0_117 = arith.constant 0 : index
    %88 = vector.load %arg1[%c0_112, %c0_113, %c3_114, %c0_115, %c0_116, %c0_117] : memref<1x4x4x5x5x128xbf16, #tpu.memory_space<vmem>>, vector<1x1x1x4x4x128xbf16>
    %89 = vector.shape_cast %88 : vector<1x1x1x4x4x128xbf16> to vector<4x4x128xbf16>
    %90 = vector.shape_cast %89 : vector<4x4x128xbf16> to vector<16x128xbf16>
    %c1_118 = arith.constant 1 : index
    %c0_119 = arith.constant 0 : index
    %c0_120 = arith.constant 0 : index
    %91 = vector.load %arg2[%c1_118, %c0_119, %c0_120] : memref<9x128x128xbf16, #tpu.memory_space<vmem>>, vector<1x128x128xbf16>
    %92 = vector.shape_cast %91 : vector<1x128x128xbf16> to vector<128x128xbf16>
    %cst_121 = arith.constant dense<0.000000e+00> : vector<16x128xf32>
    %93 = tpu.matmul %90, %92, %cst_121 {dimension_numbers = #tpu.dot_dimension_numbers<[1], [0], [0], [1], [0, 0, 1, 1], [], []>} : vector<16x128xbf16>, vector<128x128xbf16>, vector<16x128xf32> -> vector<16x128xf32>
    %94 = arith.addf %87, %93 : vector<16x128xf32>
    %c0_122 = arith.constant 0 : index
    %c0_123 = arith.constant 0 : index
    %c0_124 = arith.constant 0 : index
    %c0_125 = arith.constant 0 : index
    %c1_126 = arith.constant 1 : index
    %c0_127 = arith.constant 0 : index
    %95 = vector.load %arg1[%c0_122, %c0_123, %c0_124, %c0_125, %c1_126, %c0_127] : memref<1x4x4x5x5x128xbf16, #tpu.memory_space<vmem>>, vector<1x1x1x4x4x128xbf16>
    %96 = vector.shape_cast %95 : vector<1x1x1x4x4x128xbf16> to vector<4x4x128xbf16>
    %97 = vector.shape_cast %96 : vector<4x4x128xbf16> to vector<16x128xbf16>
    %c2_128 = arith.constant 2 : index
    %c0_129 = arith.constant 0 : index
    %c0_130 = arith.constant 0 : index
    %98 = vector.load %arg2[%c2_128, %c0_129, %c0_130] : memref<9x128x128xbf16, #tpu.memory_space<vmem>>, vector<1x128x128xbf16>
    %99 = vector.shape_cast %98 : vector<1x128x128xbf16> to vector<128x128xbf16>
    %cst_131 = arith.constant dense<0.000000e+00> : vector<16x128xf32>
    %100 = tpu.matmul %97, %99, %cst_131 {dimension_numbers = #tpu.dot_dimension_numbers<[1], [0], [0], [1], [0, 0, 1, 1], [], []>} : vector<16x128xbf16>, vector<128x128xbf16>, vector<16x128xf32> -> vector<16x128xf32>
    %101 = arith.addf %94, %100 : vector<16x128xf32>
    %c0_132 = arith.constant 0 : index
    %c1_133 = arith.constant 1 : index
    %c2_134 = arith.constant 2 : index
    %c0_135 = arith.constant 0 : index
    %c0_136 = arith.constant 0 : index
    %c0_137 = arith.constant 0 : index
    %102 = vector.load %arg1[%c0_132, %c1_133, %c2_134, %c0_135, %c0_136, %c0_137] : memref<1x4x4x5x5x128xbf16, #tpu.memory_space<vmem>>, vector<1x1x1x4x4x128xbf16>
    %103 = vector.shape_cast %102 : vector<1x1x1x4x4x128xbf16> to vector<4x4x128xbf16>
    %104 = vector.shape_cast %103 : vector<4x4x128xbf16> to vector<16x128xbf16>
    %c3_138 = arith.constant 3 : index
    %c0_139 = arith.constant 0 : index
    %c0_140 = arith.constant 0 : index
    %105 = vector.load %arg2[%c3_138, %c0_139, %c0_140] : memref<9x128x128xbf16, #tpu.memory_space<vmem>>, vector<1x128x128xbf16>
    %106 = vector.shape_cast %105 : vector<1x128x128xbf16> to vector<128x128xbf16>
    %cst_141 = arith.constant dense<0.000000e+00> : vector<16x128xf32>
    %107 = tpu.matmul %104, %106, %cst_141 {dimension_numbers = #tpu.dot_dimension_numbers<[1], [0], [0], [1], [0, 0, 1, 1], [], []>} : vector<16x128xbf16>, vector<128x128xbf16>, vector<16x128xf32> -> vector<16x128xf32>
    %108 = arith.addf %101, %107 : vector<16x128xf32>
    %c0_142 = arith.constant 0 : index
    %c1_143 = arith.constant 1 : index
    %c3_144 = arith.constant 3 : index
    %c0_145 = arith.constant 0 : index
    %c0_146 = arith.constant 0 : index
    %c0_147 = arith.constant 0 : index
    %109 = vector.load %arg1[%c0_142, %c1_143, %c3_144, %c0_145, %c0_146, %c0_147] : memref<1x4x4x5x5x128xbf16, #tpu.memory_space<vmem>>, vector<1x1x1x4x4x128xbf16>
    %110 = vector.shape_cast %109 : vector<1x1x1x4x4x128xbf16> to vector<4x4x128xbf16>
    %111 = vector.shape_cast %110 : vector<4x4x128xbf16> to vector<16x128xbf16>
    %c4_148 = arith.constant 4 : index
    %c0_149 = arith.constant 0 : index
    %c0_150 = arith.constant 0 : index
    %112 = vector.load %arg2[%c4_148, %c0_149, %c0_150] : memref<9x128x128xbf16, #tpu.memory_space<vmem>>, vector<1x128x128xbf16>
    %113 = vector.shape_cast %112 : vector<1x128x128xbf16> to vector<128x128xbf16>
    %cst_151 = arith.constant dense<0.000000e+00> : vector<16x128xf32>
    %114 = tpu.matmul %111, %113, %cst_151 {dimension_numbers = #tpu.dot_dimension_numbers<[1], [0], [0], [1], [0, 0, 1, 1], [], []>} : vector<16x128xbf16>, vector<128x128xbf16>, vector<16x128xf32> -> vector<16x128xf32>
    %115 = arith.addf %108, %114 : vector<16x128xf32>
    %c0_152 = arith.constant 0 : index
    %c1_153 = arith.constant 1 : index
    %c0_154 = arith.constant 0 : index
    %c0_155 = arith.constant 0 : index
    %c1_156 = arith.constant 1 : index
    %c0_157 = arith.constant 0 : index
    %116 = vector.load %arg1[%c0_152, %c1_153, %c0_154, %c0_155, %c1_156, %c0_157] : memref<1x4x4x5x5x128xbf16, #tpu.memory_space<vmem>>, vector<1x1x1x4x4x128xbf16>
    %117 = vector.shape_cast %116 : vector<1x1x1x4x4x128xbf16> to vector<4x4x128xbf16>
    %118 = vector.shape_cast %117 : vector<4x4x128xbf16> to vector<16x128xbf16>
    %c5_158 = arith.constant 5 : index
    %c0_159 = arith.constant 0 : index
    %c0_160 = arith.constant 0 : index
    %119 = vector.load %arg2[%c5_158, %c0_159, %c0_160] : memref<9x128x128xbf16, #tpu.memory_space<vmem>>, vector<1x128x128xbf16>
    %120 = vector.shape_cast %119 : vector<1x128x128xbf16> to vector<128x128xbf16>
    %cst_161 = arith.constant dense<0.000000e+00> : vector<16x128xf32>
    %121 = tpu.matmul %118, %120, %cst_161 {dimension_numbers = #tpu.dot_dimension_numbers<[1], [0], [0], [1], [0, 0, 1, 1], [], []>} : vector<16x128xbf16>, vector<128x128xbf16>, vector<16x128xf32> -> vector<16x128xf32>
    %122 = arith.addf %115, %121 : vector<16x128xf32>
    %c0_162 = arith.constant 0 : index
    %c2_163 = arith.constant 2 : index
    %c2_164 = arith.constant 2 : index
    %c0_165 = arith.constant 0 : index
    %c0_166 = arith.constant 0 : index
    %c0_167 = arith.constant 0 : index
    %123 = vector.load %arg1[%c0_162, %c2_163, %c2_164, %c0_165, %c0_166, %c0_167] : memref<1x4x4x5x5x128xbf16, #tpu.memory_space<vmem>>, vector<1x1x1x4x4x128xbf16>
    %124 = vector.shape_cast %123 : vector<1x1x1x4x4x128xbf16> to vector<4x4x128xbf16>
    %125 = vector.shape_cast %124 : vector<4x4x128xbf16> to vector<16x128xbf16>
    %c6_168 = arith.constant 6 : index
    %c0_169 = arith.constant 0 : index
    %c0_170 = arith.constant 0 : index
    %126 = vector.load %arg2[%c6_168, %c0_169, %c0_170] : memref<9x128x128xbf16, #tpu.memory_space<vmem>>, vector<1x128x128xbf16>
    %127 = vector.shape_cast %126 : vector<1x128x128xbf16> to vector<128x128xbf16>
    %cst_171 = arith.constant dense<0.000000e+00> : vector<16x128xf32>
    %128 = tpu.matmul %125, %127, %cst_171 {dimension_numbers = #tpu.dot_dimension_numbers<[1], [0], [0], [1], [0, 0, 1, 1], [], []>} : vector<16x128xbf16>, vector<128x128xbf16>, vector<16x128xf32> -> vector<16x128xf32>
    %129 = arith.addf %122, %128 : vector<16x128xf32>
    %c0_172 = arith.constant 0 : index
    %c2_173 = arith.constant 2 : index
    %c3_174 = arith.constant 3 : index
    %c0_175 = arith.constant 0 : index
    %c0_176 = arith.constant 0 : index
    %c0_177 = arith.constant 0 : index
    %130 = vector.load %arg1[%c0_172, %c2_173, %c3_174, %c0_175, %c0_176, %c0_177] : memref<1x4x4x5x5x128xbf16, #tpu.memory_space<vmem>>, vector<1x1x1x4x4x128xbf16>
    %131 = vector.shape_cast %130 : vector<1x1x1x4x4x128xbf16> to vector<4x4x128xbf16>
    %132 = vector.shape_cast %131 : vector<4x4x128xbf16> to vector<16x128xbf16>
    %c7_178 = arith.constant 7 : index
    %c0_179 = arith.constant 0 : index
    %c0_180 = arith.constant 0 : index
    %133 = vector.load %arg2[%c7_178, %c0_179, %c0_180] : memref<9x128x128xbf16, #tpu.memory_space<vmem>>, vector<1x128x128xbf16>
    %134 = vector.shape_cast %133 : vector<1x128x128xbf16> to vector<128x128xbf16>
    %cst_181 = arith.constant dense<0.000000e+00> : vector<16x128xf32>
    %135 = tpu.matmul %132, %134, %cst_181 {dimension_numbers = #tpu.dot_dimension_numbers<[1], [0], [0], [1], [0, 0, 1, 1], [], []>} : vector<16x128xbf16>, vector<128x128xbf16>, vector<16x128xf32> -> vector<16x128xf32>
    %136 = arith.addf %129, %135 : vector<16x128xf32>
    %c0_182 = arith.constant 0 : index
    %c2_183 = arith.constant 2 : index
    %c0_184 = arith.constant 0 : index
    %c0_185 = arith.constant 0 : index
    %c1_186 = arith.constant 1 : index
    %c0_187 = arith.constant 0 : index
    %137 = vector.load %arg1[%c0_182, %c2_183, %c0_184, %c0_185, %c1_186, %c0_187] : memref<1x4x4x5x5x128xbf16, #tpu.memory_space<vmem>>, vector<1x1x1x4x4x128xbf16>
    %138 = vector.shape_cast %137 : vector<1x1x1x4x4x128xbf16> to vector<4x4x128xbf16>
    %139 = vector.shape_cast %138 : vector<4x4x128xbf16> to vector<16x128xbf16>
    %c8_188 = arith.constant 8 : index
    %c0_189 = arith.constant 0 : index
    %c0_190 = arith.constant 0 : index
    %140 = vector.load %arg2[%c8_188, %c0_189, %c0_190] : memref<9x128x128xbf16, #tpu.memory_space<vmem>>, vector<1x128x128xbf16>
    %141 = vector.shape_cast %140 : vector<1x128x128xbf16> to vector<128x128xbf16>
    %cst_191 = arith.constant dense<0.000000e+00> : vector<16x128xf32>
    %142 = tpu.matmul %139, %141, %cst_191 {dimension_numbers = #tpu.dot_dimension_numbers<[1], [0], [0], [1], [0, 0, 1, 1], [], []>} : vector<16x128xbf16>, vector<128x128xbf16>, vector<16x128xf32> -> vector<16x128xf32>
    %143 = arith.addf %136, %142 : vector<16x128xf32>
    %144 = vector.shape_cast %143 : vector<16x128xf32> to vector<4x4x128xf32>
    %c0_192 = arith.constant 0 : index
    %c0_193 = arith.constant 0 : index
    %c1_194 = arith.constant 1 : index
    %c0_195 = arith.constant 0 : index
    %c0_196 = arith.constant 0 : index
    %c0_197 = arith.constant 0 : index
    %145 = vector.load %arg6[%c0_192, %c0_193, %c1_194, %c0_195, %c0_196, %c0_197] : memref<1x2x2x4x4x128xf32, #tpu.memory_space<vmem>>, vector<1x1x1x4x4x128xf32>
    %146 = vector.shape_cast %145 : vector<1x1x1x4x4x128xf32> to vector<4x4x128xf32>
    %147 = vector.shape_cast %144 : vector<4x4x128xf32> to vector<1x1x1x4x4x128xf32>
    tpu.vector_store %arg6[%c0_192, %c0_193, %c1_194, %c0_195, %c0_196, %c0_197], %147 {strides = array<i32>} : memref<1x2x2x4x4x128xf32, #tpu.memory_space<vmem>>, vector<1x1x1x4x4x128xf32>,
    %cst_198 = arith.constant 0.000000e+00 : f32
    %148 = vector.broadcast %cst_198 : f32 to vector<4x4x128xf32>
    %149 = arith.maximumf %144, %148 : vector<4x4x128xf32>
    %150 = arith.truncf %149 : vector<4x4x128xf32> to vector<4x4x128xbf16>
    %c1_199 = arith.constant 1 : index
    %c0_200 = arith.constant 0 : index
    %c0_201 = arith.constant 0 : index
    %c1_202 = arith.constant 1 : index
    %c0_203 = arith.constant 0 : index
    %151 = vector.load %arg8[%c1_199, %c0_200, %c0_201, %c1_202, %c0_203] : memref<2x2x5x5x128xbf16, #tpu.memory_space<vmem>>, vector<1x1x4x4x128xbf16>
    %152 = vector.shape_cast %151 : vector<1x1x4x4x128xbf16> to vector<4x4x128xbf16>
    %153 = vector.shape_cast %150 : vector<4x4x128xbf16> to vector<1x1x4x4x128xbf16>
    tpu.vector_store %arg8[%c1_199, %c0_200, %c0_201, %c1_202, %c0_203], %153 {strides = array<i32>} : memref<2x2x5x5x128xbf16, #tpu.memory_space<vmem>>, vector<1x1x4x4x128xbf16>,
    %c0_204 = arith.constant 0 : index
    %c2_205 = arith.constant 2 : index
    %c0_206 = arith.constant 0 : index
    %c0_207 = arith.constant 0 : index
    %c0_208 = arith.constant 0 : index
    %c0_209 = arith.constant 0 : index
    %154 = vector.load %arg1[%c0_204, %c2_205, %c0_206, %c0_207, %c0_208, %c0_209] : memref<1x4x4x5x5x128xbf16, #tpu.memory_space<vmem>>, vector<1x1x1x4x4x128xbf16>
    %155 = vector.shape_cast %154 : vector<1x1x1x4x4x128xbf16> to vector<4x4x128xbf16>
    %156 = vector.shape_cast %155 : vector<4x4x128xbf16> to vector<16x128xbf16>
    %c0_210 = arith.constant 0 : index
    %c0_211 = arith.constant 0 : index
    %c0_212 = arith.constant 0 : index
    %157 = vector.load %arg2[%c0_210, %c0_211, %c0_212] : memref<9x128x128xbf16, #tpu.memory_space<vmem>>, vector<1x128x128xbf16>
    %158 = vector.shape_cast %157 : vector<1x128x128xbf16> to vector<128x128xbf16>
    %cst_213 = arith.constant dense<0.000000e+00> : vector<16x128xf32>
    %159 = tpu.matmul %156, %158, %cst_213 {dimension_numbers = #tpu.dot_dimension_numbers<[1], [0], [0], [1], [0, 0, 1, 1], [], []>} : vector<16x128xbf16>, vector<128x128xbf16>, vector<16x128xf32> -> vector<16x128xf32>
    %160 = arith.addf %5, %159 : vector<16x128xf32>
    %c0_214 = arith.constant 0 : index
    %c2_215 = arith.constant 2 : index
    %c1_216 = arith.constant 1 : index
    %c0_217 = arith.constant 0 : index
    %c0_218 = arith.constant 0 : index
    %c0_219 = arith.constant 0 : index
    %161 = vector.load %arg1[%c0_214, %c2_215, %c1_216, %c0_217, %c0_218, %c0_219] : memref<1x4x4x5x5x128xbf16, #tpu.memory_space<vmem>>, vector<1x1x1x4x4x128xbf16>
    %162 = vector.shape_cast %161 : vector<1x1x1x4x4x128xbf16> to vector<4x4x128xbf16>
    %163 = vector.shape_cast %162 : vector<4x4x128xbf16> to vector<16x128xbf16>
    %c1_220 = arith.constant 1 : index
    %c0_221 = arith.constant 0 : index
    %c0_222 = arith.constant 0 : index
    %164 = vector.load %arg2[%c1_220, %c0_221, %c0_222] : memref<9x128x128xbf16, #tpu.memory_space<vmem>>, vector<1x128x128xbf16>
    %165 = vector.shape_cast %164 : vector<1x128x128xbf16> to vector<128x128xbf16>
    %cst_223 = arith.constant dense<0.000000e+00> : vector<16x128xf32>
    %166 = tpu.matmul %163, %165, %cst_223 {dimension_numbers = #tpu.dot_dimension_numbers<[1], [0], [0], [1], [0, 0, 1, 1], [], []>} : vector<16x128xbf16>, vector<128x128xbf16>, vector<16x128xf32> -> vector<16x128xf32>
    %167 = arith.addf %160, %166 : vector<16x128xf32>
    %c0_224 = arith.constant 0 : index
    %c2_225 = arith.constant 2 : index
    %c2_226 = arith.constant 2 : index
    %c0_227 = arith.constant 0 : index
    %c0_228 = arith.constant 0 : index
    %c0_229 = arith.constant 0 : index
    %168 = vector.load %arg1[%c0_224, %c2_225, %c2_226, %c0_227, %c0_228, %c0_229] : memref<1x4x4x5x5x128xbf16, #tpu.memory_space<vmem>>, vector<1x1x1x4x4x128xbf16>
    %169 = vector.shape_cast %168 : vector<1x1x1x4x4x128xbf16> to vector<4x4x128xbf16>
    %170 = vector.shape_cast %169 : vector<4x4x128xbf16> to vector<16x128xbf16>
    %c2_230 = arith.constant 2 : index
    %c0_231 = arith.constant 0 : index
    %c0_232 = arith.constant 0 : index
    %171 = vector.load %arg2[%c2_230, %c0_231, %c0_232] : memref<9x128x128xbf16, #tpu.memory_space<vmem>>, vector<1x128x128xbf16>
    %172 = vector.shape_cast %171 : vector<1x128x128xbf16> to vector<128x128xbf16>
    %cst_233 = arith.constant dense<0.000000e+00> : vector<16x128xf32>
    %173 = tpu.matmul %170, %172, %cst_233 {dimension_numbers = #tpu.dot_dimension_numbers<[1], [0], [0], [1], [0, 0, 1, 1], [], []>} : vector<16x128xbf16>, vector<128x128xbf16>, vector<16x128xf32> -> vector<16x128xf32>
    %174 = arith.addf %167, %173 : vector<16x128xf32>
    %c0_234 = arith.constant 0 : index
    %c3_235 = arith.constant 3 : index
    %c0_236 = arith.constant 0 : index
    %c0_237 = arith.constant 0 : index
    %c0_238 = arith.constant 0 : index
    %c0_239 = arith.constant 0 : index
    %175 = vector.load %arg1[%c0_234, %c3_235, %c0_236, %c0_237, %c0_238, %c0_239] : memref<1x4x4x5x5x128xbf16, #tpu.memory_space<vmem>>, vector<1x1x1x4x4x128xbf16>
    %176 = vector.shape_cast %175 : vector<1x1x1x4x4x128xbf16> to vector<4x4x128xbf16>
    %177 = vector.shape_cast %176 : vector<4x4x128xbf16> to vector<16x128xbf16>
    %c3_240 = arith.constant 3 : index
    %c0_241 = arith.constant 0 : index
    %c0_242 = arith.constant 0 : index
    %178 = vector.load %arg2[%c3_240, %c0_241, %c0_242] : memref<9x128x128xbf16, #tpu.memory_space<vmem>>, vector<1x128x128xbf16>
    %179 = vector.shape_cast %178 : vector<1x128x128xbf16> to vector<128x128xbf16>
    %cst_243 = arith.constant dense<0.000000e+00> : vector<16x128xf32>
    %180 = tpu.matmul %177, %179, %cst_243 {dimension_numbers = #tpu.dot_dimension_numbers<[1], [0], [0], [1], [0, 0, 1, 1], [], []>} : vector<16x128xbf16>, vector<128x128xbf16>, vector<16x128xf32> -> vector<16x128xf32>
    %181 = arith.addf %174, %180 : vector<16x128xf32>
    %c0_244 = arith.constant 0 : index
    %c3_245 = arith.constant 3 : index
    %c1_246 = arith.constant 1 : index
    %c0_247 = arith.constant 0 : index
    %c0_248 = arith.constant 0 : index
    %c0_249 = arith.constant 0 : index
    %182 = vector.load %arg1[%c0_244, %c3_245, %c1_246, %c0_247, %c0_248, %c0_249] : memref<1x4x4x5x5x128xbf16, #tpu.memory_space<vmem>>, vector<1x1x1x4x4x128xbf16>
    %183 = vector.shape_cast %182 : vector<1x1x1x4x4x128xbf16> to vector<4x4x128xbf16>
    %184 = vector.shape_cast %183 : vector<4x4x128xbf16> to vector<16x128xbf16>
    %c4_250 = arith.constant 4 : index
    %c0_251 = arith.constant 0 : index
    %c0_252 = arith.constant 0 : index
    %185 = vector.load %arg2[%c4_250, %c0_251, %c0_252] : memref<9x128x128xbf16, #tpu.memory_space<vmem>>, vector<1x128x128xbf16>
    %186 = vector.shape_cast %185 : vector<1x128x128xbf16> to vector<128x128xbf16>
    %cst_253 = arith.constant dense<0.000000e+00> : vector<16x128xf32>
    %187 = tpu.matmul %184, %186, %cst_253 {dimension_numbers = #tpu.dot_dimension_numbers<[1], [0], [0], [1], [0, 0, 1, 1], [], []>} : vector<16x128xbf16>, vector<128x128xbf16>, vector<16x128xf32> -> vector<16x128xf32>
    %188 = arith.addf %181, %187 : vector<16x128xf32>
    %c0_254 = arith.constant 0 : index
    %c3_255 = arith.constant 3 : index
    %c2_256 = arith.constant 2 : index
    %c0_257 = arith.constant 0 : index
    %c0_258 = arith.constant 0 : index
    %c0_259 = arith.constant 0 : index
    %189 = vector.load %arg1[%c0_254, %c3_255, %c2_256, %c0_257, %c0_258, %c0_259] : memref<1x4x4x5x5x128xbf16, #tpu.memory_space<vmem>>, vector<1x1x1x4x4x128xbf16>
    %190 = vector.shape_cast %189 : vector<1x1x1x4x4x128xbf16> to vector<4x4x128xbf16>
    %191 = vector.shape_cast %190 : vector<4x4x128xbf16> to vector<16x128xbf16>
    %c5_260 = arith.constant 5 : index
    %c0_261 = arith.constant 0 : index
    %c0_262 = arith.constant 0 : index
    %192 = vector.load %arg2[%c5_260, %c0_261, %c0_262] : memref<9x128x128xbf16, #tpu.memory_space<vmem>>, vector<1x128x128xbf16>
    %193 = vector.shape_cast %192 : vector<1x128x128xbf16> to vector<128x128xbf16>
    %cst_263 = arith.constant dense<0.000000e+00> : vector<16x128xf32>
    %194 = tpu.matmul %191, %193, %cst_263 {dimension_numbers = #tpu.dot_dimension_numbers<[1], [0], [0], [1], [0, 0, 1, 1], [], []>} : vector<16x128xbf16>, vector<128x128xbf16>, vector<16x128xf32> -> vector<16x128xf32>
    %195 = arith.addf %188, %194 : vector<16x128xf32>
    %c0_264 = arith.constant 0 : index
    %c0_265 = arith.constant 0 : index
    %c0_266 = arith.constant 0 : index
    %c1_267 = arith.constant 1 : index
    %c0_268 = arith.constant 0 : index
    %c0_269 = arith.constant 0 : index
    %196 = vector.load %arg1[%c0_264, %c0_265, %c0_266, %c1_267, %c0_268, %c0_269] : memref<1x4x4x5x5x128xbf16, #tpu.memory_space<vmem>>, vector<1x1x1x4x4x128xbf16>
    %197 = vector.shape_cast %196 : vector<1x1x1x4x4x128xbf16> to vector<4x4x128xbf16>
    %198 = vector.shape_cast %197 : vector<4x4x128xbf16> to vector<16x128xbf16>
    %c6_270 = arith.constant 6 : index
    %c0_271 = arith.constant 0 : index
    %c0_272 = arith.constant 0 : index
    %199 = vector.load %arg2[%c6_270, %c0_271, %c0_272] : memref<9x128x128xbf16, #tpu.memory_space<vmem>>, vector<1x128x128xbf16>
    %200 = vector.shape_cast %199 : vector<1x128x128xbf16> to vector<128x128xbf16>
    %cst_273 = arith.constant dense<0.000000e+00> : vector<16x128xf32>
    %201 = tpu.matmul %198, %200, %cst_273 {dimension_numbers = #tpu.dot_dimension_numbers<[1], [0], [0], [1], [0, 0, 1, 1], [], []>} : vector<16x128xbf16>, vector<128x128xbf16>, vector<16x128xf32> -> vector<16x128xf32>
    %202 = arith.addf %195, %201 : vector<16x128xf32>
    %c0_274 = arith.constant 0 : index
    %c0_275 = arith.constant 0 : index
    %c1_276 = arith.constant 1 : index
    %c1_277 = arith.constant 1 : index
    %c0_278 = arith.constant 0 : index
    %c0_279 = arith.constant 0 : index
    %203 = vector.load %arg1[%c0_274, %c0_275, %c1_276, %c1_277, %c0_278, %c0_279] : memref<1x4x4x5x5x128xbf16, #tpu.memory_space<vmem>>, vector<1x1x1x4x4x128xbf16>
    %204 = vector.shape_cast %203 : vector<1x1x1x4x4x128xbf16> to vector<4x4x128xbf16>
    %205 = vector.shape_cast %204 : vector<4x4x128xbf16> to vector<16x128xbf16>
    %c7_280 = arith.constant 7 : index
    %c0_281 = arith.constant 0 : index
    %c0_282 = arith.constant 0 : index
    %206 = vector.load %arg2[%c7_280, %c0_281, %c0_282] : memref<9x128x128xbf16, #tpu.memory_space<vmem>>, vector<1x128x128xbf16>
    %207 = vector.shape_cast %206 : vector<1x128x128xbf16> to vector<128x128xbf16>
    %cst_283 = arith.constant dense<0.000000e+00> : vector<16x128xf32>
    %208 = tpu.matmul %205, %207, %cst_283 {dimension_numbers = #tpu.dot_dimension_numbers<[1], [0], [0], [1], [0, 0, 1, 1], [], []>} : vector<16x128xbf16>, vector<128x128xbf16>, vector<16x128xf32> -> vector<16x128xf32>
    %209 = arith.addf %202, %208 : vector<16x128xf32>
    %c0_284 = arith.constant 0 : index
    %c0_285 = arith.constant 0 : index
    %c2_286 = arith.constant 2 : index
    %c1_287 = arith.constant 1 : index
    %c0_288 = arith.constant 0 : index
    %c0_289 = arith.constant 0 : index
    %210 = vector.load %arg1[%c0_284, %c0_285, %c2_286, %c1_287, %c0_288, %c0_289] : memref<1x4x4x5x5x128xbf16, #tpu.memory_space<vmem>>, vector<1x1x1x4x4x128xbf16>
    %211 = vector.shape_cast %210 : vector<1x1x1x4x4x128xbf16> to vector<4x4x128xbf16>
    %212 = vector.shape_cast %211 : vector<4x4x128xbf16> to vector<16x128xbf16>
    %c8_290 = arith.constant 8 : index
    %c0_291 = arith.constant 0 : index
    %c0_292 = arith.constant 0 : index
    %213 = vector.load %arg2[%c8_290, %c0_291, %c0_292] : memref<9x128x128xbf16, #tpu.memory_space<vmem>>, vector<1x128x128xbf16>
    %214 = vector.shape_cast %213 : vector<1x128x128xbf16> to vector<128x128xbf16>
    %cst_293 = arith.constant dense<0.000000e+00> : vector<16x128xf32>
    %215 = tpu.matmul %212, %214, %cst_293 {dimension_numbers = #tpu.dot_dimension_numbers<[1], [0], [0], [1], [0, 0, 1, 1], [], []>} : vector<16x128xbf16>, vector<128x128xbf16>, vector<16x128xf32> -> vector<16x128xf32>
    %216 = arith.addf %209, %215 : vector<16x128xf32>
    %217 = vector.shape_cast %216 : vector<16x128xf32> to vector<4x4x128xf32>
    %c0_294 = arith.constant 0 : index
    %c1_295 = arith.constant 1 : index
    %c0_296 = arith.constant 0 : index
    %c0_297 = arith.constant 0 : index
    %c0_298 = arith.constant 0 : index
    %c0_299 = arith.constant 0 : index
    %218 = vector.load %arg6[%c0_294, %c1_295, %c0_296, %c0_297, %c0_298, %c0_299] : memref<1x2x2x4x4x128xf32, #tpu.memory_space<vmem>>, vector<1x1x1x4x4x128xf32>
    %219 = vector.shape_cast %218 : vector<1x1x1x4x4x128xf32> to vector<4x4x128xf32>
    %220 = vector.shape_cast %217 : vector<4x4x128xf32> to vector<1x1x1x4x4x128xf32>
    tpu.vector_store %arg6[%c0_294, %c1_295, %c0_296, %c0_297, %c0_298, %c0_299], %220 {strides = array<i32>} : memref<1x2x2x4x4x128xf32, #tpu.memory_space<vmem>>, vector<1x1x1x4x4x128xf32>,
    %cst_300 = arith.constant 0.000000e+00 : f32
    %221 = vector.broadcast %cst_300 : f32 to vector<4x4x128xf32>
    %222 = arith.maximumf %217, %221 : vector<4x4x128xf32>
    %223 = arith.truncf %222 : vector<4x4x128xf32> to vector<4x4x128xbf16>
    %c0_301 = arith.constant 0 : index
    %c1_302 = arith.constant 1 : index
    %c1_303 = arith.constant 1 : index
    %c0_304 = arith.constant 0 : index
    %c0_305 = arith.constant 0 : index
    %224 = vector.load %arg8[%c0_301, %c1_302, %c1_303, %c0_304, %c0_305] : memref<2x2x5x5x128xbf16, #tpu.memory_space<vmem>>, vector<1x1x4x4x128xbf16>
    %225 = vector.shape_cast %224 : vector<1x1x4x4x128xbf16> to vector<4x4x128xbf16>
    %226 = vector.shape_cast %223 : vector<4x4x128xbf16> to vector<1x1x4x4x128xbf16>
    tpu.vector_store %arg8[%c0_301, %c1_302, %c1_303, %c0_304, %c0_305], %226 {strides = array<i32>} : memref<2x2x5x5x128xbf16, #tpu.memory_space<vmem>>, vector<1x1x4x4x128xbf16>,
    %c0_306 = arith.constant 0 : index
    %c2_307 = arith.constant 2 : index
    %c2_308 = arith.constant 2 : index
    %c0_309 = arith.constant 0 : index
    %c0_310 = arith.constant 0 : index
    %c0_311 = arith.constant 0 : index
    %227 = vector.load %arg1[%c0_306, %c2_307, %c2_308, %c0_309, %c0_310, %c0_311] : memref<1x4x4x5x5x128xbf16, #tpu.memory_space<vmem>>, vector<1x1x1x4x4x128xbf16>
    %228 = vector.shape_cast %227 : vector<1x1x1x4x4x128xbf16> to vector<4x4x128xbf16>
    %229 = vector.shape_cast %228 : vector<4x4x128xbf16> to vector<16x128xbf16>
    %c0_312 = arith.constant 0 : index
    %c0_313 = arith.constant 0 : index
    %c0_314 = arith.constant 0 : index
    %230 = vector.load %arg2[%c0_312, %c0_313, %c0_314] : memref<9x128x128xbf16, #tpu.memory_space<vmem>>, vector<1x128x128xbf16>
    %231 = vector.shape_cast %230 : vector<1x128x128xbf16> to vector<128x128xbf16>
    %cst_315 = arith.constant dense<0.000000e+00> : vector<16x128xf32>
    %232 = tpu.matmul %229, %231, %cst_315 {dimension_numbers = #tpu.dot_dimension_numbers<[1], [0], [0], [1], [0, 0, 1, 1], [], []>} : vector<16x128xbf16>, vector<128x128xbf16>, vector<16x128xf32> -> vector<16x128xf32>
    %233 = arith.addf %5, %232 : vector<16x128xf32>
    %c0_316 = arith.constant 0 : index
    %c2_317 = arith.constant 2 : index
    %c3_318 = arith.constant 3 : index
    %c0_319 = arith.constant 0 : index
    %c0_320 = arith.constant 0 : index
    %c0_321 = arith.constant 0 : index
    %234 = vector.load %arg1[%c0_316, %c2_317, %c3_318, %c0_319, %c0_320, %c0_321] : memref<1x4x4x5x5x128xbf16, #tpu.memory_space<vmem>>, vector<1x1x1x4x4x128xbf16>
    %235 = vector.shape_cast %234 : vector<1x1x1x4x4x128xbf16> to vector<4x4x128xbf16>
    %236 = vector.shape_cast %235 : vector<4x4x128xbf16> to vector<16x128xbf16>
    %c1_322 = arith.constant 1 : index
    %c0_323 = arith.constant 0 : index
    %c0_324 = arith.constant 0 : index
    %237 = vector.load %arg2[%c1_322, %c0_323, %c0_324] : memref<9x128x128xbf16, #tpu.memory_space<vmem>>, vector<1x128x128xbf16>
    %238 = vector.shape_cast %237 : vector<1x128x128xbf16> to vector<128x128xbf16>
    %cst_325 = arith.constant dense<0.000000e+00> : vector<16x128xf32>
    %239 = tpu.matmul %236, %238, %cst_325 {dimension_numbers = #tpu.dot_dimension_numbers<[1], [0], [0], [1], [0, 0, 1, 1], [], []>} : vector<16x128xbf16>, vector<128x128xbf16>, vector<16x128xf32> -> vector<16x128xf32>
    %240 = arith.addf %233, %239 : vector<16x128xf32>
    %c0_326 = arith.constant 0 : index
    %c2_327 = arith.constant 2 : index
    %c0_328 = arith.constant 0 : index
    %c0_329 = arith.constant 0 : index
    %c1_330 = arith.constant 1 : index
    %c0_331 = arith.constant 0 : index
    %241 = vector.load %arg1[%c0_326, %c2_327, %c0_328, %c0_329, %c1_330, %c0_331] : memref<1x4x4x5x5x128xbf16, #tpu.memory_space<vmem>>, vector<1x1x1x4x4x128xbf16>
    %242 = vector.shape_cast %241 : vector<1x1x1x4x4x128xbf16> to vector<4x4x128xbf16>
    %243 = vector.shape_cast %242 : vector<4x4x128xbf16> to vector<16x128xbf16>
    %c2_332 = arith.constant 2 : index
    %c0_333 = arith.constant 0 : index
    %c0_334 = arith.constant 0 : index
    %244 = vector.load %arg2[%c2_332, %c0_333, %c0_334] : memref<9x128x128xbf16, #tpu.memory_space<vmem>>, vector<1x128x128xbf16>
    %245 = vector.shape_cast %244 : vector<1x128x128xbf16> to vector<128x128xbf16>
    %cst_335 = arith.constant dense<0.000000e+00> : vector<16x128xf32>
    %246 = tpu.matmul %243, %245, %cst_335 {dimension_numbers = #tpu.dot_dimension_numbers<[1], [0], [0], [1], [0, 0, 1, 1], [], []>} : vector<16x128xbf16>, vector<128x128xbf16>, vector<16x128xf32> -> vector<16x128xf32>
    %247 = arith.addf %240, %246 : vector<16x128xf32>
    %c0_336 = arith.constant 0 : index
    %c3_337 = arith.constant 3 : index
    %c2_338 = arith.constant 2 : index
    %c0_339 = arith.constant 0 : index
    %c0_340 = arith.constant 0 : index
    %c0_341 = arith.constant 0 : index
    %248 = vector.load %arg1[%c0_336, %c3_337, %c2_338, %c0_339, %c0_340, %c0_341] : memref<1x4x4x5x5x128xbf16, #tpu.memory_space<vmem>>, vector<1x1x1x4x4x128xbf16>
    %249 = vector.shape_cast %248 : vector<1x1x1x4x4x128xbf16> to vector<4x4x128xbf16>
    %250 = vector.shape_cast %249 : vector<4x4x128xbf16> to vector<16x128xbf16>
    %c3_342 = arith.constant 3 : index
    %c0_343 = arith.constant 0 : index
    %c0_344 = arith.constant 0 : index
    %251 = vector.load %arg2[%c3_342, %c0_343, %c0_344] : memref<9x128x128xbf16, #tpu.memory_space<vmem>>, vector<1x128x128xbf16>
    %252 = vector.shape_cast %251 : vector<1x128x128xbf16> to vector<128x128xbf16>
    %cst_345 = arith.constant dense<0.000000e+00> : vector<16x128xf32>
    %253 = tpu.matmul %250, %252, %cst_345 {dimension_numbers = #tpu.dot_dimension_numbers<[1], [0], [0], [1], [0, 0, 1, 1], [], []>} : vector<16x128xbf16>, vector<128x128xbf16>, vector<16x128xf32> -> vector<16x128xf32>
    %254 = arith.addf %247, %253 : vector<16x128xf32>
    %c0_346 = arith.constant 0 : index
    %c3_347 = arith.constant 3 : index
    %c3_348 = arith.constant 3 : index
    %c0_349 = arith.constant 0 : index
    %c0_350 = arith.constant 0 : index
    %c0_351 = arith.constant 0 : index
    %255 = vector.load %arg1[%c0_346, %c3_347, %c3_348, %c0_349, %c0_350, %c0_351] : memref<1x4x4x5x5x128xbf16, #tpu.memory_space<vmem>>, vector<1x1x1x4x4x128xbf16>
    %256 = vector.shape_cast %255 : vector<1x1x1x4x4x128xbf16> to vector<4x4x128xbf16>
    %257 = vector.shape_cast %256 : vector<4x4x128xbf16> to vector<16x128xbf16>
    %c4_352 = arith.constant 4 : index
    %c0_353 = arith.constant 0 : index
    %c0_354 = arith.constant 0 : index
    %258 = vector.load %arg2[%c4_352, %c0_353, %c0_354] : memref<9x128x128xbf16, #tpu.memory_space<vmem>>, vector<1x128x128xbf16>
    %259 = vector.shape_cast %258 : vector<1x128x128xbf16> to vector<128x128xbf16>
    %cst_355 = arith.constant dense<0.000000e+00> : vector<16x128xf32>
    %260 = tpu.matmul %257, %259, %cst_355 {dimension_numbers = #tpu.dot_dimension_numbers<[1], [0], [0], [1], [0, 0, 1, 1], [], []>} : vector<16x128xbf16>, vector<128x128xbf16>, vector<16x128xf32> -> vector<16x128xf32>
    %261 = arith.addf %254, %260 : vector<16x128xf32>
    %c0_356 = arith.constant 0 : index
    %c3_357 = arith.constant 3 : index
    %c0_358 = arith.constant 0 : index
    %c0_359 = arith.constant 0 : index
    %c1_360 = arith.constant 1 : index
    %c0_361 = arith.constant 0 : index
    %262 = vector.load %arg1[%c0_356, %c3_357, %c0_358, %c0_359, %c1_360, %c0_361] : memref<1x4x4x5x5x128xbf16, #tpu.memory_space<vmem>>, vector<1x1x1x4x4x128xbf16>
    %263 = vector.shape_cast %262 : vector<1x1x1x4x4x128xbf16> to vector<4x4x128xbf16>
    %264 = vector.shape_cast %263 : vector<4x4x128xbf16> to vector<16x128xbf16>
    %c5_362 = arith.constant 5 : index
    %c0_363 = arith.constant 0 : index
    %c0_364 = arith.constant 0 : index
    %265 = vector.load %arg2[%c5_362, %c0_363, %c0_364] : memref<9x128x128xbf16, #tpu.memory_space<vmem>>, vector<1x128x128xbf16>
    %266 = vector.shape_cast %265 : vector<1x128x128xbf16> to vector<128x128xbf16>
    %cst_365 = arith.constant dense<0.000000e+00> : vector<16x128xf32>
    %267 = tpu.matmul %264, %266, %cst_365 {dimension_numbers = #tpu.dot_dimension_numbers<[1], [0], [0], [1], [0, 0, 1, 1], [], []>} : vector<16x128xbf16>, vector<128x128xbf16>, vector<16x128xf32> -> vector<16x128xf32>
    %268 = arith.addf %261, %267 : vector<16x128xf32>
    %c0_366 = arith.constant 0 : index
    %c0_367 = arith.constant 0 : index
    %c2_368 = arith.constant 2 : index
    %c1_369 = arith.constant 1 : index
    %c0_370 = arith.constant 0 : index
    %c0_371 = arith.constant 0 : index
    %269 = vector.load %arg1[%c0_366, %c0_367, %c2_368, %c1_369, %c0_370, %c0_371] : memref<1x4x4x5x5x128xbf16, #tpu.memory_space<vmem>>, vector<1x1x1x4x4x128xbf16>
    %270 = vector.shape_cast %269 : vector<1x1x1x4x4x128xbf16> to vector<4x4x128xbf16>
    %271 = vector.shape_cast %270 : vector<4x4x128xbf16> to vector<16x128xbf16>
    %c6_372 = arith.constant 6 : index
    %c0_373 = arith.constant 0 : index
    %c0_374 = arith.constant 0 : index
    %272 = vector.load %arg2[%c6_372, %c0_373, %c0_374] : memref<9x128x128xbf16, #tpu.memory_space<vmem>>, vector<1x128x128xbf16>
    %273 = vector.shape_cast %272 : vector<1x128x128xbf16> to vector<128x128xbf16>
    %cst_375 = arith.constant dense<0.000000e+00> : vector<16x128xf32>
    %274 = tpu.matmul %271, %273, %cst_375 {dimension_numbers = #tpu.dot_dimension_numbers<[1], [0], [0], [1], [0, 0, 1, 1], [], []>} : vector<16x128xbf16>, vector<128x128xbf16>, vector<16x128xf32> -> vector<16x128xf32>
    %275 = arith.addf %268, %274 : vector<16x128xf32>
    %c0_376 = arith.constant 0 : index
    %c0_377 = arith.constant 0 : index
    %c3_378 = arith.constant 3 : index
    %c1_379 = arith.constant 1 : index
    %c0_380 = arith.constant 0 : index
    %c0_381 = arith.constant 0 : index
    %276 = vector.load %arg1[%c0_376, %c0_377, %c3_378, %c1_379, %c0_380, %c0_381] : memref<1x4x4x5x5x128xbf16, #tpu.memory_space<vmem>>, vector<1x1x1x4x4x128xbf16>
    %277 = vector.shape_cast %276 : vector<1x1x1x4x4x128xbf16> to vector<4x4x128xbf16>
    %278 = vector.shape_cast %277 : vector<4x4x128xbf16> to vector<16x128xbf16>
    %c7_382 = arith.constant 7 : index
    %c0_383 = arith.constant 0 : index
    %c0_384 = arith.constant 0 : index
    %279 = vector.load %arg2[%c7_382, %c0_383, %c0_384] : memref<9x128x128xbf16, #tpu.memory_space<vmem>>, vector<1x128x128xbf16>
    %280 = vector.shape_cast %279 : vector<1x128x128xbf16> to vector<128x128xbf16>
    %cst_385 = arith.constant dense<0.000000e+00> : vector<16x128xf32>
    %281 = tpu.matmul %278, %280, %cst_385 {dimension_numbers = #tpu.dot_dimension_numbers<[1], [0], [0], [1], [0, 0, 1, 1], [], []>} : vector<16x128xbf16>, vector<128x128xbf16>, vector<16x128xf32> -> vector<16x128xf32>
    %282 = arith.addf %275, %281 : vector<16x128xf32>
    %c0_386 = arith.constant 0 : index
    %c0_387 = arith.constant 0 : index
    %c0_388 = arith.constant 0 : index
    %c1_389 = arith.constant 1 : index
    %c1_390 = arith.constant 1 : index
    %c0_391 = arith.constant 0 : index
    %283 = vector.load %arg1[%c0_386, %c0_387, %c0_388, %c1_389, %c1_390, %c0_391] : memref<1x4x4x5x5x128xbf16, #tpu.memory_space<vmem>>, vector<1x1x1x4x4x128xbf16>
    %284 = vector.shape_cast %283 : vector<1x1x1x4x4x128xbf16> to vector<4x4x128xbf16>
    %285 = vector.shape_cast %284 : vector<4x4x128xbf16> to vector<16x128xbf16>
    %c8_392 = arith.constant 8 : index
    %c0_393 = arith.constant 0 : index
    %c0_394 = arith.constant 0 : index
    %286 = vector.load %arg2[%c8_392, %c0_393, %c0_394] : memref<9x128x128xbf16, #tpu.memory_space<vmem>>, vector<1x128x128xbf16>
    %287 = vector.shape_cast %286 : vector<1x128x128xbf16> to vector<128x128xbf16>
    %cst_395 = arith.constant dense<0.000000e+00> : vector<16x128xf32>
    %288 = tpu.matmul %285, %287, %cst_395 {dimension_numbers = #tpu.dot_dimension_numbers<[1], [0], [0], [1], [0, 0, 1, 1], [], []>} : vector<16x128xbf16>, vector<128x128xbf16>, vector<16x128xf32> -> vector<16x128xf32>
    %289 = arith.addf %282, %288 : vector<16x128xf32>
    %290 = vector.shape_cast %289 : vector<16x128xf32> to vector<4x4x128xf32>
    %c0_396 = arith.constant 0 : index
    %c1_397 = arith.constant 1 : index
    %c1_398 = arith.constant 1 : index
    %c0_399 = arith.constant 0 : index
    %c0_400 = arith.constant 0 : index
    %c0_401 = arith.constant 0 : index
    %291 = vector.load %arg6[%c0_396, %c1_397, %c1_398, %c0_399, %c0_400, %c0_401] : memref<1x2x2x4x4x128xf32, #tpu.memory_space<vmem>>, vector<1x1x1x4x4x128xf32>
    %292 = vector.shape_cast %291 : vector<1x1x1x4x4x128xf32> to vector<4x4x128xf32>
    %293 = vector.shape_cast %290 : vector<4x4x128xf32> to vector<1x1x1x4x4x128xf32>
    tpu.vector_store %arg6[%c0_396, %c1_397, %c1_398, %c0_399, %c0_400, %c0_401], %293 {strides = array<i32>} : memref<1x2x2x4x4x128xf32, #tpu.memory_space<vmem>>, vector<1x1x1x4x4x128xf32>,
    %cst_402 = arith.constant 0.000000e+00 : f32
    %294 = vector.broadcast %cst_402 : f32 to vector<4x4x128xf32>
    %295 = arith.maximumf %290, %294 : vector<4x4x128xf32>
    %296 = arith.truncf %295 : vector<4x4x128xf32> to vector<4x4x128xbf16>
    %c0_403 = arith.constant 0 : index
    %c0_404 = arith.constant 0 : index
    %c1_405 = arith.constant 1 : index
    %c1_406 = arith.constant 1 : index
    %c0_407 = arith.constant 0 : index
    %297 = vector.load %arg8[%c0_403, %c0_404, %c1_405, %c1_406, %c0_407] : memref<2x2x5x5x128xbf16, #tpu.memory_space<vmem>>, vector<1x1x4x4x128xbf16>
    %298 = vector.shape_cast %297 : vector<1x1x4x4x128xbf16> to vector<4x4x128xbf16>
    %299 = vector.shape_cast %296 : vector<4x4x128xbf16> to vector<1x1x4x4x128xbf16>
    tpu.vector_store %arg8[%c0_403, %c0_404, %c1_405, %c1_406, %c0_407], %299 {strides = array<i32>} : memref<2x2x5x5x128xbf16, #tpu.memory_space<vmem>>, vector<1x1x4x4x128xbf16>,
    %c0_408 = arith.constant 0 : index
    %c0_409 = arith.constant 0 : index
    %c0_410 = arith.constant 0 : index
    %c0_411 = arith.constant 0 : index
    %c0_412 = arith.constant 0 : index
    %300 = vector.load %arg8[%c0_408, %c0_409, %c0_410, %c0_411, %c0_412] : memref<2x2x5x5x128xbf16, #tpu.memory_space<vmem>>, vector<1x1x4x4x128xbf16>
    %301 = vector.shape_cast %300 : vector<1x1x4x4x128xbf16> to vector<4x4x128xbf16>
    %302 = vector.shape_cast %301 : vector<4x4x128xbf16> to vector<16x128xbf16>
    %c0_413 = arith.constant 0 : index
    %c0_414 = arith.constant 0 : index
    %c0_415 = arith.constant 0 : index
    %303 = vector.load %arg4[%c0_413, %c0_414, %c0_415] : memref<9x128x128xbf16, #tpu.memory_space<vmem>>, vector<1x128x128xbf16>
    %304 = vector.shape_cast %303 : vector<1x128x128xbf16> to vector<128x128xbf16>
    %cst_416 = arith.constant dense<0.000000e+00> : vector<16x128xf32>
    %305 = tpu.matmul %302, %304, %cst_416 {dimension_numbers = #tpu.dot_dimension_numbers<[1], [0], [0], [1], [0, 0, 1, 1], [], []>} : vector<16x128xbf16>, vector<128x128xbf16>, vector<16x128xf32> -> vector<16x128xf32>
    %306 = arith.addf %7, %305 : vector<16x128xf32>
    %c0_417 = arith.constant 0 : index
    %c1_418 = arith.constant 1 : index
    %c0_419 = arith.constant 0 : index
    %c0_420 = arith.constant 0 : index
    %c0_421 = arith.constant 0 : index
    %307 = vector.load %arg8[%c0_417, %c1_418, %c0_419, %c0_420, %c0_421] : memref<2x2x5x5x128xbf16, #tpu.memory_space<vmem>>, vector<1x1x4x4x128xbf16>
    %308 = vector.shape_cast %307 : vector<1x1x4x4x128xbf16> to vector<4x4x128xbf16>
    %309 = vector.shape_cast %308 : vector<4x4x128xbf16> to vector<16x128xbf16>
    %c1_422 = arith.constant 1 : index
    %c0_423 = arith.constant 0 : index
    %c0_424 = arith.constant 0 : index
    %310 = vector.load %arg4[%c1_422, %c0_423, %c0_424] : memref<9x128x128xbf16, #tpu.memory_space<vmem>>, vector<1x128x128xbf16>
    %311 = vector.shape_cast %310 : vector<1x128x128xbf16> to vector<128x128xbf16>
    %cst_425 = arith.constant dense<0.000000e+00> : vector<16x128xf32>
    %312 = tpu.matmul %309, %311, %cst_425 {dimension_numbers = #tpu.dot_dimension_numbers<[1], [0], [0], [1], [0, 0, 1, 1], [], []>} : vector<16x128xbf16>, vector<128x128xbf16>, vector<16x128xf32> -> vector<16x128xf32>
    %313 = arith.addf %306, %312 : vector<16x128xf32>
    %c0_426 = arith.constant 0 : index
    %c0_427 = arith.constant 0 : index
    %c0_428 = arith.constant 0 : index
    %c1_429 = arith.constant 1 : index
    %c0_430 = arith.constant 0 : index
    %314 = vector.load %arg8[%c0_426, %c0_427, %c0_428, %c1_429, %c0_430] : memref<2x2x5x5x128xbf16, #tpu.memory_space<vmem>>, vector<1x1x4x4x128xbf16>
    %315 = vector.shape_cast %314 : vector<1x1x4x4x128xbf16> to vector<4x4x128xbf16>
    %316 = vector.shape_cast %315 : vector<4x4x128xbf16> to vector<16x128xbf16>
    %c2_431 = arith.constant 2 : index
    %c0_432 = arith.constant 0 : index
    %c0_433 = arith.constant 0 : index
    %317 = vector.load %arg4[%c2_431, %c0_432, %c0_433] : memref<9x128x128xbf16, #tpu.memory_space<vmem>>, vector<1x128x128xbf16>
    %318 = vector.shape_cast %317 : vector<1x128x128xbf16> to vector<128x128xbf16>
    %cst_434 = arith.constant dense<0.000000e+00> : vector<16x128xf32>
    %319 = tpu.matmul %316, %318, %cst_434 {dimension_numbers = #tpu.dot_dimension_numbers<[1], [0], [0], [1], [0, 0, 1, 1], [], []>} : vector<16x128xbf16>, vector<128x128xbf16>, vector<16x128xf32> -> vector<16x128xf32>
    %320 = arith.addf %313, %319 : vector<16x128xf32>
    %c1_435 = arith.constant 1 : index
    %c0_436 = arith.constant 0 : index
    %c0_437 = arith.constant 0 : index
    %c0_438 = arith.constant 0 : index
    %c0_439 = arith.constant 0 : index
    %321 = vector.load %arg8[%c1_435, %c0_436, %c0_437, %c0_438, %c0_439] : memref<2x2x5x5x128xbf16, #tpu.memory_space<vmem>>, vector<1x1x4x4x128xbf16>
    %322 = vector.shape_cast %321 : vector<1x1x4x4x128xbf16> to vector<4x4x128xbf16>
    %323 = vector.shape_cast %322 : vector<4x4x128xbf16> to vector<16x128xbf16>
    %c3_440 = arith.constant 3 : index
    %c0_441 = arith.constant 0 : index
    %c0_442 = arith.constant 0 : index
    %324 = vector.load %arg4[%c3_440, %c0_441, %c0_442] : memref<9x128x128xbf16, #tpu.memory_space<vmem>>, vector<1x128x128xbf16>
    %325 = vector.shape_cast %324 : vector<1x128x128xbf16> to vector<128x128xbf16>
    %cst_443 = arith.constant dense<0.000000e+00> : vector<16x128xf32>
    %326 = tpu.matmul %323, %325, %cst_443 {dimension_numbers = #tpu.dot_dimension_numbers<[1], [0], [0], [1], [0, 0, 1, 1], [], []>} : vector<16x128xbf16>, vector<128x128xbf16>, vector<16x128xf32> -> vector<16x128xf32>
    %327 = arith.addf %320, %326 : vector<16x128xf32>
    %c1_444 = arith.constant 1 : index
    %c1_445 = arith.constant 1 : index
    %c0_446 = arith.constant 0 : index
    %c0_447 = arith.constant 0 : index
    %c0_448 = arith.constant 0 : index
    %328 = vector.load %arg8[%c1_444, %c1_445, %c0_446, %c0_447, %c0_448] : memref<2x2x5x5x128xbf16, #tpu.memory_space<vmem>>, vector<1x1x4x4x128xbf16>
    %329 = vector.shape_cast %328 : vector<1x1x4x4x128xbf16> to vector<4x4x128xbf16>
    %330 = vector.shape_cast %329 : vector<4x4x128xbf16> to vector<16x128xbf16>
    %c4_449 = arith.constant 4 : index
    %c0_450 = arith.constant 0 : index
    %c0_451 = arith.constant 0 : index
    %331 = vector.load %arg4[%c4_449, %c0_450, %c0_451] : memref<9x128x128xbf16, #tpu.memory_space<vmem>>, vector<1x128x128xbf16>
    %332 = vector.shape_cast %331 : vector<1x128x128xbf16> to vector<128x128xbf16>
    %cst_452 = arith.constant dense<0.000000e+00> : vector<16x128xf32>
    %333 = tpu.matmul %330, %332, %cst_452 {dimension_numbers = #tpu.dot_dimension_numbers<[1], [0], [0], [1], [0, 0, 1, 1], [], []>} : vector<16x128xbf16>, vector<128x128xbf16>, vector<16x128xf32> -> vector<16x128xf32>
    %334 = arith.addf %327, %333 : vector<16x128xf32>
    %c1_453 = arith.constant 1 : index
    %c0_454 = arith.constant 0 : index
    %c0_455 = arith.constant 0 : index
    %c1_456 = arith.constant 1 : index
    %c0_457 = arith.constant 0 : index
    %335 = vector.load %arg8[%c1_453, %c0_454, %c0_455, %c1_456, %c0_457] : memref<2x2x5x5x128xbf16, #tpu.memory_space<vmem>>, vector<1x1x4x4x128xbf16>
    %336 = vector.shape_cast %335 : vector<1x1x4x4x128xbf16> to vector<4x4x128xbf16>
    %337 = vector.shape_cast %336 : vector<4x4x128xbf16> to vector<16x128xbf16>
    %c5_458 = arith.constant 5 : index
    %c0_459 = arith.constant 0 : index
    %c0_460 = arith.constant 0 : index
    %338 = vector.load %arg4[%c5_458, %c0_459, %c0_460] : memref<9x128x128xbf16, #tpu.memory_space<vmem>>, vector<1x128x128xbf16>
    %339 = vector.shape_cast %338 : vector<1x128x128xbf16> to vector<128x128xbf16>
    %cst_461 = arith.constant dense<0.000000e+00> : vector<16x128xf32>
    %340 = tpu.matmul %337, %339, %cst_461 {dimension_numbers = #tpu.dot_dimension_numbers<[1], [0], [0], [1], [0, 0, 1, 1], [], []>} : vector<16x128xbf16>, vector<128x128xbf16>, vector<16x128xf32> -> vector<16x128xf32>
    %341 = arith.addf %334, %340 : vector<16x128xf32>
    %c0_462 = arith.constant 0 : index
    %c0_463 = arith.constant 0 : index
    %c1_464 = arith.constant 1 : index
    %c0_465 = arith.constant 0 : index
    %c0_466 = arith.constant 0 : index
    %342 = vector.load %arg8[%c0_462, %c0_463, %c1_464, %c0_465, %c0_466] : memref<2x2x5x5x128xbf16, #tpu.memory_space<vmem>>, vector<1x1x4x4x128xbf16>
    %343 = vector.shape_cast %342 : vector<1x1x4x4x128xbf16> to vector<4x4x128xbf16>
    %344 = vector.shape_cast %343 : vector<4x4x128xbf16> to vector<16x128xbf16>
    %c6_467 = arith.constant 6 : index
    %c0_468 = arith.constant 0 : index
    %c0_469 = arith.constant 0 : index
    %345 = vector.load %arg4[%c6_467, %c0_468, %c0_469] : memref<9x128x128xbf16, #tpu.memory_space<vmem>>, vector<1x128x128xbf16>
    %346 = vector.shape_cast %345 : vector<1x128x128xbf16> to vector<128x128xbf16>
    %cst_470 = arith.constant dense<0.000000e+00> : vector<16x128xf32>
    %347 = tpu.matmul %344, %346, %cst_470 {dimension_numbers = #tpu.dot_dimension_numbers<[1], [0], [0], [1], [0, 0, 1, 1], [], []>} : vector<16x128xbf16>, vector<128x128xbf16>, vector<16x128xf32> -> vector<16x128xf32>
    %348 = arith.addf %341, %347 : vector<16x128xf32>
    %c0_471 = arith.constant 0 : index
    %c1_472 = arith.constant 1 : index
    %c1_473 = arith.constant 1 : index
    %c0_474 = arith.constant 0 : index
    %c0_475 = arith.constant 0 : index
    %349 = vector.load %arg8[%c0_471, %c1_472, %c1_473, %c0_474, %c0_475] : memref<2x2x5x5x128xbf16, #tpu.memory_space<vmem>>, vector<1x1x4x4x128xbf16>
    %350 = vector.shape_cast %349 : vector<1x1x4x4x128xbf16> to vector<4x4x128xbf16>
    %351 = vector.shape_cast %350 : vector<4x4x128xbf16> to vector<16x128xbf16>
    %c7_476 = arith.constant 7 : index
    %c0_477 = arith.constant 0 : index
    %c0_478 = arith.constant 0 : index
    %352 = vector.load %arg4[%c7_476, %c0_477, %c0_478] : memref<9x128x128xbf16, #tpu.memory_space<vmem>>, vector<1x128x128xbf16>
    %353 = vector.shape_cast %352 : vector<1x128x128xbf16> to vector<128x128xbf16>
    %cst_479 = arith.constant dense<0.000000e+00> : vector<16x128xf32>
    %354 = tpu.matmul %351, %353, %cst_479 {dimension_numbers = #tpu.dot_dimension_numbers<[1], [0], [0], [1], [0, 0, 1, 1], [], []>} : vector<16x128xbf16>, vector<128x128xbf16>, vector<16x128xf32> -> vector<16x128xf32>
    %355 = arith.addf %348, %354 : vector<16x128xf32>
    %c0_480 = arith.constant 0 : index
    %c0_481 = arith.constant 0 : index
    %c1_482 = arith.constant 1 : index
    %c1_483 = arith.constant 1 : index
    %c0_484 = arith.constant 0 : index
    %356 = vector.load %arg8[%c0_480, %c0_481, %c1_482, %c1_483, %c0_484] : memref<2x2x5x5x128xbf16, #tpu.memory_space<vmem>>, vector<1x1x4x4x128xbf16>
    %357 = vector.shape_cast %356 : vector<1x1x4x4x128xbf16> to vector<4x4x128xbf16>
    %358 = vector.shape_cast %357 : vector<4x4x128xbf16> to vector<16x128xbf16>
    %c8_485 = arith.constant 8 : index
    %c0_486 = arith.constant 0 : index
    %c0_487 = arith.constant 0 : index
    %359 = vector.load %arg4[%c8_485, %c0_486, %c0_487] : memref<9x128x128xbf16, #tpu.memory_space<vmem>>, vector<1x128x128xbf16>
    %360 = vector.shape_cast %359 : vector<1x128x128xbf16> to vector<128x128xbf16>
    %cst_488 = arith.constant dense<0.000000e+00> : vector<16x128xf32>
    %361 = tpu.matmul %358, %360, %cst_488 {dimension_numbers = #tpu.dot_dimension_numbers<[1], [0], [0], [1], [0, 0, 1, 1], [], []>} : vector<16x128xbf16>, vector<128x128xbf16>, vector<16x128xf32> -> vector<16x128xf32>
    %362 = arith.addf %355, %361 : vector<16x128xf32>
    %363 = vector.shape_cast %362 : vector<16x128xf32> to vector<4x4x128xf32>
    %c0_489 = arith.constant 0 : index
    %c0_490 = arith.constant 0 : index
    %c0_491 = arith.constant 0 : index
    %c0_492 = arith.constant 0 : index
    %364 = vector.load %arg7[%c0_489, %c0_490, %c0_491, %c0_492] : memref<1x4x4x128xf32, #tpu.memory_space<vmem>>, vector<1x4x4x128xf32>
    %365 = vector.shape_cast %364 : vector<1x4x4x128xf32> to vector<4x4x128xf32>
    %366 = vector.shape_cast %363 : vector<4x4x128xf32> to vector<1x4x4x128xf32>
    tpu.vector_store %arg7[%c0_489, %c0_490, %c0_491, %c0_492], %366 {strides = array<i32>} : memref<1x4x4x128xf32, #tpu.memory_space<vmem>>, vector<1x4x4x128xf32>,
    return
  }
  func.func @transform_0(%arg0: i32) -> (i32, i32, i32, i32, i32, i32) {
    %c0_i32 = arith.constant 0 : i32
    %c0_i32_0 = arith.constant 0 : i32
    %c0_i32_1 = arith.constant 0 : i32
    %c0_i32_2 = arith.constant 0 : i32
    %c0_i32_3 = arith.constant 0 : i32
    %c0_i32_4 = arith.constant 0 : i32
    return %arg0, %c0_i32, %c0_i32_0, %c0_i32_1, %c0_i32_2, %c0_i32_3 : i32, i32, i32, i32, i32, i32
  }
  func.func @transform_1(%arg0: i32) -> (i32, i32, i32) {
    %c0_i32 = arith.constant 0 : i32
    %c0_i32_0 = arith.constant 0 : i32
    %c0_i32_1 = arith.constant 0 : i32
    %c0_i32_2 = arith.constant 0 : i32
    return %c0_i32, %c0_i32_0, %c0_i32_1 : i32, i32, i32
  }
  func.func @transform_2(%arg0: i32) -> (i32, i32) {
    %c0_i32 = arith.constant 0 : i32
    %c0_i32_0 = arith.constant 0 : i32
    %c0_i32_1 = arith.constant 0 : i32
    return %c0_i32, %c0_i32_0 : i32, i32
  }
  func.func @transform_3(%arg0: i32) -> (i32, i32, i32) {
    %c0_i32 = arith.constant 0 : i32
    %c0_i32_0 = arith.constant 0 : i32
    %c0_i32_1 = arith.constant 0 : i32
    %c0_i32_2 = arith.constant 0 : i32
    return %c0_i32, %c0_i32_0, %c0_i32_1 : i32, i32, i32
  }
  func.func @transform_4(%arg0: i32) -> (i32, i32) {
    %c0_i32 = arith.constant 0 : i32
    %c0_i32_0 = arith.constant 0 : i32
    %c0_i32_1 = arith.constant 0 : i32
    return %c0_i32, %c0_i32_0 : i32, i32
  }
  func.func @transform_5(%arg0: i32) -> (i32, i32, i32, i32, i32, i32) {
    %c0_i32 = arith.constant 0 : i32
    %c0_i32_0 = arith.constant 0 : i32
    %c0_i32_1 = arith.constant 0 : i32
    %c0_i32_2 = arith.constant 0 : i32
    %c0_i32_3 = arith.constant 0 : i32
    %c0_i32_4 = arith.constant 0 : i32
    return %arg0, %c0_i32, %c0_i32_0, %c0_i32_1, %c0_i32_2, %c0_i32_3 : i32, i32, i32, i32, i32, i32
  }
  func.func @transform_6(%arg0: i32) -> (i32, i32, i32, i32) {
    %c0_i32 = arith.constant 0 : i32
    %c0_i32_0 = arith.constant 0 : i32
    %c0_i32_1 = arith.constant 0 : i32
    %c0_i32_2 = arith.constant 0 : i32
    return %arg0, %c0_i32, %c0_i32_0, %c0_i32_1 : i32, i32, i32, i32
  }
}

</mosaic_0001>

<bundles_post_ra>
// kernel: tpu_custom_call.1
= control target key start
LH: loop header
LB: loop body
LE: loop exit
PB: predicated region body
PF: predicated region fallthrough
CT: control target
= control target key end

     0   :  { %12 = vsyncpa [#allocation4], 0  ;;  %s12593_s0 = inlined_call_operand.vmem [shape: bf16[2,4,4,5,5,128], index: 0, kind: input, shape index: {}]   ;;  %s12594_s1 = inlined_call_operand.vmem [shape: bf16[9,128,128], index: 1, kind: input, shape index: {}]   ;;  %s12595_s2 = inlined_call_operand.vmem [shape: f32[1,128], index: 2, kind: input, shape index: {}]   ;;  %s12596_s3 = inlined_call_operand.hbm [shape: bf16[9,128,128], index: 3, kind: input, shape index: {}]   ;;  %s12597_s4 = inlined_call_operand.vmem [shape: f32[1,128], index: 4, kind: input, shape index: {}]   ;;  %s12598_s5 = inlined_call_operand.hbm [shape: f32[2,2,2,4,4,128], index: 5, kind: output, shape index: {0}]   ;;  %s12599_s6 = inlined_call_operand.hbm [shape: f32[2,4,4,128], index: 6, kind: output, shape index: {1}]  }
   0x1   :  { %13 = vsyncpa [#allocation5], 0 }
   0x2   :  { %15 = vsyncpa [#allocation5 + $0x1], 0 }
   0x3   :  { %16 = vsyncpa [#allocation8], 0 }
   0x4   :  { %18 = vsyncpa [#allocation8 + $0x1], 0  ;;  %s10660_s21 = smov 0   ;;  %s10662_s22 = smov 0  }
   0x5   :  { %s10664_s23 = smov 0   ;;  %s10666_s24 = smov 0  }
   0x6 LB: > { %s10681_s25 = sadd.s32 4294967295, %s10613_s24   ;;  %s7526_s26 = sadd.s32 4294967294, %s10613_s24   ;;  %s10613_s24 = sphi %s10666_s24, %s12613_s24   ;;  %s10609_s23 = sphi %s10664_s23, %s12612_s23   ;;  %s10605_s22 = sphi %s10662_s22, %s12611_s22   ;;  %s10601_s21 = sphi %s10660_s21, %s12610_s21  }
   0x7   : > { %s10685_s27 = sadd.s32 1, %s10613_s24   ;;  %s141_s28 = sadd.s32 1, %s10609_s23 }
   0x8   : > { %s138_s29 = ssub.s32 %s10613_s24, %s10685_s27  ;;  %p151_p0 = scmp.ne.s32.totalorder %s10609_s23, %s10605_s22 }
   0x9   : > { %p139_p1 = scmp.eq.s32.totalorder %s138_s29, 0  ;;  %p152_p2 = scmp.eq.s32.totalorder %s10681_s25, 1 }
   0xa   : > { %p157_p3 = scmp.ne.s32.totalorder %s10605_s22, %s10601_s21  ;;  %p158_p4 = scmp.eq.s32.totalorder %s7526_s26, 1 }
   0xb   : > { %s10696_s30 = scalar_select %p139_p1, %s10609_s23, %s141_s28  }
   0xc   : > { %p10698_p5 = por %p152_p2, %p151_p0  ;;  %p10702_p6 = por %p158_p4, %p157_p3 }
   0xd   : > { %p7527_p7 = scmp.ge.s32.totalorder %s10613_s24, 1  ;;  %p191_p8 = scmp.lt.s32.totalorder %s10613_s24, 3 }
   0xe   : > { %s12601_s8 = scalar_select %p10702_p6, 1, 0 }
   0xf   : > { %p9944_p9 = scmp.eq.s32.totalorder %s10681_s25, 0  ;;  %p10709_p10 = pnand %p7527_p7, %p191_p8 }
  0x10   : > { %s10615_s10 = smov [#allocation3]  }
  0x11   : > { %s209_s11 = sshll.u32 %s10615_s10, 4  ;;  %p9933_p11 = pneg %p10709_p10  ;;  %s210_s11 = int_to_ptr.vmem [resolvable:$true] %s209_s11 }
  0x12   : > { %s10504_s12 = scalar_lea.vmem %s210_s11, 9216  ;;  %p10512_p3 = scmp.lt.s32.totalorder %s210_s11, %s210_s11 }
  0x13   : > { %p9934_p12 = pnand %p9944_p9, %p9933_p11  ;;  %p10505_p0 = scmp.ne.s32.totalorder %s210_s11, %s10504_s12 }
  0x14   : > { %p10513_p4 = scmp.lt.s32.totalorder %s10504_s12, %s10504_s12 }
  0x15   : > { %p10495_p13 = pneg %p9934_p12 }
  0x16   : > { %p10514_p6 = por %p10513_p4, %p10512_p3 }
  0x17   : > { %p10507_p1 = pnand %p10505_p0, %p10495_p13 }
  0x19   : > { %p10508_p2 = pneg %p10507_p1 }
  0x1b   : > { %p10515_p7 = pnand %p10514_p6, %p10508_p2 }
  0x1d   : > { %10518 = shalt.err (!%p10515_p7)
}
  0x1e   : > { %s10616_s13 = smov 64   ;;  %s10617_s14 = smov 4  }
  0x1f   : > { %9936 = dma.hbm_to_vmem [thread:$0]  (!%p9934_p12), %s12596_s3, 9216, %s210_s11, [#allocation4], %s10616_s13, %s10616_s13, %s10617_s14  }
  0x20   : > { %236 = sbr.rel (%p10709_p10) target bundleno = 1180 (0x49c), region = 40 }
  0x25   : > { %10588 = dma.done.wait (%p9944_p9), [#allocation4], 9216  }
  0x26   : > { %10590 = vsyncadd (%p9944_p9), [#allocation4], 4294958080  ;;  %v10618_v0 = vmov 0.0   ;;  %vm10619_vm0 = vmmov 0   ;;  %vm277_vm1 = vcmask 1042432   ;;  %v9987_v6 = vld [vmem:[%s12594_s1 + $0x38] sm:$0xff]   ;;  %v383_v17 = vlaneseq }
  0x27   : > { %9024 = vmatprep.subr.bf16.mxu0 %v10618_v0  ;;  %9044 = vmatprep.subr.bf16.mxu1 %v10618_v0  ;;  %vm278_vm2 = vsmask.f32 2304  ;;  %v322_v2 = vld [vmem:[#allocation2 + $0x38] sm:$0x7]  ;;  %v337_v3 = vld [vmem:[#allocation2 + $0x4c] sm:$0x7] }
  0x28   : > { %9040 = vmatprep.mubr.msk.bf16.mxu0 %vm10619_vm0, %v10618_v0  ;;  %9060 = vmatprep.mubr.msk.bf16.mxu1 %vm10619_vm0, %v10618_v0  ;;  %vm10733_vm3 = vmand %vm277_vm1, %vm278_vm2  ;;  %v9988_v7 = vld [vmem:[%s12594_s1 + $0x78] sm:$0xff]   ;;  %v9989_v8 = vld [vmem:[%s12594_s1 + $0x30] sm:$0xff]   ;;  %p271_p6 = scmp.lt.s32.totalorder %s10681_s25, 1  ;;  %v10620_v15 = vmov 1983009808   ;;  %v384_v22 = vshrl.u32 %v383_v17, 7 }
  0x29   : > { %v323_v4 = vsel %vm10733_vm3, 0, %v322_v2  ;;  %v338_v5 = vsel %vm10733_vm3, 0, %v337_v3  ;;  %9025 = vmatpush3.bf16.msra.mxu0 %v9987_v6  ;;  %9045 = vmatpush3.bf16.msra.mxu1 %v9988_v7  ;;  %v9990_v9 = vld [vmem:[%s12594_s1 + $0x70] sm:$0xff]   ;;  %v9991_v10 = vld [vmem:[%s12594_s1 + $0x28] sm:$0xff]   ;;  %v9993_v12 = vld [vmem:[%s12594_s1 + $0x20] sm:$0xff]   ;;  %v381_v16 = vunpack.c.l.s4 %v10620_v15  ;;  %s11638_s28 = sand.u32 1, %s10605_s22  }
  0x2a   : > { %324 = vst [vmem:[#allocation2 + $0x38] sm:$0x7] %v323_v4  ;;  %339 = vst [vmem:[#allocation2 + $0x4c] sm:$0x7] %v338_v5  ;;  %9026 = vmatprep.subr.bf16.mxu0 %v10618_v0  ;;  %9046 = vmatprep.subr.bf16.mxu1 %v10618_v0  ;;  %v9992_v11 = vld [vmem:[%s12594_s1 + $0x68] sm:$0xff]   ;;  %s272_s14 = scalar_select %p271_p6, %s10681_s25, 1 }
  0x2b   : > { %v9994_v13 = vld [vmem:[%s12594_s1 + $0x60] sm:$0xff]   ;;  %v9995_v14 = vld [vmem:[%s12594_s1 + $0x18] sm:$0xff]   ;;  %v9997_v19 = vld [vmem:[%s12594_s1 + $0x10] sm:$0xff]   ;;  %v382_v21 = vunpack.c.0.s8 %v381_v16  ;;  %vm1897_vm4 = vsmask.f32 1280  ;;  %s7532_s10 = sshll.u32 %s11638_s28, 6 }
  0x2c   : > { %s9924_s19 = smul.u32 320, %s272_s14  ;;  %v9996_v18 = vld [vmem:[%s12594_s1 + $0x58] sm:$0xff]   ;;  %v9998_v20 = vld [vmem:[%s12594_s1 + $0x50] sm:$0xff]   ;;  %v9999_v25 = vld [vmem:[%s12594_s1 + $0x8] sm:$0xff]   ;;  %vm1898_vm5 = vsmask.f32 3336 }
  0x2d   : > { %9027 = vmatpush3.bf16.msra.mxu0 %v9989_v8  ;;  %9047 = vmatpush3.bf16.msra.mxu1 %v9990_v9  ;;  %v10800_v27 = vsub.s32 %v382_v21, %v384_v22  ;;  %v10000_v29 = vld [vmem:[%s12594_s1 + $0x48] sm:$0xff]   ;;  %v10001_v30 = vld [vmem:[%s12594_s1] sm:$0xff]   ;;  %v10007_v34 = vld [vmem:[%s12594_s1 + $0xb8] sm:$0xff]   ;;  %vm1900_vm6 = vsmask.f32 5392  ;;  %s11676_s20 = scalar_lea.vmem [#allocation6], %s7532_s10 }
  0x2e   : > { %9028 = vmatprep.subr.bf16.mxu0 %v10618_v0  ;;  %9048 = vmatprep.subr.bf16.mxu1 %v10618_v0  ;;  %s10782_s11 = scalar_lea.vmem %s12593_s0, %s9924_s19  ;;  %v10002_v31 = vld [vmem:[%s12594_s1 + $0x40] sm:$0xff]   ;;  %v10008_v35 = vld [vmem:[%s12594_s1 + $0xf8] sm:$0xff]   ;;  %v10009_v36 = vld [vmem:[%s12594_s1 + $0xb0] sm:$0xff]   ;;  %vm1902_vm9 = vsmask.f32 7448  ;;  %s8617_s10 = sshll.u32 %s10681_s25, 10 }
  0x2f   : > { %v10421_v23 = vld.sshfl [vmem:[%s10782_s11] sm:$0xf pattern:$0x76325410]  ;;  %v10010_v37 = vld [vmem:[%s12594_s1 + $0xf0] sm:$0xff]   ;;  %v10011_v38 = vld [vmem:[%s12594_s1 + $0xa8] sm:$0xff]   ;;  %s12502_s15 = scalar_lea.hbm %s12598_s5, %s8617_s10 }
  0x30   : > { %v10422_v24 = vld.sshfl [vmem:[%s10782_s11 + $0x8] sm:$0xf pattern:$0x76325410]  ;;  %v10013_v40 = vld [vmem:[%s12594_s1 + $0xa0] sm:$0xff]   ;;  %v10015_v42 = vld [vmem:[%s12594_s1 + $0x98] sm:$0xff]  }
  0x31   : > { %9029 = vmatpush3.bf16.msra.mxu0 %v9991_v10  ;;  %9049 = vmatpush3.bf16.msra.mxu1 %v9992_v11  ;;  %v10423_v26 = vld.sshfl [vmem:[%s10782_s11 + $0x14] sm:$0xf pattern:$0x76325410]  ;;  %v394_v32 = vcombine.low %v10421_v23, %v10422_v24  ;;  %v10012_v39 = vld [vmem:[%s12594_s1 + $0xe8] sm:$0xff]   ;;  %v10014_v41 = vld [vmem:[%s12594_s1 + $0xe0] sm:$0xff]  }
  0x32   : > { %9030 = vmatprep.subr.bf16.mxu0 %v10618_v0  ;;  %9050 = vmatprep.subr.bf16.mxu1 %v10618_v0  ;;  %v10424_v28 = vld.sshfl [vmem:[%s10782_s11 + $0x1c] sm:$0xf pattern:$0x76325410]  ;;  %v10017_v44 = vld [vmem:[%s12594_s1 + $0x90] sm:$0xff]   ;;  %v10019_v48 = vld [vmem:[%s12594_s1 + $0x88] sm:$0xff]  }
  0x33   : > { %v529_v33 = vcombine.low %v10423_v26, %v10424_v28  ;;  %v10016_v43 = vld [vmem:[%s12594_s1 + $0xd8] sm:$0xff]   ;;  %v10018_v45 = vld [vmem:[%s12594_s1 + $0xd0] sm:$0xff]   ;;  %v10425_v46 = vld.sshfl [vmem:[%s10782_s11 + $0x28] sm:$0xf pattern:$0x76325410] }
  0x34   : > { %v10426_v47 = vld.sshfl [vmem:[%s10782_s11 + $0x30] sm:$0xf pattern:$0x76325410]  ;;  %v10020_v51 = vld [vmem:[%s12594_s1 + $0xc8] sm:$0xff]   ;;  %v10021_v52 = vld [vmem:[%s12594_s1 + $0x80] sm:$0xff]  }
  0x35   : > { %9031 = vmatpush3.bf16.msra.mxu0 %v9993_v12  ;;  %9051 = vmatpush3.bf16.msra.mxu1 %v9994_v13  ;;  %v10427_v49 = vld.sshfl [vmem:[%s10782_s11 + $0x50] sm:$0xf pattern:$0x76325410]  ;;  %v10022_v53 = vld [vmem:[%s12594_s1 + $0xc0] sm:$0xff]   ;;  %v664_v54 = vcombine.low %v10425_v46, %v10426_v47  ;;  %v10027_v56 = vld [vmem:[%s12594_s1 + $0x138] sm:$0xff]  }
  0x36   : > { %9032 = vmatprep.subr.bf16.mxu0 %v10618_v0  ;;  %9052 = vmatprep.subr.bf16.mxu1 %v10618_v0  ;;  %v10428_v50 = vld.sshfl [vmem:[%s10782_s11 + $0x58] sm:$0xf pattern:$0x76325410]  ;;  %v10029_v58 = vld [vmem:[%s12594_s1 + $0x130] sm:$0xff]   ;;  %v10031_v60 = vld [vmem:[%s12594_s1 + $0x128] sm:$0xff]  }
  0x37   : > { %v799_v55 = vcombine.low %v10427_v49, %v10428_v50  ;;  %v10028_v57 = vld [vmem:[%s12594_s1 + $0x178] sm:$0xff]   ;;  %v10030_v59 = vld [vmem:[%s12594_s1 + $0x170] sm:$0xff]   ;;  %v10032_v61 = vld [vmem:[%s12594_s1 + $0x168] sm:$0xff]   ;;  %vm3125_vm11 = vsmask.f32 2306  ;;  %s7404_s12 = sshll.u32 %s11676_s20, 4  ;;  %s12504_s12 = int_to_ptr.vmem [resolvable:$true] %s7404_s12 }
  0x38   : > { %v10033_v62 = vld [vmem:[%s12594_s1 + $0x120] sm:$0xff]   ;;  %v10035_v2 = vld [vmem:[%s12594_s1 + $0x118] sm:$0xff]   ;;  %v10037_v4 = vld [vmem:[%s12594_s1 + $0x110] sm:$0xff]   ;;  %s7386_s16 = scalar_lea.sflag [#allocation5], %s11638_s28  ;;  %s10519_s17 = scalar_lea.vmem %s12504_s12, 1024 }
  0x39   : > { %9033 = vmatpush3.bf16.msra.mxu0 %v9995_v14  ;;  %9053 = vmatpush3.bf16.msra.mxu1 %v9996_v18  ;;  %v10034_v63 = vld [vmem:[%s12594_s1 + $0x160] sm:$0xff]   ;;  %v10036_v3 = vld [vmem:[%s12594_s1 + $0x158] sm:$0xff]   ;;  %v10038_v5 = vld [vmem:[%s12594_s1 + $0x150] sm:$0xff]   ;;  %p10520_p8 = scmp.ne.s32.totalorder %s12504_s12, %s10519_s17  ;;  %s10621_s18 = smov [#allocation6]  }
  0x3a   : > { %9034 = vmatprep.subr.bf16.mxu0 %v10618_v0  ;;  %9054 = vmatprep.subr.bf16.mxu1 %v10618_v0  ;;  %v10429_v6 = vld.sshfl [vmem:[%s10782_s11 + $0x64] sm:$0xf pattern:$0x76325410]  ;;  %v10047_v16 = vld [vmem:[%s12594_s1 + $0x1b8] sm:$0xff]   ;;  %v10049_v18 = vld [vmem:[%s12594_s1 + $0x1b0] sm:$0xff]  }
  0x3b   : > { %v10430_v7 = vld.sshfl [vmem:[%s10782_s11 + $0x6c] sm:$0xf pattern:$0x76325410]  ;;  %v10041_v12 = vld [vmem:[%s12594_s1 + $0x100] sm:$0xff]   ;;  %v10048_v17 = vld [vmem:[%s12594_s1 + $0x1f8] sm:$0xff]   ;;  %p10521_p9 = pnand %p10520_p8, %p10698_p5 }
  0x3c   : > { %v10039_v8 = vld [vmem:[%s12594_s1 + $0x108] sm:$0xff]   ;;  %v10431_v9 = vld.sshfl [vmem:[%s10782_s11 + $0x78] sm:$0xf pattern:$0x76325410]  ;;  %v10042_v13 = vld [vmem:[%s12594_s1 + $0x140] sm:$0xff]   ;;  %v934_v14 = vcombine.low %v10429_v6, %v10430_v7 }
  0x3d   : > { %9035 = vmatpush3.bf16.msra.mxu0 %v9997_v19  ;;  %9055 = vmatpush3.bf16.msra.mxu1 %v9998_v20  ;;  %v10432_v10 = vld.sshfl [vmem:[%s10782_s11 + $0x80] sm:$0xf pattern:$0x76325410]  ;;  %v10040_v11 = vld [vmem:[%s12594_s1 + $0x148] sm:$0xff]   ;;  %v10050_v19 = vld [vmem:[%s12594_s1 + $0x1f0] sm:$0xff]   ;;  %p10522_p10 = pneg %p10521_p9 }
  0x3e   : > { %9036 = vmatprep.subr.bf16.mxu0 %v10618_v0  ;;  %9056 = vmatprep.subr.bf16.mxu1 %v10618_v0  ;;  %v1069_v15 = vcombine.low %v10431_v9, %v10432_v10  ;;  %v10051_v20 = vld [vmem:[%s12594_s1 + $0x1a8] sm:$0xff]   ;;  %v10053_v22 = vld [vmem:[%s12594_s1 + $0x1a0] sm:$0xff]   ;;  %v10055_v24 = vld [vmem:[%s12594_s1 + $0x198] sm:$0xff]   ;;  %s10523_s19 = sshll.u32 %s10621_s18, 4  ;;  %s10524_s19 = int_to_ptr.vmem [resolvable:$false] %s10523_s19 }
  0x3f   : > { %v10052_v21 = vld [vmem:[%s12594_s1 + $0x1e8] sm:$0xff]   ;;  %v10054_v23 = vld [vmem:[%s12594_s1 + $0x1e0] sm:$0xff]   ;;  %v10057_v26 = vld [vmem:[%s12594_s1 + $0x190] sm:$0xff]   ;;  %p10526_p11 = scmp.lt.s32.totalorder %s12504_s12, %s10524_s19 }
  0x40   : > { %v10058_v28 = vld [vmem:[%s12594_s1 + $0x1d0] sm:$0xff]   ;;  %v10074_v46 = vld [vmem:[%s12594_s1 + $0x20] sm:$0xff]   ;;  %v10075_v47 = vld [vmem:[%s12594_s1 + $0x218] sm:$0xff]  }
  0x41   : > { %9037 = vmatpush3.bf16.msra.mxu0 %v9999_v25  ;;  %9057 = vmatpush3.bf16.msra.mxu1 %v10000_v29  ;;  %v10056_v25 = vld [vmem:[%s12594_s1 + $0x1d8] sm:$0xff]   ;;  %v10433_v29 = vld.sshfl [vmem:[%s10782_s11 + $0xa0] sm:$0xf pattern:$0x76325410]  ;;  %v10077_v49 = vld [vmem:[%s12594_s1 + $0x210] sm:$0xff]  }
  0x42   : > { %9038 = vmatprep.subr.bf16.mxu0 %v10618_v0  ;;  %9058 = vmatprep.subr.bf16.mxu1 %v10618_v0  ;;  %v10078_v50 = vld [vmem:[%s12594_s1 + $0x10] sm:$0xff]   ;;  %vm1899_vm7 = vmor %vm1897_vm4, %vm1898_vm5  ;;  %v10347_v1 = vld [vmem:[#allocation3 + $0xe8] sm:$0xff]  }
  0x43   : > { %vm1901_vm8 = vmor %vm1899_vm7, %vm1900_vm6 }
  0x44   : > { %vm11152_vm10 = vmor %vm1901_vm8, %vm1902_vm9 }
  0x45   : > { %9039 = vmatpush3.bf16.msra.mxu0 %v10001_v30  ;;  %9059 = vmatpush3.bf16.msra.mxu1 %v10002_v31  ;;  %v10434_v30 = vld.sshfl [vmem:[%s10782_s11 + $0xa8] sm:$0xf pattern:$0x76325410]  ;;  %vm12053_vm12 = vmand %vm277_vm1, %vm3125_vm11 }
  0x46   : > { %9064 = vmatprep.subr.bf16.mxu0 %v10618_v0  ;;  %9084 = vmatprep.subr.bf16.mxu1 %v10618_v0  ;;  %v10435_v31 = vld.sshfl [vmem:[%s10782_s11 + $0xb4] sm:$0xf pattern:$0x76325410] }
  0x48   : > { %9041 = vmatmul.mubr.bf16.vlgmr.msra.gmra.mxu0 %v394_v32  ;;  %9061 = vmatmul.mubr.bf16.vlgmr.msra.gmra.mxu1 %v529_v33  ;;  %v10436_v32 = vld.sshfl [vmem:[%s10782_s11 + $0xbc] sm:$0xf pattern:$0x76325410]  ;;  %v10059_v33 = vld [vmem:[%s12594_s1 + $0x188] sm:$0xff]  }
  0x49   : > { %9065 = vmatpush3.bf16.msra.mxu0 %v10007_v34  ;;  %9085 = vmatpush3.bf16.msra.mxu1 %v10008_v35  ;;  %v10060_v34 = vld [vmem:[%s12594_s1 + $0x1c8] sm:$0xff]   ;;  %v10061_v35 = vld [vmem:[%s12594_s1 + $0x180] sm:$0xff]  }
  0x4a   : > { %9066 = vmatprep.subr.bf16.mxu0 %v10618_v0  ;;  %9086 = vmatprep.subr.bf16.mxu1 %v10618_v0 }
  0x4b   : > { %9080 = vmatprep.mubr.msk.bf16.mxu0 %vm10619_vm0, %v10618_v0  ;;  %9100 = vmatprep.mubr.msk.bf16.mxu1 %vm10619_vm0, %v10618_v0 }
  0x4d   : > { %9067 = vmatpush3.bf16.msra.mxu0 %v10009_v36  ;;  %9087 = vmatpush3.bf16.msra.mxu1 %v10010_v37  ;;  %v10062_v36 = vld [vmem:[%s12594_s1 + $0x1c0] sm:$0xff]   ;;  %v1204_v37 = vcombine.low %v10433_v29, %v10434_v30  ;;  %v10092_v29 = vld [vmem:[%s12594_s1 + $0xa8] sm:$0xff]  }
  0x4e   : > { %9068 = vmatprep.subr.bf16.mxu0 %v10618_v0  ;;  %9088 = vmatprep.subr.bf16.mxu1 %v10618_v0 }
  0x51   : > { %9069 = vmatpush3.bf16.msra.mxu0 %v10011_v38  ;;  %9089 = vmatpush3.bf16.msra.mxu1 %v10012_v39  ;;  %v1339_v38 = vcombine.low %v10435_v31, %v10436_v32  ;;  %v10067_v39 = vld [vmem:[%s12594_s1 + $0x238] sm:$0xff]  }
  0x52   : > { %9070 = vmatprep.subr.bf16.mxu0 %v10618_v0  ;;  %9090 = vmatprep.subr.bf16.mxu1 %v10618_v0 }
  0x55   : > { %9071 = vmatpush3.bf16.msra.mxu0 %v10013_v40  ;;  %9091 = vmatpush3.bf16.msra.mxu1 %v10014_v41  ;;  %v10068_v40 = vld [vmem:[%s12594_s1 + $0x38] sm:$0xff]   ;;  %v10069_v41 = vld [vmem:[%s12594_s1 + $0x230] sm:$0xff]  }
  0x56   : > { %9072 = vmatprep.subr.bf16.mxu0 %v10618_v0  ;;  %9092 = vmatprep.subr.bf16.mxu1 %v10618_v0 }
  0x59   : > { %9073 = vmatpush3.bf16.msra.mxu0 %v10015_v42  ;;  %9093 = vmatpush3.bf16.msra.mxu1 %v10016_v43  ;;  %v10070_v42 = vld [vmem:[%s12594_s1 + $0x30] sm:$0xff]   ;;  %v10071_v43 = vld [vmem:[%s12594_s1 + $0x228] sm:$0xff]  }
  0x5a   : > { %9074 = vmatprep.subr.bf16.mxu0 %v10618_v0  ;;  %9094 = vmatprep.subr.bf16.mxu1 %v10618_v0 }
  0x5d   : > { %9075 = vmatpush3.bf16.msra.mxu0 %v10017_v44  ;;  %9095 = vmatpush3.bf16.msra.mxu1 %v10018_v45  ;;  %v10072_v44 = vld [vmem:[%s12594_s1 + $0x28] sm:$0xff]   ;;  %v10073_v45 = vld [vmem:[%s12594_s1 + $0x220] sm:$0xff]  }
  0x5e   : > { %9076 = vmatprep.subr.bf16.mxu0 %v10618_v0  ;;  %9096 = vmatprep.subr.bf16.mxu1 %v10618_v0 }
  0x61   : > { %9077 = vmatpush3.bf16.msra.mxu0 %v10019_v48  ;;  %9097 = vmatpush3.bf16.msra.mxu1 %v10020_v51  ;;  %v10076_v48 = vld [vmem:[%s12594_s1 + $0x18] sm:$0xff]   ;;  %v10437_v51 = vld.sshfl [vmem:[%s10782_s11 + $0xc8] sm:$0xf pattern:$0x76325410] }
  0x62   : > { %9078 = vmatprep.subr.bf16.mxu0 %v10618_v0  ;;  %9098 = vmatprep.subr.bf16.mxu1 %v10618_v0 }
  0x65   : > { %9079 = vmatpush3.bf16.msra.mxu0 %v10021_v52  ;;  %9099 = vmatpush3.bf16.msra.mxu1 %v10022_v53  ;;  %v10438_v52 = vld.sshfl [vmem:[%s10782_s11 + $0xd0] sm:$0xf pattern:$0x76325410]  ;;  %v10079_v53 = vld [vmem:[%s12594_s1 + $0x208] sm:$0xff]  }
  0x66   : > { %9104 = vmatprep.subr.bf16.mxu0 %v10618_v0  ;;  %9124 = vmatprep.subr.bf16.mxu1 %v10618_v0 }
  0x68   : > { %9081 = vmatmul.mubr.bf16.vlgmr.msra.gmra.mxu0 %v664_v54  ;;  %9101 = vmatmul.mubr.bf16.vlgmr.msra.gmra.mxu1 %v799_v55  ;;  %v10439_v54 = vld.sshfl [vmem:[%s10782_s11 + $0x28] sm:$0xf pattern:$0x76325410] }
  0x69   : > { %9105 = vmatpush3.bf16.msra.mxu0 %v10027_v56  ;;  %9125 = vmatpush3.bf16.msra.mxu1 %v10028_v57  ;;  %v10440_v55 = vld.sshfl [vmem:[%s10782_s11 + $0x30] sm:$0xf pattern:$0x76325410]  ;;  %v10080_v56 = vld [vmem:[%s12594_s1 + $0x8] sm:$0xff]  }
  0x6a   : > { %9106 = vmatprep.subr.bf16.mxu0 %v10618_v0  ;;  %9126 = vmatprep.subr.bf16.mxu1 %v10618_v0  ;;  %v7809_v57 = vld.sshfl [vmem:[%s10782_s11] sm:$0x13 pattern:$0x76325410] }
  0x6b   : > { %9120 = vmatprep.mubr.msk.bf16.mxu0 %vm10619_vm0, %v10618_v0  ;;  %9140 = vmatprep.mubr.msk.bf16.mxu1 %vm10619_vm0, %v10618_v0  ;;  %v1908_v6 = vshll.u32 %v7809_v57, 16 }
  0x6d   : > { %9107 = vmatpush3.bf16.msra.mxu0 %v10029_v58  ;;  %9127 = vmatpush3.bf16.msra.mxu1 %v10030_v59  ;;  %v10081_v58 = vld [vmem:[%s12594_s1 + $0x200] sm:$0xff]  }
  0x6e   : > { %9108 = vmatprep.subr.bf16.mxu0 %v10618_v0  ;;  %9128 = vmatprep.subr.bf16.mxu1 %v10618_v0  ;;  %v7810_v59 = vld.sshfl [vmem:[%s10782_s11 + $0x4] sm:$0x13 pattern:$0x76325410] }
  0x6f   : > { %v1919_v7 = vshrl.u32 %v7810_v59, 16 }
  0x71   : > { %9109 = vmatpush3.bf16.msra.mxu0 %v10031_v60  ;;  %9129 = vmatpush3.bf16.msra.mxu1 %v10032_v61  ;;  %v10082_v60 = vld [vmem:[%s12594_s1] sm:$0xff]   ;;  %v7811_v61 = vld.sshfl [vmem:[%s10782_s11 + $0x8] sm:$0x13 pattern:$0x76325410] }
  0x72   : > { %9110 = vmatprep.subr.bf16.mxu0 %v10618_v0  ;;  %9130 = vmatprep.subr.bf16.mxu1 %v10618_v0  ;;  %v1933_v9 = vshrl.u32 %v7811_v61, 16  ;;  %v1936_v10 = vshll.u32 %v7811_v61, 16 }
  0x75   : > { %9111 = vmatpush3.bf16.msra.mxu0 %v10033_v62  ;;  %9131 = vmatpush3.bf16.msra.mxu1 %v10034_v63  ;;  %v7812_v62 = vld.sshfl [vmem:[%s10782_s11 + $0xc] sm:$0x13 pattern:$0x76325410]  ;;  %v10087_v63 = vld [vmem:[%s12594_s1 + $0x78] sm:$0xff]  }
  0x76   : > { %9112 = vmatprep.subr.bf16.mxu0 %v10618_v0  ;;  %9132 = vmatprep.subr.bf16.mxu1 %v10618_v0 }
  0x79   : > { %9113 = vmatpush3.bf16.msra.mxu0 %v10035_v2  ;;  %9133 = vmatpush3.bf16.msra.mxu1 %v10036_v3  ;;  %v10088_v2 = vld [vmem:[%s12594_s1 + $0xb8] sm:$0xff]   ;;  %v1474_v3 = vcombine.low %v10437_v51, %v10438_v52  ;;  %v10097_v51 = vld [vmem:[%s12594_s1 + $0x50] sm:$0xff]  }
  0x7a   : > { %9114 = vmatprep.subr.bf16.mxu0 %v10618_v0  ;;  %9134 = vmatprep.subr.bf16.mxu1 %v10618_v0 }
  0x7d   : > { %9115 = vmatpush3.bf16.msra.mxu0 %v10037_v4  ;;  %9135 = vmatpush3.bf16.msra.mxu1 %v10038_v5  ;;  %v1630_v4 = vcombine.low %v10439_v54, %v10440_v55  ;;  %v1905_v5 = vshrl.u32 %v7809_v57, 16 }
  0x7e   : > { %9116 = vmatprep.subr.bf16.mxu0 %v10618_v0  ;;  %9136 = vmatprep.subr.bf16.mxu1 %v10618_v0 }
  0x81   : > { %9117 = vmatpush3.bf16.msra.mxu0 %v10039_v8  ;;  %9137 = vmatpush3.bf16.msra.mxu1 %v10040_v11  ;;  %v1922_v8 = vshll.u32 %v7810_v59, 16  ;;  %v1947_v11 = vshrl.u32 %v7812_v62, 16 }
  0x82   : > { %9118 = vmatprep.subr.bf16.mxu0 %v10618_v0  ;;  %9138 = vmatprep.subr.bf16.mxu1 %v10618_v0 }
  0x85   : > { %9119 = vmatpush3.bf16.msra.mxu0 %v10041_v12  ;;  %9139 = vmatpush3.bf16.msra.mxu1 %v10042_v13  ;;  %v1950_v12 = vshll.u32 %v7812_v62, 16  ;;  %v1872_v13 = vcombine.high %v7809_v57, %v7809_v57  ;;  %v10099_v57 = vld [vmem:[%s12594_s1 + $0x48] sm:$0xff]  }
  0x86   : > { %9144 = vmatprep.subr.bf16.mxu0 %v10618_v0  ;;  %9164 = vmatprep.subr.bf16.mxu1 %v10618_v0 }
  0x87   : > { %v1914_v31 = vshll.u32 %v1872_v13, 16  ;;  %v10111_v13 = vld [vmem:[%s12594_s1 + $0xe0] sm:$0xff]  }
  0x88   : > { %9121 = vmatmul.mubr.bf16.vlgmr.msra.gmra.mxu0 %v934_v14  ;;  %9141 = vmatmul.mubr.bf16.vlgmr.msra.gmra.mxu1 %v1069_v15  ;;  %v10089_v14 = vld [vmem:[%s12594_s1 + $0x70] sm:$0xff]  }
  0x89   : > { %9145 = vmatpush3.bf16.msra.mxu0 %v10047_v16  ;;  %9165 = vmatpush3.bf16.msra.mxu1 %v10048_v17  ;;  %v10090_v15 = vld [vmem:[%s12594_s1 + $0xb0] sm:$0xff]   ;;  %v1880_v16 = vcombine.high %v7810_v59, %v7810_v59  ;;  %v1888_v17 = vcombine.high %v7811_v61, %v7811_v61  ;;  %v10442_v59 = vld.sshfl [vmem:[%s10782_s11 + $0x44] sm:$0xf pattern:$0x76325410] }
  0x8a   : > { %9146 = vmatprep.subr.bf16.mxu0 %v10618_v0  ;;  %9166 = vmatprep.subr.bf16.mxu1 %v10618_v0 }
  0x8b   : > { %9160 = vmatprep.mubr.msk.bf16.mxu0 %vm10619_vm0, %v10618_v0  ;;  %9180 = vmatprep.mubr.msk.bf16.mxu1 %vm10619_vm0, %v10618_v0  ;;  %v1928_v32 = vshll.u32 %v1880_v16, 16  ;;  %v10114_v16 = vld [vmem:[%s12594_s1 + $0x118] sm:$0xff]  }
  0x8d   : > { %9147 = vmatpush3.bf16.msra.mxu0 %v10049_v18  ;;  %9167 = vmatpush3.bf16.msra.mxu1 %v10050_v19  ;;  %v1907_v18 = vrot.slane %v1905_v5, 6  ;;  %v1910_v19 = vrot.slane %v1908_v6, 7 }
  0x8e   : > { %9148 = vmatprep.subr.bf16.mxu0 %v10618_v0  ;;  %9168 = vmatprep.subr.bf16.mxu1 %v10618_v0 }
  0x8f   : > { %v1911_v30 = vor.u32 %v1910_v19, %v1907_v18  ;;  %v10116_v18 = vld [vmem:[%s12594_s1 + $0x110] sm:$0xff]   ;;  %v10443_v19 = vld.sshfl [vmem:[%s10782_s11 + $0x78] sm:$0xf pattern:$0x76325410] }
  0x91   : > { %9149 = vmatpush3.bf16.msra.mxu0 %v10051_v20  ;;  %9169 = vmatpush3.bf16.msra.mxu1 %v10052_v21  ;;  %v1896_v20 = vcombine.high %v7812_v62, %v7812_v62  ;;  %v1921_v21 = vrot.slane %v1919_v7, 6  ;;  %v10100_v62 = vld [vmem:[%s12594_s1 + $0x88] sm:$0xff]   ;;  %v10105_v7 = vld [vmem:[%s12594_s1 + $0xf8] sm:$0xff]  }
  0x92   : > { %9150 = vmatprep.subr.bf16.mxu0 %v10618_v0  ;;  %9170 = vmatprep.subr.bf16.mxu1 %v10618_v0 }
  0x95   : > { %9151 = vmatpush3.bf16.msra.mxu0 %v10053_v22  ;;  %9171 = vmatpush3.bf16.msra.mxu1 %v10054_v23  ;;  %v1924_v22 = vrot.slane %v1922_v8, 7  ;;  %v1935_v23 = vrot.slane %v1933_v9, 6  ;;  %v10106_v8 = vld [vmem:[%s12594_s1 + $0x138] sm:$0xff]   ;;  %v10107_v9 = vld [vmem:[%s12594_s1 + $0xf0] sm:$0xff]  }
  0x96   : > { %9152 = vmatprep.subr.bf16.mxu0 %v10618_v0  ;;  %9172 = vmatprep.subr.bf16.mxu1 %v10618_v0 }
  0x99   : > { %9153 = vmatpush3.bf16.msra.mxu0 %v10055_v24  ;;  %9173 = vmatpush3.bf16.msra.mxu1 %v10056_v25  ;;  %v1938_v24 = vrot.slane %v1936_v10, 7  ;;  %v1949_v25 = vrot.slane %v1947_v11, 6  ;;  %v10108_v10 = vld [vmem:[%s12594_s1 + $0x130] sm:$0xff]   ;;  %v10109_v11 = vld [vmem:[%s12594_s1 + $0xe8] sm:$0xff]  }
  0x9a   : > { %9154 = vmatprep.subr.bf16.mxu0 %v10618_v0  ;;  %9174 = vmatprep.subr.bf16.mxu1 %v10618_v0 }
  0x9d   : > { %9155 = vmatpush3.bf16.msra.mxu0 %v10057_v26  ;;  %9175 = vmatpush3.bf16.msra.mxu1 %v10058_v28  ;;  %v1952_v26 = vrot.slane %v1950_v12, 7  ;;  %v10091_v28 = vld [vmem:[%s12594_s1 + $0x68] sm:$0xff]  }
  0x9e   : > { %9156 = vmatprep.subr.bf16.mxu0 %v10618_v0  ;;  %9176 = vmatprep.subr.bf16.mxu1 %v10618_v0  ;;  %v10110_v12 = vld [vmem:[%s12594_s1 + $0x128] sm:$0xff]  }
  0xa1   : > { %9157 = vmatpush3.bf16.msra.mxu0 %v10059_v33  ;;  %9177 = vmatpush3.bf16.msra.mxu1 %v10060_v34  ;;  %v1942_v33 = vshll.u32 %v1888_v17, 16  ;;  %v1925_v34 = vor.u32 %v1924_v22, %v1921_v21  ;;  %v10115_v17 = vld [vmem:[%s12594_s1 + $0xd0] sm:$0xff]   ;;  %v10117_v21 = vld [vmem:[%s12594_s1 + $0xc8] sm:$0xff]  }
  0xa2   : > { %9158 = vmatprep.subr.bf16.mxu0 %v10618_v0  ;;  %9178 = vmatprep.subr.bf16.mxu1 %v10618_v0  ;;  %v10445_v22 = vld.sshfl [vmem:[%s10782_s11 + $0x8c] sm:$0xf pattern:$0x76325410] }
  0xa5   : > { %9159 = vmatpush3.bf16.msra.mxu0 %v10061_v35  ;;  %9179 = vmatpush3.bf16.msra.mxu1 %v10062_v36  ;;  %v1956_v35 = vshll.u32 %v1896_v20, 16  ;;  %v1939_v36 = vor.u32 %v1938_v24, %v1935_v23  ;;  %v10444_v20 = vld.sshfl [vmem:[%s10782_s11 + $0x80] sm:$0xf pattern:$0x76325410]  ;;  %v10118_v24 = vld [vmem:[%s12594_s1 + $0x108] sm:$0xff]  }
  0xa6   : > { %9184 = vmatprep.subr.bf16.mxu0 %v10618_v0  ;;  %9204 = vmatprep.subr.bf16.mxu1 %v10618_v0  ;;  %v10446_v23 = vld.sshfl [vmem:[%s10782_s11 + $0x94] sm:$0xf pattern:$0x76325410] }
  0xa8   : > { %9161 = vmatmul.mubr.bf16.vlgmr.msra.gmra.mxu0 %v1204_v37  ;;  %9181 = vmatmul.mubr.bf16.vlgmr.msra.gmra.mxu1 %v1339_v38  ;;  %v1953_v37 = vor.u32 %v1952_v26, %v1949_v25  ;;  %v10093_v38 = vld [vmem:[%s12594_s1 + $0x60] sm:$0xff]   ;;  %v7897_v25 = vld.sshfl [vmem:[%s10782_s11 + $0x50] sm:$0x13 pattern:$0x76325410] }
  0xa9   : > { %9185 = vmatpush3.bf16.msra.mxu0 %v10067_v39  ;;  %9205 = vmatpush3.bf16.msra.mxu1 %v10068_v40  ;;  %v10094_v39 = vld [vmem:[%s12594_s1 + $0xa0] sm:$0xff]   ;;  %v1912_v40 = vrot.slane %v1911_v30, 2  ;;  %v11269_v30 = vld.sshfl [vmem:[%s10782_s11 + $0x58] sm:$0x13 pattern:$0x76325410] }
  0xaa   : > { %9186 = vmatprep.subr.bf16.mxu0 %v10618_v0  ;;  %9206 = vmatprep.subr.bf16.mxu1 %v10618_v0  ;;  %v10119_v26 = vld [vmem:[%s12594_s1 + $0xc0] sm:$0xff]  }
  0xab   : > { %9200 = vmatprep.mubr.msk.bf16.mxu0 %vm10619_vm0, %v10618_v0  ;;  %9220 = vmatprep.mubr.msk.bf16.mxu1 %vm10619_vm0, %v10618_v0 }
  0xad   : > { %9187 = vmatpush3.bf16.msra.mxu0 %v10069_v41  ;;  %9207 = vmatpush3.bf16.msra.mxu1 %v10070_v42  ;;  %v1916_v41 = vrot.slane %v1914_v31, 7  ;;  %v1930_v42 = vrot.slane %v1928_v32, 7  ;;  %v2393_v31 = vshrl.u32 %v7897_v25, 16  ;;  %v2396_v32 = vshll.u32 %v7897_v25, 16 }
  0xae   : > { %9188 = vmatprep.subr.bf16.mxu0 %v10618_v0  ;;  %9208 = vmatprep.subr.bf16.mxu1 %v10618_v0 }
  0xaf   : > { %v1917_v52 = vsel %vm11152_vm10, %v1912_v40, %v1916_v41  ;;  %v2367_v41 = vcombine.high %v7897_v25, %v7897_v25  ;;  %v10132_v25 = vld [vmem:[%s12594_s1 + $0x1a0] sm:$0xff]  }
  0xb1   : > { %9189 = vmatpush3.bf16.msra.mxu0 %v10071_v43  ;;  %9209 = vmatpush3.bf16.msra.mxu1 %v10072_v44  ;;  %v1944_v43 = vrot.slane %v1942_v33, 7  ;;  %v1926_v44 = vrot.slane %v1925_v34, 2  ;;  %v10125_v33 = vld [vmem:[%s12594_s1 + $0x178] sm:$0xff]  }
  0xb2   : > { %9190 = vmatprep.subr.bf16.mxu0 %v10618_v0  ;;  %9210 = vmatprep.subr.bf16.mxu1 %v10618_v0  ;;  %v11275_v34 = vld.sshfl [vmem:[%s10782_s11 + $0x5c] sm:$0x13 pattern:$0x76325410] }
  0xb3   : > { %v1931_v54 = vsel %vm11152_vm10, %v1926_v44, %v1930_v42  ;;  %v2398_v44 = vrot.slane %v2396_v32, 7  ;;  %v10134_v32 = vld [vmem:[%s12594_s1 + $0x198] sm:$0xff]  }
  0xb5   : > { %9191 = vmatpush3.bf16.msra.mxu0 %v10073_v45  ;;  %9211 = vmatpush3.bf16.msra.mxu1 %v10074_v46  ;;  %v1958_v45 = vrot.slane %v1956_v35, 7  ;;  %v10095_v46 = vld [vmem:[%s12594_s1 + $0x58] sm:$0xff]   ;;  %v7535_v35 = vld [vmem:[%s12595_s2] ss:$0 sm:$0xff] }
  0xb6   : > { %9192 = vmatprep.subr.bf16.mxu0 %v10618_v0  ;;  %9212 = vmatprep.subr.bf16.mxu1 %v10618_v0 }
  0xb9   : > { %9193 = vmatpush3.bf16.msra.mxu0 %v10075_v47  ;;  %9213 = vmatpush3.bf16.msra.mxu1 %v10076_v48  ;;  %v10096_v47 = vld [vmem:[%s12594_s1 + $0x98] sm:$0xff]   ;;  %v10392_v48 = vld [vmem:[#allocation3 + $0x130] sm:$0xff]  }
  0xba   : > { %9194 = vmatprep.subr.bf16.mxu0 %v10618_v0  ;;  %9214 = vmatprep.subr.bf16.mxu1 %v10618_v0 }
  0xbd   : > { %9195 = vmatpush3.bf16.msra.mxu0 %v10077_v49  ;;  %9215 = vmatpush3.bf16.msra.mxu1 %v10078_v50  ;;  %v1940_v49 = vrot.slane %v1939_v36, 2  ;;  %v1954_v50 = vrot.slane %v1953_v37, 2  ;;  %v2125_v36 = vcombine.low %v10443_v19, %v10444_v20  ;;  %v2259_v37 = vcombine.low %v10445_v22, %v10446_v23  ;;  %v10131_v20 = vld [vmem:[%s12594_s1 + $0x160] sm:$0xff]  }
  0xbe   : > { %9196 = vmatprep.subr.bf16.mxu0 %v10618_v0  ;;  %9216 = vmatprep.subr.bf16.mxu1 %v10618_v0 }
  0xbf   : > { %v1945_v55 = vsel %vm11152_vm10, %v1940_v49, %v1944_v43  ;;  %v2395_v43 = vrot.slane %v2393_v31, 6  ;;  %v2424_v49 = vshll.u32 %v11269_v30, 16  ;;  %v10133_v31 = vld [vmem:[%s12594_s1 + $0x158] sm:$0xff]  }
  0xc1   : > { %9197 = vmatpush3.bf16.msra.mxu0 %v10079_v53  ;;  %9217 = vmatpush3.bf16.msra.mxu1 %v10080_v56  ;;  %v10098_v53 = vld [vmem:[%s12594_s1 + $0x90] sm:$0xff]   ;;  %v1959_v56 = vsel %vm11152_vm10, %v1954_v50, %v1958_v45 }
  0xc2   : > { %9198 = vmatprep.subr.bf16.mxu0 %v10618_v0  ;;  %9218 = vmatprep.subr.bf16.mxu1 %v10618_v0  ;;  %v1977_v61 = vcombine.low %v1945_v55, %v1959_v56  ;;  %v10127_v45 = vld [vmem:[%s12594_s1 + $0x170] sm:$0xff]  }
  0xc5   : > { %9199 = vmatpush3.bf16.msra.mxu0 %v10081_v58  ;;  %9219 = vmatpush3.bf16.msra.mxu1 %v10082_v60  ;;  %v10441_v58 = vld.sshfl [vmem:[%s10782_s11 + $0x3c] sm:$0xf pattern:$0x76325410]  ;;  %v1976_v60 = vcombine.low %v1917_v52, %v1931_v54  ;;  %v2435_v52 = vshrl.u32 %v11275_v34, 16 }
  0xc6   : > { %9224 = vmatprep.subr.bf16.mxu0 %v10618_v0  ;;  %9244 = vmatprep.subr.bf16.mxu1 %v10618_v0  ;;  %v1764_v5 = vcombine.low %v10441_v58, %v10442_v59  ;;  %v11297_v59 = vshll.u32 %v2367_v41, 16  ;;  %v7985_v41 = vld.sshfl [vmem:[%s10782_s11 + $0xa0] sm:$0x13 pattern:$0x76325410] }
  0xc8   : > { %9201 = vmatmul.mubr.bf16.vlgmr.msra.gmra.mxu0 %v1474_v3  ;;  %9221 = vmatmul.mubr.bf16.vlgmr.msra.gmra.mxu1 %v1630_v4  ;;  %v1991_v3 = vrot.slane %v1977_v61, %v10800_v27  ;;  %v10102_v4 = vld [vmem:[%s12594_s1 + $0x80] sm:$0xff]  }
  0xc9   : > { %9225 = vmatpush3.bf16.msra.mxu0 %v10087_v63  ;;  %9245 = vmatpush3.bf16.msra.mxu1 %v10088_v2  ;;  %v10101_v63 = vld [vmem:[%s12594_s1 + $0x40] sm:$0xff]   ;;  %v1984_v2 = vrot.slane %v1976_v60, %v10800_v27 }
  0xca   : > { %9226 = vmatprep.subr.bf16.mxu0 %v10618_v0  ;;  %9246 = vmatprep.subr.bf16.mxu1 %v10618_v0 }
  0xcb   : > { %9240 = vmatprep.mubr.msk.bf16.mxu0 %vm10619_vm0, %v10618_v0  ;;  %9260 = vmatprep.mubr.msk.bf16.mxu1 %vm10619_vm0, %v10618_v0  ;;  %v1992_v6 = vcombine.low %v1984_v2, %v1991_v3  ;;  %v2383_v2 = vcombine.high %v11269_v30, %v11269_v30 }
  0xcd   : > { %9227 = vmatpush3.bf16.msra.mxu0 %v10089_v14  ;;  %9247 = vmatpush3.bf16.msra.mxu1 %v10090_v15  ;;  %v10112_v14 = vld [vmem:[%s12594_s1 + $0x120] sm:$0xff]   ;;  %v10113_v15 = vld [vmem:[%s12594_s1 + $0xd8] sm:$0xff]   ;;  %v2430_v22 = vshll.u32 %v2383_v2, 16 }
  0xce   : > { %9228 = vmatprep.subr.bf16.mxu0 %v10618_v0  ;;  %9248 = vmatprep.subr.bf16.mxu1 %v10618_v0 }
  0xd1   : > { %9229 = vmatpush3.bf16.msra.mxu0 %v10091_v28  ;;  %9249 = vmatpush3.bf16.msra.mxu1 %v10092_v29  ;;  %v7898_v28 = vld.sshfl [vmem:[%s10782_s11 + $0x54] sm:$0x13 pattern:$0x76325410]  ;;  %v10120_v29 = vld [vmem:[%s12594_s1 + $0x100] sm:$0xff]  }
  0xd2   : > { %9230 = vmatprep.subr.bf16.mxu0 %v10618_v0  ;;  %9250 = vmatprep.subr.bf16.mxu1 %v10618_v0  ;;  %v2410_v40 = vshll.u32 %v7898_v28, 16  ;;  %v2375_v42 = vcombine.high %v7898_v28, %v7898_v28 }
  0xd4   : > { %v2412_v56 = vrot.slane %v2410_v40, 7  ;;  %v11299_v60 = vshll.u32 %v2375_v42, 16  ;;  %v10135_v42 = vld [vmem:[%s12594_s1 + $0x150] sm:$0xff]  }
  0xd5   : > { %9231 = vmatpush3.bf16.msra.mxu0 %v10093_v38  ;;  %9251 = vmatpush3.bf16.msra.mxu1 %v10094_v39  ;;  %v10126_v38 = vld [vmem:[%s12594_s1 + $0x1b8] sm:$0xff]   ;;  %v2407_v39 = vshrl.u32 %v7898_v28, 16 }
  0xd6   : > { %9232 = vmatprep.subr.bf16.mxu0 %v10618_v0  ;;  %9252 = vmatprep.subr.bf16.mxu1 %v10618_v0  ;;  %v2418_v28 = vrot.slane %v11299_v60, 7 }
  0xd7   : > { %v2409_v55 = vrot.slane %v2407_v39, 6 }
  0xd9   : > { %9233 = vmatpush3.bf16.msra.mxu0 %v10095_v46  ;;  %9253 = vmatpush3.bf16.msra.mxu1 %v10096_v47  ;;  %v10128_v46 = vld [vmem:[%s12594_s1 + $0x1b0] sm:$0xff]   ;;  %v2421_v47 = vshrl.u32 %v11269_v30, 16 }
  0xda   : > { %9234 = vmatprep.subr.bf16.mxu0 %v10618_v0  ;;  %9254 = vmatprep.subr.bf16.mxu1 %v10618_v0 }
  0xdb   : > { %v2423_v3 = vrot.slane %v2421_v47, 6 }
  0xdd   : > { %9235 = vmatpush3.bf16.msra.mxu0 %v10097_v51  ;;  %9255 = vmatpush3.bf16.msra.mxu1 %v10098_v53  ;;  %v2438_v53 = vshll.u32 %v11275_v34, 16 }
  0xde   : > { %9236 = vmatprep.subr.bf16.mxu0 %v10618_v0  ;;  %9256 = vmatprep.subr.bf16.mxu1 %v10618_v0 }
  0xe1   : > { %9237 = vmatpush3.bf16.msra.mxu0 %v10099_v57  ;;  %9257 = vmatpush3.bf16.msra.mxu1 %v10100_v62  ;;  %v10129_v62 = vld [vmem:[%s12594_s1 + $0x168] sm:$0xff]  }
  0xe2   : > { %9238 = vmatprep.subr.bf16.mxu0 %v10618_v0  ;;  %9258 = vmatprep.subr.bf16.mxu1 %v10618_v0 }
  0xe5   : > { %9239 = vmatpush3.bf16.msra.mxu0 %v10101_v63  ;;  %9259 = vmatpush3.bf16.msra.mxu1 %v10102_v4  ;;  %v10130_v63 = vld [vmem:[%s12594_s1 + $0x1a8] sm:$0xff]   ;;  %v2426_v4 = vrot.slane %v2424_v49, 7  ;;  %v7986_v49 = vld.sshfl [vmem:[%s10782_s11 + $0xa4] sm:$0x13 pattern:$0x76325410] }
  0xe6   : > { %9264 = vmatprep.subr.bf16.mxu0 %v10618_v0  ;;  %9284 = vmatprep.subr.bf16.mxu1 %v10618_v0  ;;  %v2863_v2 = vcombine.high %v7986_v49, %v7986_v49 }
  0xe8   : > { %9241 = vmatmul.mubr.bf16.vlgmr.msra.gmra.mxu0 %v1764_v5  ;;  %9261 = vmatmul.mubr.bf16.vlgmr.msra.gmra.mxu1 %v1992_v6 }
  0xe9   : > { %9265 = vmatpush3.bf16.msra.mxu0 %v10105_v7  ;;  %9285 = vmatpush3.bf16.msra.mxu1 %v10106_v8  ;;  %v2391_v7 = vcombine.high %v11275_v34, %v11275_v34  ;;  %v2399_v8 = vor.u32 %v2398_v44, %v2395_v43  ;;  %v2432_v34 = vrot.slane %v2430_v22, 7  ;;  %v10136_v44 = vld [vmem:[%s12594_s1 + $0x190] sm:$0xff]  }
  0xea   : > { %9266 = vmatprep.subr.bf16.mxu0 %v10618_v0  ;;  %9286 = vmatprep.subr.bf16.mxu1 %v10618_v0 }
  0xeb   : > { %9280 = vmatprep.mubr.msk.bf16.mxu0 %vm10619_vm0, %v10618_v0  ;;  %9300 = vmatprep.mubr.msk.bf16.mxu1 %vm10619_vm0, %v10618_v0  ;;  %v2400_v23 = vrot.slane %v2399_v8, 2  ;;  %v2444_v30 = vshll.u32 %v2391_v7, 16 }
  0xed   : > { %9267 = vmatpush3.bf16.msra.mxu0 %v10107_v9  ;;  %9287 = vmatpush3.bf16.msra.mxu1 %v10108_v10  ;;  %v2437_v9 = vrot.slane %v2435_v52, 6  ;;  %v2440_v10 = vrot.slane %v2438_v53, 7  ;;  %v2446_v40 = vrot.slane %v2444_v30, 7  ;;  %v10137_v52 = vld [vmem:[%s12594_s1 + $0x148] sm:$0xff]  }
  0xee   : > { %9268 = vmatprep.subr.bf16.mxu0 %v10618_v0  ;;  %9288 = vmatprep.subr.bf16.mxu1 %v10618_v0  ;;  %v10447_v53 = vld.sshfl [vmem:[%s10782_s11 + $0xc8] sm:$0xf pattern:$0x76325410] }
  0xf1   : > { %9269 = vmatpush3.bf16.msra.mxu0 %v10109_v11  ;;  %9289 = vmatpush3.bf16.msra.mxu1 %v10110_v12  ;;  %v325_v11 = vld [vmem:[#allocation2 + $0x3c] sm:$0x7]  ;;  %v328_v12 = vld [vmem:[#allocation2 + $0x40] sm:$0x7] }
  0xf2   : > { %9270 = vmatprep.subr.bf16.mxu0 %v10618_v0  ;;  %9290 = vmatprep.subr.bf16.mxu1 %v10618_v0 }
  0xf5   : > { %9271 = vmatpush3.bf16.msra.mxu0 %v10111_v13  ;;  %9291 = vmatpush3.bf16.msra.mxu1 %v10112_v14  ;;  %v2413_v14 = vor.u32 %v2412_v56, %v2409_v55  ;;  %v10448_v56 = vld.sshfl [vmem:[%s10782_s11 + $0xd0] sm:$0xf pattern:$0x76325410] }
  0xf6   : > { %9272 = vmatprep.subr.bf16.mxu0 %v10618_v0  ;;  %9292 = vmatprep.subr.bf16.mxu1 %v10618_v0 }
  0xf9   : > { %9273 = vmatpush3.bf16.msra.mxu0 %v10113_v15  ;;  %9293 = vmatpush3.bf16.msra.mxu1 %v10114_v16  ;;  %v326_v15 = vsel %vm10733_vm3, 0, %v325_v11  ;;  %v329_v16 = vsel %vm10733_vm3, 0, %v328_v12  ;;  %v10143_v12 = vld [vmem:[%s12594_s1 + $0x1f8] sm:$0xff]  }
  0xfa   : > { %9274 = vmatprep.subr.bf16.mxu0 %v10618_v0  ;;  %9294 = vmatprep.subr.bf16.mxu1 %v10618_v0  ;;  %327 = vst [vmem:[#allocation2 + $0x3c] sm:$0x7] %v326_v15  ;;  %330 = vst [vmem:[#allocation2 + $0x40] sm:$0x7] %v329_v16  ;;  %v11395_v16 = vshll.u32 %v2863_v2, 16  ;;  %v10154_v2 = vld [vmem:[%s12594_s1 + $0x210] sm:$0xff]  }
  0xfc   : > { %v2906_v30 = vrot.slane %v11395_v16, 7 }
  0xfd   : > { %9275 = vmatpush3.bf16.msra.mxu0 %v10115_v17  ;;  %9295 = vmatpush3.bf16.msra.mxu1 %v10116_v18 }
  0xfe   : > { %9276 = vmatprep.subr.bf16.mxu0 %v10618_v0  ;;  %9296 = vmatprep.subr.bf16.mxu1 %v10618_v0 }
 0x101   : > { %9277 = vmatpush3.bf16.msra.mxu0 %v10117_v21  ;;  %9297 = vmatpush3.bf16.msra.mxu1 %v10118_v24  ;;  %v2427_v21 = vor.u32 %v2426_v4, %v2423_v3  ;;  %v2404_v24 = vrot.slane %v11297_v59, 7  ;;  %v7987_v59 = vld.sshfl [vmem:[%s10782_s11 + $0xa8] sm:$0x13 pattern:$0x76325410]  ;;  %v2895_v3 = vshrl.u32 %v7986_v49, 16 }
 0x102   : > { %9278 = vmatprep.subr.bf16.mxu0 %v10618_v0  ;;  %9298 = vmatprep.subr.bf16.mxu1 %v10618_v0  ;;  %v2898_v4 = vshll.u32 %v7986_v49, 16 }
 0x103   : > { %v2405_v43 = vsel %vm11152_vm10, %v2400_v23, %v2404_v24 }
 0x104   : > { %v2900_v15 = vrot.slane %v2898_v4, 7 }
 0x105   : > { %9279 = vmatpush3.bf16.msra.mxu0 %v10119_v26  ;;  %9299 = vmatpush3.bf16.msra.mxu1 %v10120_v29  ;;  %v2414_v26 = vrot.slane %v2413_v14, 2  ;;  %v2441_v29 = vor.u32 %v2440_v10, %v2437_v9  ;;  %v7988_v9 = vld.sshfl [vmem:[%s10782_s11 + $0xac] sm:$0x13 pattern:$0x76325410]  ;;  %v2871_v10 = vcombine.high %v7987_v59, %v7987_v59  ;;  %v2897_v14 = vrot.slane %v2895_v3, 6 }
 0x106   : > { %9304 = vmatprep.subr.bf16.mxu0 %v10618_v0  ;;  %9324 = vmatprep.subr.bf16.mxu1 %v10618_v0 }
 0x107   : > { %v2442_v39 = vrot.slane %v2441_v29, 2  ;;  %v11398_v23 = vshll.u32 %v2871_v10, 16  ;;  %v2879_v29 = vcombine.high %v7988_v9, %v7988_v9  ;;  %v10450_v10 = vld.sshfl [vmem:[%s10782_s11 + $0xe4] sm:$0xf pattern:$0x76325410] }
 0x108   : > { %v478_v50 = vpop.f32.mrf.mxu0  ;;  %v613_v51 = vpop.f32.mrf.mxu1  ;;  %9281 = vmatmul.mubr.bf16.vlgmr.msra.gmra.mxu0 %v2125_v36  ;;  %9301 = vmatmul.mubr.bf16.vlgmr.msra.gmra.mxu1 %v2259_v37  ;;  %v334_v36 = vld [vmem:[#allocation2 + $0x48] sm:$0x7] }
 0x109   : > { %v485_v54 = vadd.f32 %v7535_v35, %v478_v50  ;;  %9305 = vmatpush3.bf16.msra.mxu0 %v10125_v33  ;;  %9325 = vmatpush3.bf16.msra.mxu1 %v10126_v38  ;;  %v2428_v33 = vrot.slane %v2427_v21, 2  ;;  %v335_v38 = vsel %vm10733_vm3, 0, %v334_v36  ;;  %v2447_v47 = vsel %vm11152_vm10, %v2442_v39, %v2446_v40  ;;  %v10147_v40 = vld [vmem:[%s12594_s1 + $0x1e8] sm:$0xff]  }
 0x10a   : > { %v9042_v57 = vpop.f32.mrf.mxu0  ;;  %v9062_v58 = vpop.f32.mrf.mxu1  ;;  %9306 = vmatprep.subr.bf16.mxu0 %v10618_v0  ;;  %9326 = vmatprep.subr.bf16.mxu1 %v10618_v0  ;;  %336 = vst [vmem:[#allocation2 + $0x48] sm:$0x7] %v335_v38  ;;  %v2881_v50 = vshrl.u32 %v7985_v41, 16  ;;  %v2912_v21 = vshll.u32 %v7987_v59, 16 }
 0x10b   : > { %v11301_v61 = vadd.f32 %v613_v51, %v485_v54  ;;  %9320 = vmatprep.mubr.msk.bf16.mxu0 %vm10619_vm0, %v10618_v0  ;;  %9340 = vmatprep.mubr.msk.bf16.mxu1 %vm10619_vm0, %v10618_v0  ;;  %v2884_v51 = vshll.u32 %v7985_v41, 16  ;;  %v2855_v57 = vcombine.high %v7985_v41, %v7985_v41  ;;  %v10138_v58 = vld [vmem:[%s12594_s1 + $0x188] sm:$0xff]  }
 0x10c   : > { %v481_v5 = vpop.f32.mrf.mxu0  ;;  %v616_v6 = vpop.f32.mrf.mxu1  ;;  %v2883_v60 = vrot.slane %v2881_v50, 6  ;;  %v10148_v41 = vld [vmem:[%s12594_s1 + $0x228] sm:$0xff]   ;;  %v2901_v50 = vor.u32 %v2900_v15, %v2897_v14  ;;  %v10158_v14 = vld [vmem:[%s12594_s1 + $0x200] sm:$0xff]  }
 0x10d   : > { %v486_v13 = vadd.f32 %v7535_v35, %v481_v5  ;;  %9307 = vmatpush3.bf16.msra.mxu0 %v10127_v45  ;;  %9327 = vmatpush3.bf16.msra.mxu1 %v10128_v46  ;;  %v331_v35 = vld [vmem:[#allocation2 + $0x44] sm:$0x7]  ;;  %v2419_v45 = vsel %vm11152_vm10, %v2414_v26, %v2418_v28  ;;  %v2433_v46 = vsel %vm11152_vm10, %v2428_v33, %v2432_v34  ;;  %v11384_v8 = vshll.u32 %v2855_v57, 16  ;;  %v10145_v26 = vld [vmem:[%s12594_s1 + $0x1f0] sm:$0xff]  }
 0x10e   : > { %v9043_v17 = vpop.f32.mrf.mxu0  ;;  %v9063_v18 = vpop.f32.mrf.mxu1  ;;  %9308 = vmatprep.subr.bf16.mxu0 %v10618_v0  ;;  %9328 = vmatprep.subr.bf16.mxu1 %v10618_v0  ;;  %v332_v37 = vsel %vm10733_vm3, 0, %v331_v35  ;;  %v2464_v54 = vcombine.low %v2405_v43, %v2419_v45  ;;  %v2465_v55 = vcombine.low %v2433_v46, %v2447_v47  ;;  %v10140_v5 = vld [vmem:[%s12594_s1 + $0x180] sm:$0xff]   ;;  %v10146_v28 = vld [vmem:[%s12594_s1 + $0x230] sm:$0xff]   ;;  %v2914_v35 = vrot.slane %v2912_v21, 7 }
 0x10f   : > { %v11323_v19 = vadd.f32 %v616_v6, %v486_v13  ;;  %333 = vst [vmem:[#allocation2 + $0x44] sm:$0x7] %v332_v37  ;;  %v10144_v13 = vld [vmem:[%s12594_s1 + $0x238] sm:$0xff]   ;;  %v2613_v18 = vcombine.low %v10447_v53, %v10448_v56  ;;  %v2892_v22 = vrot.slane %v11384_v8, 7  ;;  %v2932_v43 = vshll.u32 %v2879_v29, 16  ;;  %v10150_v53 = vld [vmem:[%s12594_s1 + $0x220] sm:$0xff]  }
 0x110   : > { %v2472_v6 = vrot.slane %v2464_v54, %v10800_v27  ;;  %v2479_v7 = vrot.slane %v2465_v55, %v10800_v27  ;;  %v2920_v54 = vrot.slane %v11398_v23, 7  ;;  %v2902_v56 = vrot.slane %v2901_v50, 2  ;;  %v10155_v8 = vld [vmem:[%s12594_s1 + $0x1c8] sm:$0xff]   ;;  %v10164_v23 = vld [vmem:[%s12594_s1 + $0x70] sm:$0xff]   ;;  %v10181_v50 = vld [vmem:[%s12594_s1 + $0xb8] sm:$0xff]  }
 0x111   : > { %9309 = vmatpush3.bf16.msra.mxu0 %v10129_v62  ;;  %9329 = vmatpush3.bf16.msra.mxu1 %v10130_v63  ;;  %v2886_v62 = vrot.slane %v2884_v51, 7  ;;  %v10139_v63 = vld [vmem:[%s12594_s1 + $0x140] sm:$0xff]   ;;  %v2934_v57 = vrot.slane %v2932_v43, 7  ;;  %v10165_v29 = vld [vmem:[%s12594_s1 + $0x28] sm:$0xff]  }
 0x112   : > { %9310 = vmatprep.subr.bf16.mxu0 %v10618_v0  ;;  %9330 = vmatprep.subr.bf16.mxu1 %v10618_v0  ;;  %v2480_v17 = vcombine.low %v2472_v6, %v2479_v7  ;;  %v2907_v4 = vsel %vm11152_vm10, %v2902_v56, %v2906_v30  ;;  %v10449_v7 = vld.sshfl [vmem:[%s10782_s11 + $0xdc] sm:$0xf pattern:$0x76325410]  ;;  %v10166_v30 = vld [vmem:[%s12594_s1 + $0x68] sm:$0xff]  }
 0x113   : > { %v2887_v11 = vor.u32 %v2886_v62, %v2883_v60  ;;  %v10453_v43 = vld.sshfl [vmem:[%s10782_s11 + $0xb4] sm:$0xf pattern:$0x76325410] }
 0x115   : > { %9311 = vmatpush3.bf16.msra.mxu0 %v10131_v20  ;;  %9331 = vmatpush3.bf16.msra.mxu1 %v10132_v25  ;;  %v2909_v20 = vshrl.u32 %v7987_v59, 16  ;;  %v2888_v24 = vrot.slane %v2887_v11, 2  ;;  %v2923_v25 = vshrl.u32 %v7988_v9, 16  ;;  %v10152_v59 = vld [vmem:[%s12594_s1 + $0x218] sm:$0xff]  }
 0x116   : > { %9312 = vmatprep.subr.bf16.mxu0 %v10618_v0  ;;  %9332 = vmatprep.subr.bf16.mxu1 %v10618_v0 }
 0x117   : > { %v2911_v34 = vrot.slane %v2909_v20, 6  ;;  %v2893_v3 = vsel %vm11152_vm10, %v2888_v24, %v2892_v22  ;;  %v2747_v20 = vcombine.low %v10449_v7, %v10450_v10  ;;  %v10163_v22 = vld [vmem:[%s12594_s1 + $0x30] sm:$0xff]   ;;  %v10189_v7 = vld [vmem:[%s12594_s1 + $0x98] sm:$0xff]  }
 0x118   : > { %v2952_v11 = vcombine.low %v2893_v3, %v2907_v4  ;;  %v10192_v10 = vld [vmem:[%s12594_s1 + $0xd0] sm:$0xff]  }
 0x119   : > { %9313 = vmatpush3.bf16.msra.mxu0 %v10133_v31  ;;  %9333 = vmatpush3.bf16.msra.mxu1 %v10134_v32  ;;  %v2926_v31 = vshll.u32 %v7988_v9, 16  ;;  %v10156_v9 = vld [vmem:[%s12594_s1 + $0x208] sm:$0xff]  }
 0x11a   : > { %9314 = vmatprep.subr.bf16.mxu0 %v10618_v0  ;;  %9334 = vmatprep.subr.bf16.mxu1 %v10618_v0  ;;  %v2960_v15 = vrot.slane %v2952_v11, %v10800_v27  ;;  %v10455_v11 = vld.sshfl [vmem:[%s10782_s11 + $0xc8] sm:$0xf pattern:$0x76325410] }
 0x11d   : > { %9315 = vmatpush3.bf16.msra.mxu0 %v10135_v42  ;;  %9335 = vmatpush3.bf16.msra.mxu1 %v10136_v44  ;;  %v2928_v42 = vrot.slane %v2926_v31, 7 }
 0x11e   : > { %9316 = vmatprep.subr.bf16.mxu0 %v10618_v0  ;;  %9336 = vmatprep.subr.bf16.mxu1 %v10618_v0 }
 0x121   : > { %9317 = vmatpush3.bf16.msra.mxu0 %v10137_v52  ;;  %9337 = vmatpush3.bf16.msra.mxu1 %v10138_v58  ;;  %v10149_v52 = vld [vmem:[%s12594_s1 + $0x1e0] sm:$0xff]   ;;  %v10151_v58 = vld [vmem:[%s12594_s1 + $0x1d8] sm:$0xff]  }
 0x122   : > { %9318 = vmatprep.subr.bf16.mxu0 %v10618_v0  ;;  %9338 = vmatprep.subr.bf16.mxu1 %v10618_v0 }
 0x125   : > { %9319 = vmatpush3.bf16.msra.mxu0 %v10139_v63  ;;  %9339 = vmatpush3.bf16.msra.mxu1 %v10140_v5  ;;  %v10153_v63 = vld [vmem:[%s12594_s1 + $0x1d0] sm:$0xff]  }
 0x126   : > { %9344 = vmatprep.subr.bf16.mxu0 %v10618_v0  ;;  %9364 = vmatprep.subr.bf16.mxu1 %v10618_v0 }
 0x128   : > { %v748_v32 = vpop.f32.mrf.mxu0  ;;  %v883_v33 = vpop.f32.mrf.mxu1  ;;  %9321 = vmatmul.mubr.bf16.vlgmr.msra.gmra.mxu0 %v2480_v17  ;;  %9341 = vmatmul.mubr.bf16.vlgmr.msra.gmra.mxu1 %v2613_v18  ;;  %v10161_v17 = vld [vmem:[%s12594_s1 + $0x38] sm:$0xff]  }
 0x129   : > { %v755_v36 = vadd.f32 %v748_v32, %v11301_v61  ;;  %9345 = vmatpush3.bf16.msra.mxu0 %v10143_v12  ;;  %9365 = vmatpush3.bf16.msra.mxu1 %v10144_v13  ;;  %v2925_v61 = vrot.slane %v2923_v25, 6  ;;  %v10157_v13 = vld [vmem:[%s12594_s1 + $0x1c0] sm:$0xff]   ;;  %v10162_v18 = vld [vmem:[%s12594_s1 + $0x78] sm:$0xff]  }
 0x12a   : > { %v9082_v37 = vpop.f32.mrf.mxu0  ;;  %v9102_v38 = vpop.f32.mrf.mxu1  ;;  %9346 = vmatprep.subr.bf16.mxu0 %v10618_v0  ;;  %9366 = vmatprep.subr.bf16.mxu1 %v10618_v0 }
 0x12b   : > { %v11412_v39 = vadd.f32 %v883_v33, %v755_v36  ;;  %9360 = vmatprep.mubr.msk.bf16.mxu0 %vm10619_vm0, %v10618_v0  ;;  %9380 = vmatprep.mubr.msk.bf16.mxu1 %vm10619_vm0, %v10618_v0  ;;  %v2929_v55 = vor.u32 %v2928_v42, %v2925_v61  ;;  %v10168_v36 = vld [vmem:[%s12594_s1 + $0x60] sm:$0xff]   ;;  %v10169_v37 = vld [vmem:[%s12594_s1 + $0x18] sm:$0xff]   ;;  %v10452_v42 = vld.sshfl [vmem:[%s10782_s11 + $0xa8] sm:$0xf pattern:$0x76325410] }
 0x12c   : > { %v751_v44 = vpop.f32.mrf.mxu0  ;;  %v886_v45 = vpop.f32.mrf.mxu1  ;;  %v10170_v38 = vld [vmem:[%s12594_s1 + $0x58] sm:$0xff]   ;;  %v10451_v61 = vld.sshfl [vmem:[%s10782_s11 + $0xa0] sm:$0xf pattern:$0x76325410] }
 0x12d   : > { %v756_v46 = vadd.f32 %v751_v44, %v11323_v19  ;;  %9347 = vmatpush3.bf16.msra.mxu0 %v10145_v26  ;;  %9367 = vmatpush3.bf16.msra.mxu1 %v10146_v28  ;;  %v2915_v19 = vor.u32 %v2914_v35, %v2911_v34  ;;  %v2930_v62 = vrot.slane %v2929_v55, 2  ;;  %v10167_v35 = vld [vmem:[%s12594_s1 + $0x20] sm:$0xff]   ;;  %v10173_v44 = vld [vmem:[%s12594_s1 + $0x8] sm:$0xff]   ;;  %v10184_v55 = vld [vmem:[%s12594_s1 + $0xf0] sm:$0xff]  }
 0x12e   : > { %v9083_v47 = vpop.f32.mrf.mxu0  ;;  %v9103_v49 = vpop.f32.mrf.mxu1  ;;  %9348 = vmatprep.subr.bf16.mxu0 %v10618_v0  ;;  %9368 = vmatprep.subr.bf16.mxu1 %v10618_v0 }
 0x12f   : > { %v11427_v51 = vadd.f32 %v886_v45, %v756_v46  ;;  %v2916_v60 = vrot.slane %v2915_v19, 2  ;;  %v2935_v6 = vsel %vm11152_vm10, %v2930_v62, %v2934_v57  ;;  %v10174_v45 = vld [vmem:[%s12594_s1 + $0x48] sm:$0xff]   ;;  %v10454_v46 = vld.sshfl [vmem:[%s10782_s11 + $0xbc] sm:$0xf pattern:$0x76325410] }
 0x130   : > { %v10175_v47 = vld [vmem:[%s12594_s1] sm:$0xff]   ;;  %v3312_v19 = vcombine.low %v10453_v43, %v10454_v46  ;;  %v10186_v62 = vld [vmem:[%s12594_s1 + $0xe8] sm:$0xff]  }
 0x131   : > { %9349 = vmatpush3.bf16.msra.mxu0 %v10147_v40  ;;  %9369 = vmatpush3.bf16.msra.mxu1 %v10148_v41  ;;  %v2921_v5 = vsel %vm11152_vm10, %v2916_v60, %v2920_v54  ;;  %v10171_v40 = vld [vmem:[%s12594_s1 + $0x10] sm:$0xff]   ;;  %v10176_v49 = vld [vmem:[%s12594_s1 + $0x40] sm:$0xff]   ;;  %v10185_v60 = vld [vmem:[%s12594_s1 + $0xa8] sm:$0xff]  }
 0x132   : > { %9350 = vmatprep.subr.bf16.mxu0 %v10618_v0  ;;  %9370 = vmatprep.subr.bf16.mxu1 %v10618_v0  ;;  %v2953_v12 = vcombine.low %v2921_v5, %v2935_v6  ;;  %v10172_v41 = vld [vmem:[%s12594_s1 + $0x50] sm:$0xff]   ;;  %v10187_v5 = vld [vmem:[%s12594_s1 + $0xa0] sm:$0xff]   ;;  %v10205_v46 = vld [vmem:[%s12594_s1 + $0x128] sm:$0xff]  }
 0x133   : > { %v10183_v54 = vld [vmem:[%s12594_s1 + $0xb0] sm:$0xff]   ;;  %v10188_v6 = vld [vmem:[%s12594_s1 + $0xe0] sm:$0xff]  }
 0x134   : > { %v2967_v16 = vrot.slane %v2953_v12, %v10800_v27  ;;  %v10456_v12 = vld.sshfl [vmem:[%s10782_s11 + $0xd0] sm:$0xf pattern:$0x76325410] }
 0x135   : > { %9351 = vmatpush3.bf16.msra.mxu0 %v10149_v52  ;;  %9371 = vmatpush3.bf16.msra.mxu1 %v10150_v53  ;;  %v10182_v52 = vld [vmem:[%s12594_s1 + $0xf8] sm:$0xff]   ;;  %v3179_v53 = vcombine.low %v10451_v61, %v10452_v42 }
 0x136   : > { %9352 = vmatprep.subr.bf16.mxu0 %v10618_v0  ;;  %9372 = vmatprep.subr.bf16.mxu1 %v10618_v0  ;;  %v2968_v21 = vcombine.low %v2960_v15, %v2967_v16  ;;  %v10193_v16 = vld [vmem:[%s12594_s1 + $0x88] sm:$0xff]  }
 0x139   : > { %9353 = vmatpush3.bf16.msra.mxu0 %v10151_v58  ;;  %9373 = vmatpush3.bf16.msra.mxu1 %v10152_v59 }
 0x13a   : > { %9354 = vmatprep.subr.bf16.mxu0 %v10618_v0  ;;  %9374 = vmatprep.subr.bf16.mxu1 %v10618_v0 }
 0x13d   : > { %9355 = vmatpush3.bf16.msra.mxu0 %v10153_v63  ;;  %9375 = vmatpush3.bf16.msra.mxu1 %v10154_v2 }
 0x13e   : > { %9356 = vmatprep.subr.bf16.mxu0 %v10618_v0  ;;  %9376 = vmatprep.subr.bf16.mxu1 %v10618_v0 }
 0x141   : > { %9357 = vmatpush3.bf16.msra.mxu0 %v10155_v8  ;;  %9377 = vmatpush3.bf16.msra.mxu1 %v10156_v9  ;;  %v10190_v8 = vld [vmem:[%s12594_s1 + $0xd8] sm:$0xff]   ;;  %v10191_v9 = vld [vmem:[%s12594_s1 + $0x90] sm:$0xff]  }
 0x142   : > { %9358 = vmatprep.subr.bf16.mxu0 %v10618_v0  ;;  %9378 = vmatprep.subr.bf16.mxu1 %v10618_v0 }
 0x145   : > { %9359 = vmatpush3.bf16.msra.mxu0 %v10157_v13  ;;  %9379 = vmatpush3.bf16.msra.mxu1 %v10158_v14  ;;  %v10457_v13 = vld.sshfl [vmem:[%s10782_s11 + $0xf0] sm:$0xf pattern:$0x76325410] }
 0x146   : > { %9384 = vmatprep.subr.bf16.mxu0 %v10618_v0  ;;  %9404 = vmatprep.subr.bf16.mxu1 %v10618_v0  ;;  %v10458_v14 = vld.sshfl [vmem:[%s10782_s11 + $0xf8] sm:$0xf pattern:$0x76325410] }
 0x148   : > { %v11498_v24 = vpop.f32.mrf.mxu0  ;;  %v11500_v25 = vpop.f32.mrf.mxu1  ;;  %9361 = vmatmul.mubr.bf16.vlgmr.msra.gmra.mxu0 %v2747_v20  ;;  %9381 = vmatmul.mubr.bf16.vlgmr.msra.gmra.mxu1 %v2968_v21  ;;  %v10196_v21 = vld [vmem:[%s12594_s1 + $0xc0] sm:$0xff]  }
 0x149   : > { %9385 = vmatpush3.bf16.msra.mxu0 %v10161_v17  ;;  %9405 = vmatpush3.bf16.msra.mxu1 %v10162_v18  ;;  %v1025_v15 = vadd.f32 %v11498_v24, %v11412_v39  ;;  %v10194_v17 = vld [vmem:[%s12594_s1 + $0xc8] sm:$0xff]   ;;  %v10195_v18 = vld [vmem:[%s12594_s1 + $0x80] sm:$0xff]   ;;  %v3445_v24 = vcombine.low %v10455_v11, %v10456_v12  ;;  %v10461_v12 = vld.sshfl [vmem:[%s10782_s11 + $0x118] sm:$0xf pattern:$0x76325410] }
 0x14a   : > { %v9122_v26 = vpop.f32.mrf.mxu0  ;;  %v9142_v28 = vpop.f32.mrf.mxu1  ;;  %9386 = vmatprep.subr.bf16.mxu0 %v10618_v0  ;;  %9406 = vmatprep.subr.bf16.mxu1 %v10618_v0  ;;  %v10460_v11 = vld.sshfl [vmem:[%s10782_s11 + $0x10c] sm:$0xf pattern:$0x76325410] }
 0x14b   : > { %9400 = vmatprep.mubr.msk.bf16.mxu0 %vm10619_vm0, %v10618_v0  ;;  %9420 = vmatprep.mubr.msk.bf16.mxu1 %vm10619_vm0, %v10618_v0  ;;  %v1160_v39 = vadd.f32 %v11500_v25, %v1025_v15  ;;  %v3579_v25 = vcombine.low %v10457_v13, %v10458_v14  ;;  %v10462_v13 = vld.sshfl [vmem:[%s10782_s11 + $0x120] sm:$0xf pattern:$0x76325410]  ;;  %v10214_v14 = vld [vmem:[%s12594_s1 + $0x148] sm:$0xff]  }
 0x14c   : > { %v11514_v31 = vpop.f32.mrf.mxu0  ;;  %v11516_v32 = vpop.f32.mrf.mxu1  ;;  %v10215_v15 = vld [vmem:[%s12594_s1 + $0x100] sm:$0xff]  }
 0x14d   : > { %9387 = vmatpush3.bf16.msra.mxu0 %v10163_v22  ;;  %9407 = vmatpush3.bf16.msra.mxu1 %v10164_v23  ;;  %v1026_v20 = vadd.f32 %v11514_v31, %v11427_v51  ;;  %v10201_v23 = vld [vmem:[%s12594_s1 + $0x138] sm:$0xff]   ;;  %v10204_v31 = vld [vmem:[%s12594_s1 + $0x170] sm:$0xff]  }
 0x14e   : > { %v9123_v33 = vpop.f32.mrf.mxu0  ;;  %v9143_v34 = vpop.f32.mrf.mxu1  ;;  %9388 = vmatprep.subr.bf16.mxu0 %v10618_v0  ;;  %9408 = vmatprep.subr.bf16.mxu1 %v10618_v0  ;;  %v10202_v51 = vld [vmem:[%s12594_s1 + $0x178] sm:$0xff]  }
 0x14f   : > { %v1161_v26 = vadd.f32 %v11516_v32, %v1026_v20  ;;  %v10222_v20 = vld [vmem:[%s12594_s1 + $0x1f8] sm:$0xff]  }
 0x151   : > { %9389 = vmatpush3.bf16.msra.mxu0 %v10165_v29  ;;  %9409 = vmatpush3.bf16.msra.mxu1 %v10166_v30  ;;  %v10203_v30 = vld [vmem:[%s12594_s1 + $0x130] sm:$0xff]  }
 0x152   : > { %9390 = vmatprep.subr.bf16.mxu0 %v10618_v0  ;;  %9410 = vmatprep.subr.bf16.mxu1 %v10618_v0 }
 0x155   : > { %9391 = vmatpush3.bf16.msra.mxu0 %v10167_v35  ;;  %9411 = vmatpush3.bf16.msra.mxu1 %v10168_v36  ;;  %v310_v35 = vld [vmem:[#allocation2 + $0x28] sm:$0x7]  ;;  %v313_v36 = vld [vmem:[#allocation2 + $0x2c] sm:$0x7] }
 0x156   : > { %9392 = vmatprep.subr.bf16.mxu0 %v10618_v0  ;;  %9412 = vmatprep.subr.bf16.mxu1 %v10618_v0 }
 0x159   : > { %9393 = vmatpush3.bf16.msra.mxu0 %v10169_v37  ;;  %9413 = vmatpush3.bf16.msra.mxu1 %v10170_v38 }
 0x15a   : > { %9394 = vmatprep.subr.bf16.mxu0 %v10618_v0  ;;  %9414 = vmatprep.subr.bf16.mxu1 %v10618_v0 }
 0x15d   : > { %9395 = vmatpush3.bf16.msra.mxu0 %v10171_v40  ;;  %9415 = vmatpush3.bf16.msra.mxu1 %v10172_v41  ;;  %v311_v40 = vsel %vm10733_vm3, 0, %v310_v35  ;;  %v314_v41 = vsel %vm10733_vm3, 0, %v313_v36  ;;  %v10226_v35 = vld [vmem:[%s12594_s1 + $0x1e8] sm:$0xff]  }
 0x15e   : > { %9396 = vmatprep.subr.bf16.mxu0 %v10618_v0  ;;  %9416 = vmatprep.subr.bf16.mxu1 %v10618_v0  ;;  %312 = vst [vmem:[#allocation2 + $0x28] sm:$0x7] %v311_v40  ;;  %315 = vst [vmem:[#allocation2 + $0x2c] sm:$0x7] %v314_v41  ;;  %v10227_v41 = vld [vmem:[%s12594_s1 + $0x1a0] sm:$0xff]  }
 0x161   : > { %9397 = vmatpush3.bf16.msra.mxu0 %v10173_v44  ;;  %9417 = vmatpush3.bf16.msra.mxu1 %v10174_v45 }
 0x162   : > { %9398 = vmatprep.subr.bf16.mxu0 %v10618_v0  ;;  %9418 = vmatprep.subr.bf16.mxu1 %v10618_v0 }
 0x165   : > { %9399 = vmatpush3.bf16.msra.mxu0 %v10175_v47  ;;  %9419 = vmatpush3.bf16.msra.mxu1 %v10176_v49 }
 0x166   : > { %9424 = vmatprep.subr.bf16.mxu0 %v10618_v0  ;;  %9444 = vmatprep.subr.bf16.mxu1 %v10618_v0 }
 0x168   : > { %v1288_v56 = vpop.f32.mrf.mxu0  ;;  %v11578_v57 = vpop.f32.mrf.mxu1  ;;  %9401 = vmatmul.mubr.bf16.vlgmr.msra.gmra.mxu0 %v3179_v53  ;;  %9421 = vmatmul.mubr.bf16.vlgmr.msra.gmra.mxu1 %v3312_v19 }
 0x169   : > { %9425 = vmatpush3.bf16.msra.mxu0 %v10181_v50  ;;  %9445 = vmatpush3.bf16.msra.mxu1 %v10182_v52  ;;  %v1295_v22 = vadd.f32 %v1288_v56, %v1160_v39  ;;  %v10206_v52 = vld [vmem:[%s12594_s1 + $0x168] sm:$0xff]   ;;  %v10221_v39 = vld [vmem:[%s12594_s1 + $0x1b8] sm:$0xff]  }
 0x16a   : > { %v9162_v58 = vpop.f32.mrf.mxu0  ;;  %v9182_v59 = vpop.f32.mrf.mxu1  ;;  %9426 = vmatprep.subr.bf16.mxu0 %v10618_v0  ;;  %9446 = vmatprep.subr.bf16.mxu1 %v10618_v0 }
 0x16b   : > { %9440 = vmatprep.mubr.msk.bf16.mxu0 %vm10619_vm0, %v10618_v0  ;;  %9460 = vmatprep.mubr.msk.bf16.mxu1 %vm10619_vm0, %v10618_v0  ;;  %v1430_v28 = vadd.f32 %v11578_v57, %v1295_v22  ;;  %v10207_v57 = vld [vmem:[%s12594_s1 + $0x120] sm:$0xff]  }
 0x16c   : > { %v1291_v63 = vpop.f32.mrf.mxu0  ;;  %v11592_v2 = vpop.f32.mrf.mxu1 }
 0x16d   : > { %9427 = vmatpush3.bf16.msra.mxu0 %v10183_v54  ;;  %9447 = vmatpush3.bf16.msra.mxu1 %v10184_v55  ;;  %v1296_v29 = vadd.f32 %v1291_v63, %v1161_v26 }
 0x16e   : > { %v9163_v3 = vpop.f32.mrf.mxu0  ;;  %v9183_v4 = vpop.f32.mrf.mxu1  ;;  %9428 = vmatprep.subr.bf16.mxu0 %v10618_v0  ;;  %9448 = vmatprep.subr.bf16.mxu1 %v10618_v0 }
 0x16f   : > { %v1431_v61 = vadd.f32 %v11592_v2, %v1296_v29  ;;  %v319_v3 = vld [vmem:[#allocation2 + $0x34] sm:$0x7]  ;;  %v10209_v4 = vld [vmem:[%s12594_s1 + $0x118] sm:$0xff]  }
 0x171   : > { %9429 = vmatpush3.bf16.msra.mxu0 %v10185_v60  ;;  %9449 = vmatpush3.bf16.msra.mxu1 %v10186_v62  ;;  %v10208_v60 = vld [vmem:[%s12594_s1 + $0x160] sm:$0xff]   ;;  %v316_v62 = vld [vmem:[#allocation2 + $0x30] sm:$0x7] }
 0x172   : > { %9430 = vmatprep.subr.bf16.mxu0 %v10618_v0  ;;  %9450 = vmatprep.subr.bf16.mxu1 %v10618_v0  ;;  %v317_v63 = vsel %vm10733_vm3, 0, %v316_v62  ;;  %v10243_v62 = vld [vmem:[%s12594_s1 + $0x230] sm:$0xff]  }
 0x173   : > { %318 = vst [vmem:[#allocation2 + $0x30] sm:$0x7] %v317_v63  ;;  %v10244_v63 = vld [vmem:[%s12594_s1 + $0x30] sm:$0xff]  }
 0x175   : > { %9431 = vmatpush3.bf16.msra.mxu0 %v10187_v5  ;;  %9451 = vmatpush3.bf16.msra.mxu1 %v10188_v6  ;;  %v320_v5 = vsel %vm10733_vm3, 0, %v319_v3  ;;  %v10210_v6 = vld [vmem:[%s12594_s1 + $0x158] sm:$0xff]  }
 0x176   : > { %9432 = vmatprep.subr.bf16.mxu0 %v10618_v0  ;;  %9452 = vmatprep.subr.bf16.mxu1 %v10618_v0  ;;  %321 = vst [vmem:[#allocation2 + $0x34] sm:$0x7] %v320_v5 }
 0x179   : > { %9433 = vmatpush3.bf16.msra.mxu0 %v10189_v7  ;;  %9453 = vmatpush3.bf16.msra.mxu1 %v10190_v8  ;;  %v10211_v7 = vld [vmem:[%s12594_s1 + $0x110] sm:$0xff]  }
 0x17a   : > { %9434 = vmatprep.subr.bf16.mxu0 %v10618_v0  ;;  %9454 = vmatprep.subr.bf16.mxu1 %v10618_v0  ;;  %v10212_v8 = vld [vmem:[%s12594_s1 + $0x150] sm:$0xff]  }
 0x17d   : > { %9435 = vmatpush3.bf16.msra.mxu0 %v10191_v9  ;;  %9455 = vmatpush3.bf16.msra.mxu1 %v10192_v10  ;;  %v10459_v9 = vld.sshfl [vmem:[%s10782_s11 + $0x104] sm:$0xf pattern:$0x76325410] }
 0x17e   : > { %9436 = vmatprep.subr.bf16.mxu0 %v10618_v0  ;;  %9456 = vmatprep.subr.bf16.mxu1 %v10618_v0  ;;  %v10213_v10 = vld [vmem:[%s12594_s1 + $0x108] sm:$0xff]  }
 0x181   : > { %9437 = vmatpush3.bf16.msra.mxu0 %v10193_v16  ;;  %9457 = vmatpush3.bf16.msra.mxu1 %v10194_v17  ;;  %v10216_v16 = vld [vmem:[%s12594_s1 + $0x140] sm:$0xff]   ;;  %v3713_v17 = vcombine.low %v10459_v9, %v10460_v11 }
 0x182   : > { %9438 = vmatprep.subr.bf16.mxu0 %v10618_v0  ;;  %9458 = vmatprep.subr.bf16.mxu1 %v10618_v0  ;;  %v10248_v11 = vld [vmem:[%s12594_s1 + $0x20] sm:$0xff]  }
 0x185   : > { %9439 = vmatpush3.bf16.msra.mxu0 %v10195_v18  ;;  %9459 = vmatpush3.bf16.msra.mxu1 %v10196_v21  ;;  %v3847_v18 = vcombine.low %v10461_v12, %v10462_v13  ;;  %v10419_v21 = vld [vmem:[%s12595_s2] ss:$0 sm:$0xff]  ;;  %v10249_v12 = vld [vmem:[%s12594_s1 + $0x218] sm:$0xff]  }
 0x186   : > { %9464 = vmatprep.subr.bf16.mxu0 %v10618_v0  ;;  %9484 = vmatprep.subr.bf16.mxu1 %v10618_v0  ;;  %v10250_v13 = vld [vmem:[%s12594_s1 + $0x18] sm:$0xff]  }
 0x188   : > { %v1558_v33 = vpop.f32.mrf.mxu0  ;;  %v11665_v34 = vpop.f32.mrf.mxu1  ;;  %9441 = vmatmul.mubr.bf16.vlgmr.msra.gmra.mxu0 %v3445_v24  ;;  %9461 = vmatmul.mubr.bf16.vlgmr.msra.gmra.mxu1 %v3579_v25  ;;  %v10223_v24 = vld [vmem:[%s12594_s1 + $0x1b0] sm:$0xff]  }
 0x189   : > { %v1565_v32 = vadd.f32 %v1558_v33, %v1430_v28  ;;  %9465 = vmatpush3.bf16.msra.mxu0 %v10201_v23  ;;  %9485 = vmatpush3.bf16.msra.mxu1 %v10202_v51  ;;  %v1721_v22 = vadd.f32 %v10419_v21, %v11665_v34  ;;  %v10224_v25 = vld [vmem:[%s12594_s1 + $0x1f0] sm:$0xff]  }
 0x18a   : > { %v9202_v37 = vpop.f32.mrf.mxu0  ;;  %v9222_v38 = vpop.f32.mrf.mxu1  ;;  %9466 = vmatprep.subr.bf16.mxu0 %v10618_v0  ;;  %9486 = vmatprep.subr.bf16.mxu1 %v10618_v0 }
 0x18b   : > { %v1569_v42 = vcombine.high %v1565_v32, %v1565_v32  ;;  %1573 = vst [vmem:[%s11676_s20] sm:$0xf] %v1565_v32  ;;  %v1577_v43 = vmax.f32 %v1565_v32, 0.0  ;;  %9480 = vmatprep.mubr.msk.bf16.mxu0 %vm10619_vm0, %v10618_v0  ;;  %9500 = vmatprep.mubr.msk.bf16.mxu1 %vm10619_vm0, %v10618_v0  ;;  %v10225_v32 = vld [vmem:[%s12594_s1 + $0x1a8] sm:$0xff]  }
 0x18c   : > { %v1561_v44 = vpop.f32.mrf.mxu0  ;;  %v11683_v45 = vpop.f32.mrf.mxu1 }
 0x18d   : > { %1574 = vst [vmem:[%s11676_s20 + $0x4] sm:$0xf] %v1569_v42  ;;  %v1578_v47 = vmax.f32 %v1569_v42, 0.0  ;;  %v1581_v49 = vpack.c.bf16 %v1577_v43, %v1577_v43  ;;  %v1566_v50 = vadd.f32 %v1561_v44, %v1431_v61  ;;  %9467 = vmatpush3.bf16.msra.mxu0 %v10203_v30  ;;  %9487 = vmatpush3.bf16.msra.mxu1 %v10204_v31  ;;  %v10228_v61 = vld [vmem:[%s12594_s1 + $0x1e0] sm:$0xff]   ;;  %v10229_v42 = vld [vmem:[%s12594_s1 + $0x198] sm:$0xff]   ;;  %v10231_v44 = vld [vmem:[%s12594_s1 + $0x190] sm:$0xff]  }
 0x18e   : > { %v9203_v53 = vpop.f32.mrf.mxu0  ;;  %v9223_v19 = vpop.f32.mrf.mxu1  ;;  %9468 = vmatprep.subr.bf16.mxu0 %v10618_v0  ;;  %9488 = vmatprep.subr.bf16.mxu1 %v10618_v0  ;;  %v1722_v30 = vadd.f32 %v10419_v21, %v11683_v45  ;;  %v10230_v43 = vld [vmem:[%s12594_s1 + $0x1d8] sm:$0xff]   ;;  %v10232_v45 = vld [vmem:[%s12594_s1 + $0x1d0] sm:$0xff]   ;;  %v10254_v21 = vld [vmem:[%s12594_s1 + $0x8] sm:$0xff]  }
 0x18f   : > { %v1582_v54 = vpack.c.bf16 %v1578_v47, %v1578_v47  ;;  %1586 = vst [vmem:[#allocation2 + $0x3c] sm:$0x3] %v1581_v49  ;;  %v1570_v55 = vcombine.high %v1566_v50, %v1566_v50  ;;  %1575 = vst [vmem:[%s11676_s20 + $0x8] sm:$0xf] %v1566_v50  ;;  %v1579_v56 = vmax.f32 %v1566_v50, 0.0  ;;  %v10234_v53 = vld [vmem:[%s12594_s1 + $0x1c8] sm:$0xff]  }
 0x190   : > { %v10464_v47 = vld.sshfl [vmem:[%s10782_s11 + $0xc] sm:$0xf pattern:$0x76325410]  ;;  %v10235_v19 = vld [vmem:[%s12594_s1 + $0x180] sm:$0xff]  }
 0x191   : > { %1587 = vst [vmem:[#allocation2 + $0x40] sm:$0x3] %v1582_v54  ;;  %1576 = vst [vmem:[%s11676_s20 + $0xc] sm:$0xf] %v1570_v55  ;;  %v1580_v58 = vmax.f32 %v1570_v55, 0.0  ;;  %v1583_v59 = vpack.c.bf16 %v1579_v56, %v1579_v56  ;;  %9469 = vmatpush3.bf16.msra.mxu0 %v10205_v46  ;;  %9489 = vmatpush3.bf16.msra.mxu1 %v10206_v52  ;;  %v10233_v52 = vld [vmem:[%s12594_s1 + $0x188] sm:$0xff]  }
 0x192   : > { %9470 = vmatprep.subr.bf16.mxu0 %v10618_v0  ;;  %9490 = vmatprep.subr.bf16.mxu1 %v10618_v0  ;;  %v10463_v46 = vld.sshfl [vmem:[%s10782_s11 + $0x4] sm:$0xf pattern:$0x76325410] }
 0x193   : > { %v1584_v2 = vpack.c.bf16 %v1580_v58, %v1580_v58  ;;  %1588 = vst [vmem:[#allocation2 + $0x44] sm:$0x3] %v1583_v59  ;;  %v10465_v49 = vld.sshfl [vmem:[%s10782_s11 + $0x18] sm:$0xf pattern:$0x76325410]  ;;  %v3981_v55 = vcombine.low %v10463_v46, %v10464_v47 }
 0x194   : > { %v10466_v50 = vld.sshfl [vmem:[%s10782_s11 + $0x20] sm:$0xf pattern:$0x76325410]  ;;  %v10242_v58 = vld [vmem:[%s12594_s1 + $0x38] sm:$0xff]  }
 0x195   : > { %1589 = vst [vmem:[#allocation2 + $0x48] sm:$0x3] %v1584_v2  ;;  %9471 = vmatpush3.bf16.msra.mxu0 %v10207_v57  ;;  %9491 = vmatpush3.bf16.msra.mxu1 %v10208_v60  ;;  %v10236_v54 = vld [vmem:[%s12594_s1 + $0x1c0] sm:$0xff]   ;;  %v4115_v56 = vcombine.low %v10465_v49, %v10466_v50  ;;  %v10241_v57 = vld [vmem:[%s12594_s1 + $0x238] sm:$0xff]  }
 0x196   : > { %9472 = vmatprep.subr.bf16.mxu0 %v10618_v0  ;;  %9492 = vmatprep.subr.bf16.mxu1 %v10618_v0 }
 0x199   : > { %9473 = vmatpush3.bf16.msra.mxu0 %v10209_v4  ;;  %9493 = vmatpush3.bf16.msra.mxu1 %v10210_v6  ;;  %v10245_v6 = vld [vmem:[%s12594_s1 + $0x228] sm:$0xff]  }
 0x19a   : > { %9474 = vmatprep.subr.bf16.mxu0 %v10618_v0  ;;  %9494 = vmatprep.subr.bf16.mxu1 %v10618_v0 }
 0x19d   : > { %9475 = vmatpush3.bf16.msra.mxu0 %v10211_v7  ;;  %9495 = vmatpush3.bf16.msra.mxu1 %v10212_v8  ;;  %v10246_v7 = vld [vmem:[%s12594_s1 + $0x28] sm:$0xff]  }
 0x19e   : > { %9476 = vmatprep.subr.bf16.mxu0 %v10618_v0  ;;  %9496 = vmatprep.subr.bf16.mxu1 %v10618_v0 }
 0x1a1   : > { %9477 = vmatpush3.bf16.msra.mxu0 %v10213_v10  ;;  %9497 = vmatpush3.bf16.msra.mxu1 %v10214_v14  ;;  %v10247_v10 = vld [vmem:[%s12594_s1 + $0x220] sm:$0xff]   ;;  %v10251_v14 = vld [vmem:[%s12594_s1 + $0x210] sm:$0xff]  }
 0x1a2   : > { %9478 = vmatprep.subr.bf16.mxu0 %v10618_v0  ;;  %9498 = vmatprep.subr.bf16.mxu1 %v10618_v0 }
 0x1a5   : > { %9479 = vmatpush3.bf16.msra.mxu0 %v10215_v15  ;;  %9499 = vmatpush3.bf16.msra.mxu1 %v10216_v16  ;;  %v10252_v15 = vld [vmem:[%s12594_s1 + $0x10] sm:$0xff]  }
 0x1a6   : > { %9504 = vmatprep.subr.bf16.mxu0 %v10618_v0  ;;  %9524 = vmatprep.subr.bf16.mxu1 %v10618_v0  ;;  %v10467_v16 = vld.sshfl [vmem:[%s10782_s11 + $0x2c] sm:$0xf pattern:$0x76325410] }
 0x1a8   : > { %v1848_v23 = vpop.f32.mrf.mxu0  ;;  %v2076_v51 = vpop.f32.mrf.mxu1  ;;  %9481 = vmatmul.mubr.bf16.vlgmr.msra.gmra.mxu0 %v3713_v17  ;;  %9501 = vmatmul.mubr.bf16.vlgmr.msra.gmra.mxu1 %v3847_v18  ;;  %v10468_v17 = vld.sshfl [vmem:[%s10782_s11 + $0x34] sm:$0xf pattern:$0x76325410] }
 0x1a9   : > { %v1855_v26 = vadd.f32 %v1848_v23, %v1721_v22  ;;  %9505 = vmatpush3.bf16.msra.mxu0 %v10221_v39  ;;  %9525 = vmatpush3.bf16.msra.mxu1 %v10222_v20  ;;  %v10469_v18 = vld.sshfl [vmem:[%s10782_s11 + $0xc8] sm:$0xf pattern:$0x76325410]  ;;  %v10255_v22 = vld [vmem:[%s12594_s1 + $0x200] sm:$0xff]  }
 0x1aa   : > { %v9242_v28 = vpop.f32.mrf.mxu0  ;;  %v9262_v29 = vpop.f32.mrf.mxu1  ;;  %9506 = vmatprep.subr.bf16.mxu0 %v10618_v0  ;;  %9526 = vmatprep.subr.bf16.mxu1 %v10618_v0  ;;  %v10470_v39 = vld.sshfl [vmem:[%s10782_s11 + $0xd0] sm:$0xf pattern:$0x76325410]  ;;  %v10253_v20 = vld [vmem:[%s12594_s1 + $0x208] sm:$0xff]   ;;  %v10256_v23 = vld [vmem:[%s12594_s1] sm:$0xff]  }
 0x1ab   : > { %v11765_v31 = vadd.f32 %v2076_v51, %v1855_v26  ;;  %9520 = vmatprep.mubr.msk.bf16.mxu0 %vm10619_vm0, %v10618_v0  ;;  %9540 = vmatprep.mubr.msk.bf16.mxu1 %vm10619_vm0, %v10618_v0  ;;  %v8305_v51 = vld.sshfl [vmem:[%s10782_s11 + $0xa0] sm:$0x13 pattern:$0x76325410]  ;;  %v10261_v28 = vld [vmem:[%s12594_s1 + $0x78] sm:$0xff]  }
 0x1ac   : > { %v1851_v33 = vpop.f32.mrf.mxu0  ;;  %v2079_v34 = vpop.f32.mrf.mxu1  ;;  %v8306_v26 = vld.sshfl [vmem:[%s10782_s11 + $0xa4] sm:$0x13 pattern:$0x76325410]  ;;  %v10262_v29 = vld [vmem:[%s12594_s1 + $0xb8] sm:$0xff]   ;;  %v4647_v49 = vcombine.high %v8305_v51, %v8305_v51 }
 0x1ad   : > { %v1856_v36 = vadd.f32 %v1851_v33, %v1722_v30  ;;  %9507 = vmatpush3.bf16.msra.mxu0 %v10223_v24  ;;  %9527 = vmatpush3.bf16.msra.mxu1 %v10224_v25  ;;  %v4249_v24 = vcombine.low %v10467_v16, %v10468_v17  ;;  %v4406_v25 = vcombine.low %v10469_v18, %v10470_v39  ;;  %v8307_v30 = vld.sshfl [vmem:[%s10782_s11 + $0xa8] sm:$0x13 pattern:$0x76325410] }
 0x1ae   : > { %v9243_v37 = vpop.f32.mrf.mxu0  ;;  %v9263_v38 = vpop.f32.mrf.mxu1  ;;  %9508 = vmatprep.subr.bf16.mxu0 %v10618_v0  ;;  %9528 = vmatprep.subr.bf16.mxu1 %v10618_v0  ;;  %v8308_v33 = vld.sshfl [vmem:[%s10782_s11 + $0xac] sm:$0x13 pattern:$0x76325410]  ;;  %v4655_v50 = vcombine.high %v8306_v26, %v8306_v26 }
 0x1af   : > { %v11779_v40 = vadd.f32 %v2079_v34, %v1856_v36  ;;  %v4673_v34 = vshrl.u32 %v8305_v51, 16  ;;  %v4676_v36 = vshll.u32 %v8305_v51, 16  ;;  %v4687_v37 = vshrl.u32 %v8306_v26, 16  ;;  %v10269_v51 = vld [vmem:[%s12594_s1 + $0x58] sm:$0xff]  }
 0x1b0   : > { %v4690_v38 = vshll.u32 %v8306_v26, 16 }
 0x1b1   : > { %9509 = vmatpush3.bf16.msra.mxu0 %v10225_v32  ;;  %9529 = vmatpush3.bf16.msra.mxu1 %v10226_v35 }
 0x1b2   : > { %9510 = vmatprep.subr.bf16.mxu0 %v10618_v0  ;;  %9530 = vmatprep.subr.bf16.mxu1 %v10618_v0 }
 0x1b5   : > { %9511 = vmatpush3.bf16.msra.mxu0 %v10227_v41  ;;  %9531 = vmatpush3.bf16.msra.mxu1 %v10228_v61  ;;  %v10263_v41 = vld [vmem:[%s12594_s1 + $0x70] sm:$0xff]  }
 0x1b6   : > { %9512 = vmatprep.subr.bf16.mxu0 %v10618_v0  ;;  %9532 = vmatprep.subr.bf16.mxu1 %v10618_v0  ;;  %v10264_v61 = vld [vmem:[%s12594_s1 + $0xb0] sm:$0xff]  }
 0x1b9   : > { %9513 = vmatpush3.bf16.msra.mxu0 %v10229_v42  ;;  %9533 = vmatpush3.bf16.msra.mxu1 %v10230_v43  ;;  %v4701_v42 = vshrl.u32 %v8307_v30, 16  ;;  %v4704_v43 = vshll.u32 %v8307_v30, 16 }
 0x1ba   : > { %9514 = vmatprep.subr.bf16.mxu0 %v10618_v0  ;;  %9534 = vmatprep.subr.bf16.mxu1 %v10618_v0 }
 0x1bd   : > { %9515 = vmatpush3.bf16.msra.mxu0 %v10231_v44  ;;  %9535 = vmatpush3.bf16.msra.mxu1 %v10232_v45  ;;  %v4715_v44 = vshrl.u32 %v8308_v33, 16  ;;  %v4718_v45 = vshll.u32 %v8308_v33, 16 }
 0x1be   : > { %9516 = vmatprep.subr.bf16.mxu0 %v10618_v0  ;;  %9536 = vmatprep.subr.bf16.mxu1 %v10618_v0 }
 0x1c1   : > { %9517 = vmatpush3.bf16.msra.mxu0 %v10233_v52  ;;  %9537 = vmatpush3.bf16.msra.mxu1 %v10234_v53  ;;  %v4663_v52 = vcombine.high %v8307_v30, %v8307_v30  ;;  %v4675_v53 = vrot.slane %v4673_v34, 6  ;;  %v10272_v34 = vld [vmem:[%s12594_s1 + $0x90] sm:$0xff]  }
 0x1c2   : > { %9518 = vmatprep.subr.bf16.mxu0 %v10618_v0  ;;  %9538 = vmatprep.subr.bf16.mxu1 %v10618_v0 }
 0x1c5   : > { %9519 = vmatpush3.bf16.msra.mxu0 %v10235_v19  ;;  %9539 = vmatpush3.bf16.msra.mxu1 %v10236_v54 }
 0x1c6   : > { %9544 = vmatprep.subr.bf16.mxu0 %v10618_v0  ;;  %9564 = vmatprep.subr.bf16.mxu1 %v10618_v0 }
 0x1c8   : > { %v11833_v59 = vpop.f32.mrf.mxu0  ;;  %v11835_v60 = vpop.f32.mrf.mxu1  ;;  %9521 = vmatmul.mubr.bf16.vlgmr.msra.gmra.mxu0 %v3981_v55  ;;  %9541 = vmatmul.mubr.bf16.vlgmr.msra.gmra.mxu1 %v4115_v56  ;;  %v4671_v55 = vcombine.high %v8308_v33, %v8308_v33  ;;  %v4678_v56 = vrot.slane %v4676_v36, 7  ;;  %v10271_v33 = vld [vmem:[%s12594_s1 + $0x50] sm:$0xff]  }
 0x1c9   : > { %9545 = vmatpush3.bf16.msra.mxu0 %v10241_v57  ;;  %9565 = vmatpush3.bf16.msra.mxu1 %v10242_v58  ;;  %v4689_v57 = vrot.slane %v4687_v37, 6  ;;  %v4692_v58 = vrot.slane %v4690_v38, 7 }
 0x1ca   : > { %v9282_v2 = vpop.f32.mrf.mxu0  ;;  %v9302_v3 = vpop.f32.mrf.mxu1  ;;  %9546 = vmatprep.subr.bf16.mxu0 %v10618_v0  ;;  %9566 = vmatprep.subr.bf16.mxu1 %v10618_v0  ;;  %v4724_v39 = vshll.u32 %v4671_v55, 16 }
 0x1cb   : > { %9560 = vmatprep.mubr.msk.bf16.mxu0 %vm10619_vm0, %v10618_v0  ;;  %9580 = vmatprep.mubr.msk.bf16.mxu1 %vm10619_vm0, %v10618_v0  ;;  %v4703_v2 = vrot.slane %v4701_v42, 6  ;;  %v4706_v3 = vrot.slane %v4704_v43, 7  ;;  %v4693_v16 = vor.u32 %v4692_v58, %v4689_v57 }
 0x1cc   : > { %v11849_v4 = vpop.f32.mrf.mxu0  ;;  %v11851_v5 = vpop.f32.mrf.mxu1 }
 0x1cd   : > { %9547 = vmatpush3.bf16.msra.mxu0 %v10243_v62  ;;  %9567 = vmatpush3.bf16.msra.mxu1 %v10244_v63  ;;  %v10265_v62 = vld [vmem:[%s12594_s1 + $0x68] sm:$0xff]   ;;  %v4707_v17 = vor.u32 %v4706_v3, %v4703_v2  ;;  %v10282_v2 = vld [vmem:[%s12594_s1 + $0x130] sm:$0xff]  }
 0x1ce   : > { %v9283_v8 = vpop.f32.mrf.mxu0  ;;  %v9303_v9 = vpop.f32.mrf.mxu1  ;;  %9548 = vmatprep.subr.bf16.mxu0 %v10618_v0  ;;  %9568 = vmatprep.subr.bf16.mxu1 %v10618_v0  ;;  %v10266_v63 = vld [vmem:[%s12594_s1 + $0xa8] sm:$0xff]  }
 0x1cf   : > { %v4708_v26 = vrot.slane %v4707_v17, 2 }
 0x1d1   : > { %9549 = vmatpush3.bf16.msra.mxu0 %v10245_v6  ;;  %9569 = vmatpush3.bf16.msra.mxu1 %v10246_v7  ;;  %v4717_v6 = vrot.slane %v4715_v44, 6  ;;  %v4720_v7 = vrot.slane %v4718_v45, 7  ;;  %v2216_v44 = vadd.f32 %v11833_v59, %v11765_v31  ;;  %v10273_v45 = vld [vmem:[%s12594_s1 + $0x48] sm:$0xff]   ;;  %v2217_v59 = vadd.f32 %v11849_v4, %v11779_v40  ;;  %v10279_v4 = vld [vmem:[%s12594_s1 + $0xf8] sm:$0xff]  }
 0x1d2   : > { %9550 = vmatprep.subr.bf16.mxu0 %v10618_v0  ;;  %9570 = vmatprep.subr.bf16.mxu1 %v10618_v0 }
 0x1d3   : > { %v4721_v18 = vor.u32 %v4720_v7, %v4717_v6  ;;  %v2350_v31 = vadd.f32 %v11835_v60, %v2216_v44  ;;  %v2351_v40 = vadd.f32 %v11851_v5, %v2217_v59  ;;  %v10288_v44 = vld [vmem:[%s12594_s1 + $0x118] sm:$0xff]  }
 0x1d5   : > { %9551 = vmatpush3.bf16.msra.mxu0 %v10247_v10  ;;  %9571 = vmatpush3.bf16.msra.mxu1 %v10248_v11  ;;  %v4679_v10 = vor.u32 %v4678_v56, %v4675_v53  ;;  %v4682_v11 = vshll.u32 %v4647_v49, 16  ;;  %v10280_v56 = vld [vmem:[%s12594_s1 + $0x138] sm:$0xff]  }
 0x1d6   : > { %9552 = vmatprep.subr.bf16.mxu0 %v10618_v0  ;;  %9572 = vmatprep.subr.bf16.mxu1 %v10618_v0 }
 0x1d9   : > { %9553 = vmatpush3.bf16.msra.mxu0 %v10249_v12  ;;  %9573 = vmatpush3.bf16.msra.mxu1 %v10250_v13  ;;  %v4696_v12 = vshll.u32 %v4655_v50, 16  ;;  %v4710_v13 = vshll.u32 %v4663_v52, 16  ;;  %v10275_v50 = vld [vmem:[%s12594_s1 + $0x40] sm:$0xff]  }
 0x1da   : > { %9554 = vmatprep.subr.bf16.mxu0 %v10618_v0  ;;  %9574 = vmatprep.subr.bf16.mxu1 %v10618_v0  ;;  %v10276_v52 = vld [vmem:[%s12594_s1 + $0x80] sm:$0xff]  }
 0x1dd   : > { %9555 = vmatpush3.bf16.msra.mxu0 %v10251_v14  ;;  %9575 = vmatpush3.bf16.msra.mxu1 %v10252_v15  ;;  %v10267_v14 = vld [vmem:[%s12594_s1 + $0x60] sm:$0xff]  }
 0x1de   : > { %9556 = vmatprep.subr.bf16.mxu0 %v10618_v0  ;;  %9576 = vmatprep.subr.bf16.mxu1 %v10618_v0  ;;  %v10268_v15 = vld [vmem:[%s12594_s1 + $0xa0] sm:$0xff]  }
 0x1e1   : > { %9557 = vmatpush3.bf16.msra.mxu0 %v10253_v20  ;;  %9577 = vmatpush3.bf16.msra.mxu1 %v10254_v21  ;;  %v4680_v20 = vrot.slane %v4679_v10, 2  ;;  %v4684_v21 = vrot.slane %v4682_v11, 7 }
 0x1e2   : > { %9558 = vmatprep.subr.bf16.mxu0 %v10618_v0  ;;  %9578 = vmatprep.subr.bf16.mxu1 %v10618_v0 }
 0x1e3   : > { %v4685_v30 = vsel %vm11152_vm10, %v4680_v20, %v4684_v21  ;;  %v301_v20 = vld [vmem:[#allocation2 + $0x1c] sm:$0x7] }
 0x1e5   : > { %9559 = vmatpush3.bf16.msra.mxu0 %v10255_v22  ;;  %9579 = vmatpush3.bf16.msra.mxu1 %v10256_v23  ;;  %v4698_v22 = vrot.slane %v4696_v12, 7  ;;  %v4712_v23 = vrot.slane %v4710_v13, 7  ;;  %v10284_v12 = vld [vmem:[%s12594_s1 + $0x128] sm:$0xff]  }
 0x1e6   : > { %9584 = vmatprep.subr.bf16.mxu0 %v10618_v0  ;;  %9604 = vmatprep.subr.bf16.mxu1 %v10618_v0 }
 0x1e7   : > { %v4713_v37 = vsel %vm11152_vm10, %v4708_v26, %v4712_v23  ;;  %v302_v26 = vsel %vm10733_vm3, 0, %v301_v20 }
 0x1e8   : > { %v11917_v32 = vpop.f32.mrf.mxu0  ;;  %v11919_v35 = vpop.f32.mrf.mxu1  ;;  %9561 = vmatmul.mubr.bf16.vlgmr.msra.gmra.mxu0 %v4249_v24  ;;  %9581 = vmatmul.mubr.bf16.vlgmr.msra.gmra.mxu1 %v4406_v25  ;;  %v10270_v24 = vld [vmem:[%s12594_s1 + $0x98] sm:$0xff]   ;;  %v4694_v25 = vrot.slane %v4693_v16, 2  ;;  %303 = vst [vmem:[#allocation2 + $0x1c] sm:$0x7] %v302_v26 }
 0x1e9   : > { %9585 = vmatpush3.bf16.msra.mxu0 %v10261_v28  ;;  %9605 = vmatpush3.bf16.msra.mxu1 %v10262_v29  ;;  %v4722_v28 = vrot.slane %v4721_v18, 2  ;;  %v4726_v29 = vrot.slane %v4724_v39, 7  ;;  %v2571_v53 = vadd.f32 %v11917_v32, %v2350_v31  ;;  %v298_v18 = vld [vmem:[#allocation2 + $0x18] sm:$0x7] }
 0x1ea   : > { %v9322_v46 = vpop.f32.mrf.mxu0  ;;  %v9342_v47 = vpop.f32.mrf.mxu1  ;;  %9586 = vmatprep.subr.bf16.mxu0 %v10618_v0  ;;  %9606 = vmatprep.subr.bf16.mxu1 %v10618_v0  ;;  %v4699_v36 = vsel %vm11152_vm10, %v4694_v25, %v4698_v22  ;;  %v299_v39 = vsel %vm10733_vm3, 0, %v298_v18 }
 0x1eb   : > { %9600 = vmatprep.mubr.msk.bf16.mxu0 %vm10619_vm0, %v10618_v0  ;;  %9620 = vmatprep.mubr.msk.bf16.mxu1 %vm10619_vm0, %v10618_v0  ;;  %v4727_v38 = vsel %vm11152_vm10, %v4722_v28, %v4726_v29  ;;  %v4744_v42 = vcombine.low %v4685_v30, %v4699_v36  ;;  %v10274_v46 = vld [vmem:[%s12594_s1 + $0x88] sm:$0xff]   ;;  %v2704_v32 = vadd.f32 %v11919_v35, %v2571_v53 }
 0x1ec   : > { %v11933_v19 = vpop.f32.mrf.mxu0  ;;  %v11935_v54 = vpop.f32.mrf.mxu1  ;;  %v4745_v43 = vcombine.low %v4713_v37, %v4727_v38  ;;  %300 = vst [vmem:[#allocation2 + $0x18] sm:$0x7] %v299_v39  ;;  %v3127_v36 = vld [vmem:[#allocation2 + $0x28] sm:$0x7] }
 0x1ed   : > { %9587 = vmatpush3.bf16.msra.mxu0 %v10263_v41  ;;  %9607 = vmatpush3.bf16.msra.mxu1 %v10264_v61  ;;  %v10471_v41 = vld.sshfl [vmem:[%s10782_s11 + $0xdc] sm:$0xf pattern:$0x76325410]  ;;  %v4752_v47 = vrot.slane %v4744_v42, %v10800_v27  ;;  %v2572_v57 = vadd.f32 %v11933_v19, %v2351_v40  ;;  %v10289_v40 = vld [vmem:[%s12594_s1 + $0xd0] sm:$0xff]  }
 0x1ee   : > { %v9323_v8 = vpop.f32.mrf.mxu0  ;;  %v9343_v9 = vpop.f32.mrf.mxu1  ;;  %9588 = vmatprep.subr.bf16.mxu0 %v10618_v0  ;;  %9608 = vmatprep.subr.bf16.mxu1 %v10618_v0  ;;  %v10472_v61 = vld.sshfl [vmem:[%s10782_s11 + $0xe4] sm:$0xf pattern:$0x76325410]  ;;  %v4759_v49 = vrot.slane %v4745_v43, %v10800_v27  ;;  %v10287_v43 = vld [vmem:[%s12594_s1 + $0xd8] sm:$0xff]  }
 0x1ef   : > { %v4539_v60 = vcombine.low %v10471_v41, %v10472_v61  ;;  %v2705_v19 = vadd.f32 %v11935_v54, %v2572_v57  ;;  %v10283_v54 = vld [vmem:[%s12594_s1 + $0xe8] sm:$0xff]  }
 0x1f0   : > { %v4760_v55 = vcombine.low %v4752_v47, %v4759_v49 }
 0x1f1   : > { %9589 = vmatpush3.bf16.msra.mxu0 %v10265_v62  ;;  %9609 = vmatpush3.bf16.msra.mxu1 %v10266_v63  ;;  %v10281_v63 = vld [vmem:[%s12594_s1 + $0xf0] sm:$0xff]  }
 0x1f2   : > { %9590 = vmatprep.subr.bf16.mxu0 %v10618_v0  ;;  %9610 = vmatprep.subr.bf16.mxu1 %v10618_v0 }
 0x1f5   : > { %9591 = vmatpush3.bf16.msra.mxu0 %v10267_v14  ;;  %9611 = vmatpush3.bf16.msra.mxu1 %v10268_v15 }
 0x1f6   : > { %9592 = vmatprep.subr.bf16.mxu0 %v10618_v0  ;;  %9612 = vmatprep.subr.bf16.mxu1 %v10618_v0 }
 0x1f9   : > { %9593 = vmatpush3.bf16.msra.mxu0 %v10269_v51  ;;  %9613 = vmatpush3.bf16.msra.mxu1 %v10270_v24  ;;  %v10285_v51 = vld [vmem:[%s12594_s1 + $0xe0] sm:$0xff]  }
 0x1fa   : > { %9594 = vmatprep.subr.bf16.mxu0 %v10618_v0  ;;  %9614 = vmatprep.subr.bf16.mxu1 %v10618_v0  ;;  %v10286_v24 = vld [vmem:[%s12594_s1 + $0x120] sm:$0xff]  }
 0x1fd   : > { %9595 = vmatpush3.bf16.msra.mxu0 %v10271_v33  ;;  %9615 = vmatpush3.bf16.msra.mxu1 %v10272_v34  ;;  %v10383_v34 = vld [vmem:[#allocation3 + $0xb8] sm:$0xff]  }
 0x1fe   : > { %9596 = vmatprep.subr.bf16.mxu0 %v10618_v0  ;;  %9616 = vmatprep.subr.bf16.mxu1 %v10618_v0 }
 0x201   : > { %9597 = vmatpush3.bf16.msra.mxu0 %v10273_v45  ;;  %9617 = vmatpush3.bf16.msra.mxu1 %v10274_v46  ;;  %v3130_v45 = vld [vmem:[#allocation2 + $0x2c] sm:$0x7] }
 0x202   : > { %9598 = vmatprep.subr.bf16.mxu0 %v10618_v0  ;;  %9618 = vmatprep.subr.bf16.mxu1 %v10618_v0 }
 0x205   : > { %9599 = vmatpush3.bf16.msra.mxu0 %v10275_v50  ;;  %9619 = vmatpush3.bf16.msra.mxu1 %v10276_v52 }
 0x206   : > { %9624 = vmatprep.subr.bf16.mxu0 %v10618_v0  ;;  %9644 = vmatprep.subr.bf16.mxu1 %v10618_v0 }
 0x208   : > { %v2831_v58 = vpop.f32.mrf.mxu0  ;;  %v3052_v5 = vpop.f32.mrf.mxu1  ;;  %9601 = vmatmul.mubr.bf16.vlgmr.msra.gmra.mxu0 %v4539_v60  ;;  %9621 = vmatmul.mubr.bf16.vlgmr.msra.gmra.mxu1 %v4760_v55  ;;  %v3133_v55 = vld [vmem:[#allocation2 + $0x30] sm:$0x7] }
 0x209   : > { %v2838_v62 = vadd.f32 %v2831_v58, %v2704_v32  ;;  %9625 = vmatpush3.bf16.msra.mxu0 %v10279_v4  ;;  %9645 = vmatpush3.bf16.msra.mxu1 %v10280_v56  ;;  %v10290_v4 = vld [vmem:[%s12594_s1 + $0x110] sm:$0xff]   ;;  %v10473_v58 = vld.sshfl [vmem:[%s10782_s11 + $0x118] sm:$0xf pattern:$0x76325410] }
 0x20a   : > { %v9362_v3 = vpop.f32.mrf.mxu0  ;;  %v9382_v35 = vpop.f32.mrf.mxu1  ;;  %9626 = vmatprep.subr.bf16.mxu0 %v10618_v0  ;;  %9646 = vmatprep.subr.bf16.mxu1 %v10618_v0  ;;  %v3136_v32 = vld [vmem:[#allocation2 + $0x34] sm:$0x7] }
 0x20b   : > { %v3059_v6 = vadd.f32 %v3052_v5, %v2838_v62  ;;  %9640 = vmatprep.mubr.msk.bf16.mxu0 %vm10619_vm0, %v10618_v0  ;;  %9660 = vmatprep.mubr.msk.bf16.mxu1 %vm10619_vm0, %v10618_v0  ;;  %v10474_v62 = vld.sshfl [vmem:[%s10782_s11 + $0x120] sm:$0xf pattern:$0x76325410]  ;;  %v10291_v35 = vld [vmem:[%s12594_s1 + $0xc8] sm:$0xff]  }
 0x20c   : > { %v2834_v7 = vpop.f32.mrf.mxu0  ;;  %v3055_v8 = vpop.f32.mrf.mxu1 }
 0x20d   : > { %v3063_v9 = vcombine.high %v3059_v6, %v3059_v6  ;;  %8013 = vst [vmem:[%s11676_s20 + $0x10] sm:$0xf] %v3059_v6  ;;  %v3072_v10 = vmax.f32 %v3059_v6, 0.0  ;;  %v2839_v11 = vadd.f32 %v2834_v7, %v2705_v19  ;;  %9627 = vmatpush3.bf16.msra.mxu0 %v10281_v63  ;;  %9647 = vmatpush3.bf16.msra.mxu1 %v10282_v2  ;;  %v10292_v19 = vld [vmem:[%s12594_s1 + $0x108] sm:$0xff]   ;;  %v10293_v6 = vld [vmem:[%s12594_s1 + $0xc0] sm:$0xff]  }
 0x20e   : > { %v9363_v13 = vpop.f32.mrf.mxu0  ;;  %v9383_v14 = vpop.f32.mrf.mxu1  ;;  %9628 = vmatprep.subr.bf16.mxu0 %v10618_v0  ;;  %9648 = vmatprep.subr.bf16.mxu1 %v10618_v0  ;;  %v10475_v63 = vld.sshfl [vmem:[%s10782_s11 + $0x12c] sm:$0xf pattern:$0x76325410]  ;;  %v10294_v7 = vld [vmem:[%s12594_s1 + $0x100] sm:$0xff]  }
 0x20f   : > { %8014 = vst [vmem:[%s11676_s20 + $0x14] sm:$0xf] %v3063_v9  ;;  %v3073_v15 = vmax.f32 %v3063_v9, 0.0  ;;  %v8609_v16 = vpack.c.bf16 %v3072_v10, %v3072_v10  ;;  %v3060_v17 = vadd.f32 %v3055_v8, %v2839_v11  ;;  %v10299_v8 = vld [vmem:[%s12594_s1 + $0x178] sm:$0xff]   ;;  %v4893_v11 = vcombine.low %v10473_v58, %v10474_v62 }
 0x210   : > { %v10476_v2 = vld.sshfl [vmem:[%s10782_s11 + $0x134] sm:$0xf pattern:$0x76325410] }
 0x211   : > { %v8610_v21 = vpack.c.bf16 %v3073_v15, %v3073_v15  ;;  %v3093_v22 = vshrl.u32 %v8609_v16, 16  ;;  %v3064_v23 = vcombine.high %v3060_v17, %v3060_v17  ;;  %8015 = vst [vmem:[%s11676_s20 + $0x18] sm:$0xf] %v3060_v17  ;;  %9629 = vmatpush3.bf16.msra.mxu0 %v10283_v54  ;;  %9649 = vmatpush3.bf16.msra.mxu1 %v10284_v12  ;;  %v3074_v25 = vmax.f32 %v3060_v17, 0.0  ;;  %v10300_v9 = vld [vmem:[%s12594_s1 + $0x1b8] sm:$0xff]  }
 0x212   : > { %9630 = vmatprep.subr.bf16.mxu0 %v10618_v0  ;;  %9650 = vmatprep.subr.bf16.mxu1 %v10618_v0  ;;  %v3096_v29 = vshll.u32 %v8609_v16, 16  ;;  %v12108_v10 = vld.sshfl [vmem:[%s10782_s11 + $0xf0] sm:$0x13 pattern:$0x76325410]  ;;  %v5027_v54 = vcombine.low %v10475_v63, %v10476_v2  ;;  %v10306_v63 = vld [vmem:[%s12594_s1 + $0x1a0] sm:$0xff]  }
 0x213   : > { %v3095_v28 = vrot.slane %v3093_v22, 7  ;;  %v3100_v30 = vshrl.u32 %v8610_v21, 16  ;;  %8016 = vst [vmem:[%s11676_s20 + $0x1c] sm:$0xf] %v3064_v23  ;;  %v3075_v33 = vmax.f32 %v3064_v23, 0.0  ;;  %v8611_v37 = vpack.c.bf16 %v3074_v25, %v3074_v25 }
 0x214   : > { %v3103_v61 = vshll.u32 %v8610_v21, 16  ;;  %v8394_v12 = vld.sshfl [vmem:[%s10782_s11 + $0xf4] sm:$0x13 pattern:$0x76325410]  ;;  %v5161_v15 = vshrl.u32 %v12108_v10, 16 }
 0x215   : > { %v3098_v38 = vor.u32 %v3096_v29, %v3095_v28  ;;  %v3102_v41 = vrot.slane %v3100_v30, 7  ;;  %v8612_v42 = vpack.c.bf16 %v3075_v33, %v3075_v33  ;;  %9631 = vmatpush3.bf16.msra.mxu0 %v10285_v51  ;;  %9651 = vmatpush3.bf16.msra.mxu1 %v10286_v24  ;;  %v3107_v46 = vshrl.u32 %v8611_v37, 16  ;;  %v8395_v13 = vld.sshfl [vmem:[%s10782_s11 + $0xf8] sm:$0x13 pattern:$0x76325410] }
 0x216   : > { %9632 = vmatprep.subr.bf16.mxu0 %v10618_v0  ;;  %9652 = vmatprep.subr.bf16.mxu1 %v10618_v0  ;;  %v3110_v50 = vshll.u32 %v8611_v37, 16  ;;  %v12115_v14 = vld.sshfl [vmem:[%s10782_s11 + $0xfc] sm:$0x13 pattern:$0x76325410]  ;;  %v5164_v18 = vshll.u32 %v12108_v10, 16  ;;  %v5135_v33 = vcombine.high %v12108_v10, %v12108_v10 }
 0x217   : > { %v3105_v47 = vor.u32 %v3103_v61, %v3102_v41  ;;  %v3128_v49 = vsel %vm12053_vm12, %v3098_v38, %v3127_v36  ;;  %v3114_v31 = vshrl.u32 %v8612_v42, 16  ;;  %v3109_v59 = vrot.slane %v3107_v46, 7  ;;  %v12122_v22 = vld [vmem:[%s12595_s2] ss:$0 sm:$0xff]  ;;  %v10301_v51 = vld [vmem:[%s12594_s1 + $0x170] sm:$0xff]  }
 0x218   : > { %3129 = vst [vmem:[#allocation2 + $0x28] sm:$0x7] %v3128_v49  ;;  %v3117_v60 = vshll.u32 %v8612_v42, 16  ;;  %v5175_v39 = vshrl.u32 %v8394_v12, 16  ;;  %v5178_v20 = vshll.u32 %v8394_v12, 16  ;;  %v5189_v21 = vshrl.u32 %v8395_v13, 16 }
 0x219   : > { %v3131_v52 = vsel %vm12053_vm12, %v3105_v47, %v3130_v45  ;;  %v3116_v53 = vrot.slane %v3114_v31, 7  ;;  %9633 = vmatpush3.bf16.msra.mxu0 %v10287_v43  ;;  %9653 = vmatpush3.bf16.msra.mxu1 %v10288_v44  ;;  %v3112_v56 = vor.u32 %v3110_v50, %v3109_v59  ;;  %v10302_v24 = vld [vmem:[%s12594_s1 + $0x1b0] sm:$0xff]   ;;  %v5192_v25 = vshll.u32 %v8395_v13, 16  ;;  %v10303_v31 = vld [vmem:[%s12594_s1 + $0x168] sm:$0xff]  }
 0x21a   : > { %3132 = vst [vmem:[#allocation2 + $0x2c] sm:$0x7] %v3131_v52  ;;  %9634 = vmatprep.subr.bf16.mxu0 %v10618_v0  ;;  %9654 = vmatprep.subr.bf16.mxu1 %v10618_v0  ;;  %v5203_v26 = vshrl.u32 %v12115_v14, 16  ;;  %v5206_v28 = vshll.u32 %v12115_v14, 16  ;;  %v5143_v36 = vcombine.high %v8394_v12, %v8394_v12  ;;  %v5151_v38 = vcombine.high %v8395_v13, %v8395_v13  ;;  %v10304_v59 = vld [vmem:[%s12594_s1 + $0x1a8] sm:$0xff]   ;;  %v10307_v13 = vld [vmem:[%s12594_s1 + $0x158] sm:$0xff]  }
 0x21b   : > { %v3119_v57 = vor.u32 %v3117_v60, %v3116_v53  ;;  %v3134_v5 = vsel %vm12053_vm12, %v3112_v56, %v3133_v55  ;;  %v5159_v41 = vcombine.high %v12115_v14, %v12115_v14  ;;  %v5163_v61 = vrot.slane %v5161_v15, 6  ;;  %v10308_v14 = vld [vmem:[%s12594_s1 + $0x198] sm:$0xff]  }
 0x21c   : > { %3135 = vst [vmem:[#allocation2 + $0x30] sm:$0x7] %v3134_v5  ;;  %v5166_v44 = vrot.slane %v5164_v18, 7  ;;  %v5177_v45 = vrot.slane %v5175_v39, 6  ;;  %v5180_v46 = vrot.slane %v5178_v20, 7  ;;  %v5191_v47 = vrot.slane %v5189_v21, 6 }
 0x21d   : > { %v3137_v3 = vsel %vm12053_vm12, %v3119_v57, %v3136_v32  ;;  %9635 = vmatpush3.bf16.msra.mxu0 %v10289_v40  ;;  %9655 = vmatpush3.bf16.msra.mxu1 %v10290_v4  ;;  %v5194_v50 = vrot.slane %v5192_v25, 7  ;;  %v5205_v52 = vrot.slane %v5203_v26, 6  ;;  %v5208_v53 = vrot.slane %v5206_v28, 7  ;;  %v295_v40 = vld [vmem:[#allocation2 + $0x14] sm:$0x7]  ;;  %v10305_v32 = vld [vmem:[%s12594_s1 + $0x160] sm:$0xff]  }
 0x21e   : > { %3138 = vst [vmem:[#allocation2 + $0x34] sm:$0x7] %v3137_v3  ;;  %9636 = vmatprep.subr.bf16.mxu0 %v10618_v0  ;;  %9656 = vmatprep.subr.bf16.mxu1 %v10618_v0  ;;  %v296_v56 = vsel %vm10733_vm3, 0, %v295_v40  ;;  %v5167_v57 = vor.u32 %v5166_v44, %v5163_v61  ;;  %v5170_v58 = vshll.u32 %v5135_v33, 16  ;;  %v5184_v5 = vshll.u32 %v5143_v36, 16  ;;  %v10309_v20 = vld [vmem:[%s12594_s1 + $0x150] sm:$0xff]  }
 0x21f   : > { %v5198_v62 = vshll.u32 %v5151_v38, 16  ;;  %297 = vst [vmem:[#allocation2 + $0x14] sm:$0x7] %v296_v56  ;;  %v5181_v2 = vor.u32 %v5180_v46, %v5177_v45  ;;  %v5195_v3 = vor.u32 %v5194_v50, %v5191_v47  ;;  %v10310_v21 = vld [vmem:[%s12594_s1 + $0x190] sm:$0xff]   ;;  %v10312_v33 = vld [vmem:[%s12594_s1 + $0x188] sm:$0xff]   ;;  %v10314_v61 = vld [vmem:[%s12594_s1 + $0x180] sm:$0xff]  }
 0x220   : > { %v5168_v10 = vrot.slane %v5167_v57, 2  ;;  %v10477_v28 = vld.sshfl [vmem:[%s10782_s11 + $0x2c] sm:$0xf pattern:$0x76325410]  ;;  %v10317_v46 = vld [vmem:[%s12594_s1 + $0x1f8] sm:$0xff]  }
 0x221   : > { %9637 = vmatpush3.bf16.msra.mxu0 %v10291_v35  ;;  %9657 = vmatpush3.bf16.msra.mxu1 %v10292_v19  ;;  %v5209_v35 = vor.u32 %v5208_v53, %v5205_v52  ;;  %v5212_v19 = vshll.u32 %v5159_v41, 16  ;;  %v5200_v12 = vrot.slane %v5198_v62, 7  ;;  %v5182_v15 = vrot.slane %v5181_v2, 2  ;;  %v10313_v41 = vld [vmem:[%s12594_s1 + $0x140] sm:$0xff]   ;;  %v10318_v47 = vld [vmem:[%s12594_s1 + $0x238] sm:$0xff]   ;;  %v10320_v57 = vld [vmem:[%s12594_s1 + $0x230] sm:$0xff]  }
 0x222   : > { %9638 = vmatprep.subr.bf16.mxu0 %v10618_v0  ;;  %9658 = vmatprep.subr.bf16.mxu1 %v10618_v0  ;;  %v8482_v45 = vld.sshfl [vmem:[%s10782_s11 + $0x8] sm:$0x13 pattern:$0x76325410] }
 0x223   : > { %v5214_v18 = vrot.slane %v5212_v19, 7 }
 0x225   : > { %9639 = vmatpush3.bf16.msra.mxu0 %v10293_v6  ;;  %9659 = vmatpush3.bf16.msra.mxu1 %v10294_v7  ;;  %v304_v6 = vld [vmem:[#allocation2 + $0x20] sm:$0x7]  ;;  %v307_v7 = vld [vmem:[#allocation2 + $0x24] sm:$0x7] }
 0x226   : > { %9664 = vmatprep.subr.bf16.mxu0 %v10618_v0  ;;  %9684 = vmatprep.subr.bf16.mxu1 %v10618_v0 }
 0x228   : > { %v3263_v16 = vpop.f32.mrf.mxu0  ;;  %v3396_v17 = vpop.f32.mrf.mxu1  ;;  %9641 = vmatmul.mubr.bf16.vlgmr.msra.gmra.mxu0 %v4893_v11  ;;  %9661 = vmatmul.mubr.bf16.vlgmr.msra.gmra.mxu1 %v5027_v54  ;;  %v5172_v11 = vrot.slane %v5170_v58, 7  ;;  %v5186_v54 = vrot.slane %v5184_v5, 7 }
 0x229   : > { %v3270_v23 = vadd.f32 %v12122_v22, %v3263_v16  ;;  %9665 = vmatpush3.bf16.msra.mxu0 %v10299_v8  ;;  %9685 = vmatpush3.bf16.msra.mxu1 %v10300_v9  ;;  %v305_v8 = vsel %vm10733_vm3, 0, %v304_v6  ;;  %v308_v9 = vsel %vm10733_vm3, 0, %v307_v7  ;;  %v5196_v16 = vrot.slane %v5195_v3, 2 }
 0x22a   : > { %v9402_v29 = vpop.f32.mrf.mxu0  ;;  %v9422_v30 = vpop.f32.mrf.mxu1  ;;  %9666 = vmatprep.subr.bf16.mxu0 %v10618_v0  ;;  %9686 = vmatprep.subr.bf16.mxu1 %v10618_v0  ;;  %306 = vst [vmem:[#allocation2 + $0x20] sm:$0x7] %v305_v8  ;;  %309 = vst [vmem:[#allocation2 + $0x24] sm:$0x7] %v308_v9  ;;  %v5173_v39 = vsel %vm11152_vm10, %v5168_v10, %v5172_v11  ;;  %v5631_v3 = vcombine.high %v8482_v45, %v8482_v45 }
 0x22b   : > { %v12137_v37 = vadd.f32 %v3396_v17, %v3270_v23  ;;  %9680 = vmatprep.mubr.msk.bf16.mxu0 %vm10619_vm0, %v10618_v0  ;;  %9700 = vmatprep.mubr.msk.bf16.mxu1 %vm10619_vm0, %v10618_v0  ;;  %v5210_v17 = vrot.slane %v5209_v35, 2  ;;  %v5187_v23 = vsel %vm11152_vm10, %v5182_v15, %v5186_v54  ;;  %v10478_v29 = vld.sshfl [vmem:[%s10782_s11 + $0x34] sm:$0xf pattern:$0x76325410]  ;;  %v10311_v30 = vld [vmem:[%s12594_s1 + $0x148] sm:$0xff]  }
 0x22c   : > { %v3266_v42 = vpop.f32.mrf.mxu0  ;;  %v3399_v43 = vpop.f32.mrf.mxu1  ;;  %v5232_v25 = vcombine.low %v5173_v39, %v5187_v23  ;;  %v5381_v44 = vcombine.low %v10477_v28, %v10478_v29  ;;  %v10322_v15 = vld [vmem:[%s12594_s1 + $0x228] sm:$0xff]  }
 0x22d   : > { %v3271_v49 = vadd.f32 %v12122_v22, %v3266_v42  ;;  %9667 = vmatpush3.bf16.msra.mxu0 %v10301_v51  ;;  %9687 = vmatpush3.bf16.msra.mxu1 %v10302_v24  ;;  %v5201_v51 = vsel %vm11152_vm10, %v5196_v16, %v5200_v12  ;;  %v5215_v24 = vsel %vm11152_vm10, %v5210_v17, %v5214_v18  ;;  %v8481_v42 = vld.sshfl [vmem:[%s10782_s11 + $0x4] sm:$0x13 pattern:$0x76325410] }
 0x22e   : > { %v9403_v60 = vpop.f32.mrf.mxu0  ;;  %v9423_v55 = vpop.f32.mrf.mxu1  ;;  %9668 = vmatprep.subr.bf16.mxu0 %v10618_v0  ;;  %9688 = vmatprep.subr.bf16.mxu1 %v10618_v0  ;;  %v5233_v26 = vcombine.low %v5201_v51, %v5215_v24  ;;  %v5240_v36 = vrot.slane %v5232_v25, %v10800_v27  ;;  %v5652_v53 = vshll.u32 %v8481_v42, 16  ;;  %v5672_v51 = vshll.u32 %v5631_v3, 16  ;;  %v10323_v25 = vld [vmem:[%s12594_s1 + $0x1e0] sm:$0xff]   ;;  %v10335_v3 = vld [vmem:[#allocation3 + $0x78] sm:$0xff]  }
 0x22f   : > { %v12154_v4 = vadd.f32 %v3399_v43, %v3271_v49  ;;  %v8483_v49 = vld.sshfl [vmem:[%s10782_s11 + $0xc] sm:$0x13 pattern:$0x76325410]  ;;  %v5663_v60 = vshrl.u32 %v8482_v45, 16  ;;  %v5666_v55 = vshll.u32 %v8482_v45, 16 }
 0x230   : > { %v5247_v38 = vrot.slane %v5233_v26, %v10800_v27  ;;  %v5677_v40 = vshrl.u32 %v8483_v49, 16  ;;  %v5680_v58 = vshll.u32 %v8483_v49, 16  ;;  %v5639_v19 = vcombine.high %v8483_v49, %v8483_v49  ;;  %v10324_v26 = vld [vmem:[%s12594_s1 + $0x220] sm:$0xff]  }
 0x231   : > { %9669 = vmatpush3.bf16.msra.mxu0 %v10303_v31  ;;  %9689 = vmatpush3.bf16.msra.mxu1 %v10304_v59  ;;  %v8484_v31 = vld.sshfl [vmem:[%s10782_s11 + $0x10] sm:$0x13 pattern:$0x76325410]  ;;  %v5649_v59 = vshrl.u32 %v8481_v42, 16  ;;  %v5654_v10 = vrot.slane %v5652_v53, 7 }
 0x232   : > { %9670 = vmatprep.subr.bf16.mxu0 %v10618_v0  ;;  %9690 = vmatprep.subr.bf16.mxu1 %v10618_v0  ;;  %v5248_v43 = vcombine.low %v5240_v36, %v5247_v38  ;;  %v5691_v5 = vshrl.u32 %v8484_v31, 16  ;;  %v5694_v62 = vshll.u32 %v8484_v31, 16  ;;  %v5647_v6 = vcombine.high %v8484_v31, %v8484_v31  ;;  %v10327_v31 = vld [vmem:[%s12594_s1 + $0x1d0] sm:$0xff]  }
 0x233   : > { %v5651_v7 = vrot.slane %v5649_v59, 6  ;;  %v5665_v11 = vrot.slane %v5663_v60, 6  ;;  %v5668_v54 = vrot.slane %v5666_v55, 7  ;;  %v5679_v12 = vrot.slane %v5677_v40, 6  ;;  %v10328_v59 = vld [vmem:[%s12594_s1 + $0x210] sm:$0xff]  }
 0x234   : > { %v5682_v16 = vrot.slane %v5680_v58, 7  ;;  %v5693_v17 = vrot.slane %v5691_v5, 6  ;;  %v5696_v18 = vrot.slane %v5694_v62, 7  ;;  %v5686_v24 = vshll.u32 %v5639_v19, 16  ;;  %v10331_v62 = vld [vmem:[%s12594_s1 + $0x1c0] sm:$0xff]  }
 0x235   : > { %9671 = vmatpush3.bf16.msra.mxu0 %v10305_v32  ;;  %9691 = vmatpush3.bf16.msra.mxu1 %v10306_v63  ;;  %v10319_v32 = vld [vmem:[%s12594_s1 + $0x1f0] sm:$0xff]   ;;  %v5669_v28 = vor.u32 %v5668_v54, %v5665_v11  ;;  %v10479_v60 = vld.sshfl [vmem:[%s10782_s11 + $0x40] sm:$0xf pattern:$0x76325410]  ;;  %v10337_v54 = vld [vmem:[#allocation3 + $0x68] sm:$0xff]  }
 0x236   : > { %9672 = vmatprep.subr.bf16.mxu0 %v10618_v0  ;;  %9692 = vmatprep.subr.bf16.mxu1 %v10618_v0  ;;  %v5683_v29 = vor.u32 %v5682_v16, %v5679_v12  ;;  %v10480_v55 = vld.sshfl [vmem:[%s10782_s11 + $0x48] sm:$0xf pattern:$0x76325410]  ;;  %v10340_v16 = vld [vmem:[#allocation3 + $0x50] sm:$0xff]  }
 0x238   : > { %v5684_v45 = vrot.slane %v5683_v29, 2 }
 0x239   : > { %9673 = vmatpush3.bf16.msra.mxu0 %v10307_v13  ;;  %9693 = vmatpush3.bf16.msra.mxu1 %v10308_v14  ;;  %v10321_v14 = vld [vmem:[%s12594_s1 + $0x1e8] sm:$0xff]  }
 0x23a   : > { %9674 = vmatprep.subr.bf16.mxu0 %v10618_v0  ;;  %9694 = vmatprep.subr.bf16.mxu1 %v10618_v0 }
 0x23d   : > { %9675 = vmatpush3.bf16.msra.mxu0 %v10309_v20  ;;  %9695 = vmatpush3.bf16.msra.mxu1 %v10310_v21  ;;  %v5655_v21 = vor.u32 %v5654_v10, %v5651_v7  ;;  %v10336_v7 = vld [vmem:[#allocation3 + $0x70] sm:$0xff]  }
 0x23e   : > { %9676 = vmatprep.subr.bf16.mxu0 %v10618_v0  ;;  %9696 = vmatprep.subr.bf16.mxu1 %v10618_v0 }
 0x23f   : > { %v5656_v36 = vrot.slane %v5655_v21, 2 }
 0x241   : > { %9677 = vmatpush3.bf16.msra.mxu0 %v10311_v30  ;;  %9697 = vmatpush3.bf16.msra.mxu1 %v10312_v33  ;;  %v5697_v30 = vor.u32 %v5696_v18, %v5693_v17  ;;  %v5700_v33 = vshll.u32 %v5647_v6, 16  ;;  %v10341_v17 = vld [vmem:[#allocation3 + $0x48] sm:$0xff]   ;;  %v10342_v18 = vld [vmem:[#allocation3 + $0x40] sm:$0xff]  }
 0x242   : > { %9678 = vmatprep.subr.bf16.mxu0 %v10618_v0  ;;  %9698 = vmatprep.subr.bf16.mxu1 %v10618_v0 }
 0x245   : > { %9679 = vmatpush3.bf16.msra.mxu0 %v10313_v41  ;;  %9699 = vmatpush3.bf16.msra.mxu1 %v10314_v61  ;;  %v5674_v41 = vrot.slane %v5672_v51, 7  ;;  %v5688_v61 = vrot.slane %v5686_v24, 7 }
 0x246   : > { %9704 = vmatprep.subr.bf16.mxu0 %v10618_v0  ;;  %9724 = vmatprep.subr.bf16.mxu1 %v10618_v0 }
 0x248   : > { %v3529_v50 = vpop.f32.mrf.mxu0  ;;  %v3663_v52 = vpop.f32.mrf.mxu1  ;;  %9681 = vmatmul.mubr.bf16.vlgmr.msra.gmra.mxu0 %v5248_v43  ;;  %9701 = vmatmul.mubr.bf16.vlgmr.msra.gmra.mxu1 %v5381_v44  ;;  %v10326_v43 = vld [vmem:[%s12594_s1 + $0x218] sm:$0xff]   ;;  %v5670_v44 = vrot.slane %v5669_v28, 2 }
 0x249   : > { %v3536_v56 = vadd.f32 %v3529_v50, %v12137_v37  ;;  %9705 = vmatpush3.bf16.msra.mxu0 %v10317_v46  ;;  %9725 = vmatpush3.bf16.msra.mxu1 %v10318_v47  ;;  %v5623_v37 = vcombine.high %v8481_v42, %v8481_v42  ;;  %v10325_v42 = vld [vmem:[%s12594_s1 + $0x1d8] sm:$0xff]   ;;  %v5698_v46 = vrot.slane %v5697_v30, 2  ;;  %v5702_v47 = vrot.slane %v5700_v33, 7 }
 0x24a   : > { %v9442_v63 = vpop.f32.mrf.mxu0  ;;  %v9462_v2 = vpop.f32.mrf.mxu1  ;;  %9706 = vmatprep.subr.bf16.mxu0 %v10618_v0  ;;  %9726 = vmatprep.subr.bf16.mxu1 %v10618_v0  ;;  %v5675_v50 = vsel %vm11152_vm10, %v5670_v44, %v5674_v41  ;;  %v283_v44 = vld [vmem:[#allocation2 + $0x4] sm:$0x7] }
 0x24b   : > { %v12235_v35 = vadd.f32 %v3663_v52, %v3536_v56  ;;  %9720 = vmatprep.mubr.msk.bf16.mxu0 %vm10619_vm0, %v10618_v0  ;;  %9740 = vmatprep.mubr.msk.bf16.mxu1 %vm10619_vm0, %v10618_v0  ;;  %v5658_v23 = vshll.u32 %v5623_v37, 16  ;;  %v5689_v52 = vsel %vm11152_vm10, %v5684_v45, %v5688_v61  ;;  %v5703_v53 = vsel %vm11152_vm10, %v5698_v46, %v5702_v47  ;;  %v10332_v63 = vld [vmem:[%s12594_s1 + $0x200] sm:$0xff]   ;;  %v286_v45 = vld [vmem:[#allocation2 + $0x8] sm:$0x7] }
 0x24c   : > { %v3532_v8 = vpop.f32.mrf.mxu0  ;;  %v3666_v9 = vpop.f32.mrf.mxu1  ;;  %v5721_v56 = vcombine.low %v5689_v52, %v5703_v53  ;;  %v5515_v2 = vcombine.low %v10479_v60, %v10480_v55  ;;  %v10373_v53 = vld [vmem:[#allocation3 + $0x38] sm:$0xff]  }
 0x24d   : > { %v3537_v13 = vadd.f32 %v3532_v8, %v12154_v4  ;;  %9707 = vmatpush3.bf16.msra.mxu0 %v10319_v32  ;;  %9727 = vmatpush3.bf16.msra.mxu1 %v10320_v57  ;;  %v5660_v38 = vrot.slane %v5658_v23, 7  ;;  %v10329_v32 = vld [vmem:[%s12594_s1 + $0x1c8] sm:$0xff]  }
 0x24e   : > { %v9443_v39 = vpop.f32.mrf.mxu0  ;;  %v9463_v20 = vpop.f32.mrf.mxu1  ;;  %9708 = vmatprep.subr.bf16.mxu0 %v10618_v0  ;;  %9728 = vmatprep.subr.bf16.mxu1 %v10618_v0  ;;  %v10330_v57 = vld [vmem:[%s12594_s1 + $0x208] sm:$0xff]   ;;  %v5735_v5 = vrot.slane %v5721_v56, %v10800_v27 }
 0x24f   : > { %v12250_v4 = vadd.f32 %v3666_v9, %v3537_v13  ;;  %v5661_v49 = vsel %vm11152_vm10, %v5656_v36, %v5660_v38 }
 0x250   : > { %v5720_v40 = vcombine.low %v5661_v49, %v5675_v50 }
 0x251   : > { %9709 = vmatpush3.bf16.msra.mxu0 %v10321_v14  ;;  %9729 = vmatpush3.bf16.msra.mxu1 %v10322_v15  ;;  %v10338_v14 = vld [vmem:[#allocation3 + $0x60] sm:$0xff]   ;;  %v10339_v15 = vld [vmem:[#allocation3 + $0x58] sm:$0xff]  }
 0x252   : > { %9710 = vmatprep.subr.bf16.mxu0 %v10618_v0  ;;  %9730 = vmatprep.subr.bf16.mxu1 %v10618_v0  ;;  %v5728_v58 = vrot.slane %v5720_v40, %v10800_v27 }
 0x254   : > { %v5736_v37 = vcombine.low %v5728_v58, %v5735_v5 }
 0x255   : > { %9711 = vmatpush3.bf16.msra.mxu0 %v10323_v25  ;;  %9731 = vmatpush3.bf16.msra.mxu1 %v10324_v26 }
 0x256   : > { %9712 = vmatprep.subr.bf16.mxu0 %v10618_v0  ;;  %9732 = vmatprep.subr.bf16.mxu1 %v10618_v0 }
 0x259   : > { %9713 = vmatpush3.bf16.msra.mxu0 %v10325_v42  ;;  %9733 = vmatpush3.bf16.msra.mxu1 %v10326_v43 }
 0x25a   : > { %9714 = vmatprep.subr.bf16.mxu0 %v10618_v0  ;;  %9734 = vmatprep.subr.bf16.mxu1 %v10618_v0 }
 0x25d   : > { %9715 = vmatpush3.bf16.msra.mxu0 %v10327_v31  ;;  %9735 = vmatpush3.bf16.msra.mxu1 %v10328_v59 }
 0x25e   : > { %9716 = vmatprep.subr.bf16.mxu0 %v10618_v0  ;;  %9736 = vmatprep.subr.bf16.mxu1 %v10618_v0 }
 0x261   : > { %9717 = vmatpush3.bf16.msra.mxu0 %v10329_v32  ;;  %9737 = vmatpush3.bf16.msra.mxu1 %v10330_v57 }
 0x262   : > { %9718 = vmatprep.subr.bf16.mxu0 %v10618_v0  ;;  %9738 = vmatprep.subr.bf16.mxu1 %v10618_v0 }
 0x265   : > { %9719 = vmatpush3.bf16.msra.mxu0 %v10331_v62  ;;  %9739 = vmatpush3.bf16.msra.mxu1 %v10332_v63  ;;  %v10374_v62 = vld [vmem:[#allocation3 + $0x30] sm:$0xff]  }
 0x266   : > { %9764 = vmatprep.subr.bf16.mxu1 %v10618_v0  ;;  %9744 = vmatprep.subr.bf16.mxu0 %v10618_v0 }
 0x268   : > { %v3797_v19 = vpop.f32.mrf.mxu0  ;;  %v3931_v6 = vpop.f32.mrf.mxu1  ;;  %9721 = vmatmul.mubr.bf16.vlgmr.msra.gmra.mxu0 %v5515_v2  ;;  %9741 = vmatmul.mubr.bf16.vlgmr.msra.gmra.mxu1 %v5736_v37 }
 0x269   : > { %9765 = vmatpush3.bf16.msra.mxu1 %v10335_v3  ;;  %9780 = vmatprep.mubr.msk.bf16.mxu1 %vm10619_vm0, %v10618_v0  ;;  %v3804_v28 = vadd.f32 %v3797_v19, %v12235_v35  ;;  %v284_v35 = vsel %vm10733_vm3, 0, %v283_v44  ;;  %v10375_v3 = vld [vmem:[#allocation3 + $0x28] sm:$0xff]   ;;  %v289_v19 = vld [vmem:[#allocation2 + $0xc] sm:$0x7] }
 0x26a   : > { %v9482_v8 = vpop.f32.mrf.mxu0  ;;  %v9502_v9 = vpop.f32.mrf.mxu1  ;;  %9766 = vmatprep.subr.bf16.mxu1 %v10618_v0  ;;  %9760 = vmatprep.mubr.msk.bf16.mxu0 %vm10619_vm0, %v10618_v0  ;;  %285 = vst [vmem:[#allocation2 + $0x4] sm:$0x7] %v284_v35  ;;  %v10483_v44 = vld.sshfl [vmem:[#allocation2 + $0x30] sm:$0xf pattern:$0x76325410] }
 0x26b   : > { %v3938_v29 = vadd.f32 %v3931_v6, %v3804_v28  ;;  %9745 = vmatpush3.bf16.msra.mxu0 %v10373_v53  ;;  %v292_v8 = vld [vmem:[#allocation2 + $0x10] sm:$0x7] }
 0x26c   : > { %v3800_v10 = vpop.f32.mrf.mxu0  ;;  %v3934_v11 = vpop.f32.mrf.mxu1  ;;  %9746 = vmatprep.subr.bf16.mxu0 %v10618_v0  ;;  %v10376_v9 = vld [vmem:[#allocation3 + $0x20] sm:$0xff]  }
 0x26d   : > { %9767 = vmatpush3.bf16.msra.mxu1 %v10336_v7  ;;  %v3805_v30 = vadd.f32 %v3800_v10, %v12250_v4  ;;  %v287_v4 = vsel %vm10733_vm3, 0, %v286_v45  ;;  %v290_v7 = vsel %vm10733_vm3, 0, %v289_v19  ;;  %v10484_v45 = vld.sshfl [vmem:[#allocation2 + $0x28] sm:$0xf pattern:$0x76325410] }
 0x26e   : > { %v9483_v12 = vpop.f32.mrf.mxu0  ;;  %v9503_v13 = vpop.f32.mrf.mxu1  ;;  %9768 = vmatprep.subr.bf16.mxu1 %v10618_v0  ;;  %288 = vst [vmem:[#allocation2 + $0x8] sm:$0x7] %v287_v4  ;;  %291 = vst [vmem:[#allocation2 + $0xc] sm:$0x7] %v290_v7  ;;  %v6436_v35 = vcombine.low %v10484_v45, %v10483_v44  ;;  %v10361_v44 = vld [vmem:[#allocation3 + $0x148] sm:$0xff]  }
 0x26f   : > { %v3939_v36 = vadd.f32 %v3934_v11, %v3805_v30  ;;  %9747 = vmatpush3.bf16.msra.mxu0 %v10374_v62  ;;  %v293_v11 = vsel %vm10733_vm3, 0, %v292_v8  ;;  %v10377_v12 = vld [vmem:[#allocation3 + $0x18] sm:$0xff]   ;;  %v8564_v4 = vld.sshfl [vmem:[#allocation2 + $0x34] sm:$0x13 pattern:$0x76325410] }
 0x270   : > { %9748 = vmatprep.subr.bf16.mxu0 %v10618_v0  ;;  %294 = vst [vmem:[#allocation2 + $0x10] sm:$0x7] %v293_v11  ;;  %v6749_v53 = vshll.u32 %v8564_v4, 16  ;;  %v6702_v19 = vcombine.high %v8564_v4, %v8564_v4 }
 0x271   : > { %9769 = vmatpush3.bf16.msra.mxu1 %v10337_v54  ;;  %v280_v54 = vld [vmem:[#allocation2] sm:$0x7] }
 0x272   : > { %9770 = vmatprep.subr.bf16.mxu1 %v10618_v0  ;;  %v281_v13 = vsel %vm10733_vm3, 0, %v280_v54  ;;  %v6751_v62 = vrot.slane %v6749_v53, 7 }
 0x273   : > { %9749 = vmatpush3.bf16.msra.mxu0 %v10375_v3  ;;  %282 = vst [vmem:[#allocation2] sm:$0x7] %v281_v13  ;;  %v10358_v3 = vld [vmem:[#allocation3 + $0x160] sm:$0xff]  }
 0x274   : > { %9750 = vmatprep.subr.bf16.mxu0 %v10618_v0 }
 0x275   : > { %9771 = vmatpush3.bf16.msra.mxu1 %v10338_v14  ;;  %v10345_v14 = vld [vmem:[#allocation3 + $0xf8] sm:$0xff]  }
 0x276   : > { %9772 = vmatprep.subr.bf16.mxu1 %v10618_v0 }
 0x277   : > { %9751 = vmatpush3.bf16.msra.mxu0 %v10376_v9 }
 0x278   : > { %9752 = vmatprep.subr.bf16.mxu0 %v10618_v0 }
 0x279   : > { %9773 = vmatpush3.bf16.msra.mxu1 %v10339_v15 }
 0x27a   : > { %9774 = vmatprep.subr.bf16.mxu1 %v10618_v0 }
 0x27b   : > { %9753 = vmatpush3.bf16.msra.mxu0 %v10377_v12 }
 0x27c   : > { %9754 = vmatprep.subr.bf16.mxu0 %v10618_v0 }
 0x27d   : > { %9775 = vmatpush3.bf16.msra.mxu1 %v10340_v16  ;;  %v10378_v16 = vld [vmem:[#allocation3 + $0x10] sm:$0xff]  }
 0x27e   : > { %9776 = vmatprep.subr.bf16.mxu1 %v10618_v0 }
 0x27f   : > { %9755 = vmatpush3.bf16.msra.mxu0 %v10378_v16 }
 0x280   : > { %9756 = vmatprep.subr.bf16.mxu0 %v10618_v0 }
 0x281   : > { %9777 = vmatpush3.bf16.msra.mxu1 %v10341_v17  ;;  %v10346_v17 = vld [vmem:[#allocation3 + $0xf0] sm:$0xff]  }
 0x282   : > { %9778 = vmatprep.subr.bf16.mxu1 %v10618_v0 }
 0x285   : > { %9779 = vmatpush3.bf16.msra.mxu1 %v10342_v18  ;;  %v10379_v18 = vld [vmem:[#allocation3 + $0x8] sm:$0xff]  }
 0x286   : > { %9804 = vmatprep.subr.bf16.mxu1 %v10618_v0  ;;  %9757 = vmatpush3.bf16.msra.mxu0 %v10379_v18 }
 0x287   : > { %9758 = vmatprep.subr.bf16.mxu0 %v10618_v0 }
 0x288   : > { %v4065_v39 = vpop.f32.mrf.mxu0  ;;  %v4199_v20 = vpop.f32.mrf.mxu1 }
 0x289   : > { %v4072_v33 = vadd.f32 %v4065_v39, %v3938_v29 }
 0x28a   : > { %v9522_v21 = vpop.f32.mrf.mxu0  ;;  %v9542_v23 = vpop.f32.mrf.mxu1 }
 0x28b   : > { %v4206_v38 = vadd.f32 %v4199_v20, %v4072_v33  ;;  %v10380_v20 = vld [vmem:[#allocation3] sm:$0xff]  }
 0x28c   : > { %v4068_v51 = vpop.f32.mrf.mxu0  ;;  %v4202_v24 = vpop.f32.mrf.mxu1  ;;  %9759 = vmatpush3.bf16.msra.mxu0 %v10380_v20  ;;  %v6755_v20 = vshll.u32 %v6702_v19, 16 }
 0x28d   : > { %v4073_v41 = vadd.f32 %v4068_v51, %v3939_v36  ;;  %9784 = vmatprep.subr.bf16.mxu0 %v10618_v0 }
 0x28e   : > { %v9523_v25 = vpop.f32.mrf.mxu0  ;;  %v9543_v26 = vpop.f32.mrf.mxu1 }
 0x28f   : > { %v4207_v49 = vadd.f32 %v4202_v24, %v4073_v41  ;;  %v10348_v24 = vld [vmem:[#allocation3 + $0xe0] sm:$0xff]  }
 0x2a8   : > { %v4333_v61 = vpop.f32.mrf.mxu0  ;;  %v12320_v42 = vpop.f32.mrf.mxu1 }
 0x2a9   : > { %v4340_v43 = vadd.f32 %v4333_v61, %v4206_v38  ;;  %v4497_v39 = vadd.f32 %v12122_v22, %v12320_v42  ;;  %v10349_v38 = vld [vmem:[#allocation3 + $0xd8] sm:$0xff]  }
 0x2aa   : > { %v9562_v46 = vpop.f32.mrf.mxu0  ;;  %v9582_v47 = vpop.f32.mrf.mxu1 }
 0x2ab   : > { %v4344_v31 = vcombine.high %v4340_v43, %v4340_v43  ;;  %8257 = vst [vmem:[%s11676_s20 + $0x20] sm:$0xf] %v4340_v43  ;;  %v4353_v59 = vmax.f32 %v4340_v43, 0.0  ;;  %v10350_v43 = vld [vmem:[#allocation3 + $0xd0] sm:$0xff]   ;;  %v10352_v46 = vld [vmem:[#allocation3 + $0xc0] sm:$0xff]   ;;  %v10355_v47 = vld [vmem:[#allocation3 + $0x178] sm:$0xff]  }
 0x2ac   : > { %v4336_v50 = vpop.f32.mrf.mxu0  ;;  %v12327_v52 = vpop.f32.mrf.mxu1 }
 0x2ad   : > { %8258 = vst [vmem:[%s11676_s20 + $0x24] sm:$0xf] %v4344_v31  ;;  %v4354_v60 = vmax.f32 %v4344_v31, 0.0  ;;  %v4357_v55 = vpack.c.bf16 %v4353_v59, %v4353_v59  ;;  %v4341_v40 = vadd.f32 %v4336_v50, %v4207_v49  ;;  %v4498_v28 = vadd.f32 %v12122_v22, %v12327_v52  ;;  %v10351_v22 = vld [vmem:[#allocation3 + $0xc8] sm:$0xff]   ;;  %v10356_v49 = vld [vmem:[#allocation3 + $0x170] sm:$0xff]  }
 0x2ae   : > { %v9563_v56 = vpop.f32.mrf.mxu0  ;;  %v9583_v32 = vpop.f32.mrf.mxu1  ;;  %v8562_v31 = vld.sshfl [vmem:[#allocation2 + $0x2c] sm:$0x13 pattern:$0x76325410]  ;;  %v6746_v52 = vshrl.u32 %v8564_v4, 16 }
 0x2af   : > { %v4358_v57 = vpack.c.bf16 %v4354_v60, %v4354_v60  ;;  %4362 = vst [vmem:[#allocation2 + $0x18] sm:$0x3] %v4357_v55  ;;  %v4345_v58 = vcombine.high %v4341_v40, %v4341_v40  ;;  %8259 = vst [vmem:[%s11676_s20 + $0x28] sm:$0xf] %v4341_v40  ;;  %v4355_v5 = vmax.f32 %v4341_v40, 0.0  ;;  %v6718_v60 = vshrl.u32 %v8562_v31, 16 }
 0x2b0   : > { %v8563_v59 = vld.sshfl [vmem:[#allocation2 + $0x30] sm:$0x13 pattern:$0x76325410]  ;;  %v10357_v55 = vld [vmem:[#allocation3 + $0x168] sm:$0xff]   ;;  %v6721_v40 = vshll.u32 %v8562_v31, 16  ;;  %v6686_v54 = vcombine.high %v8562_v31, %v8562_v31 }
 0x2b1   : > { %4363 = vst [vmem:[#allocation2 + $0x1c] sm:$0x3] %v4358_v57  ;;  %8260 = vst [vmem:[%s11676_s20 + $0x2c] sm:$0xf] %v4345_v58  ;;  %v4356_v63 = vmax.f32 %v4345_v58, 0.0  ;;  %v4359_v2 = vpack.c.bf16 %v4355_v5, %v4355_v5  ;;  %v6732_v56 = vshrl.u32 %v8563_v59, 16  ;;  %v6694_v12 = vcombine.high %v8563_v59, %v8563_v59 }
 0x2b2   : > { %v8561_v50 = vld.sshfl [vmem:[#allocation2 + $0x28] sm:$0x13 pattern:$0x76325410]  ;;  %v6735_v32 = vshll.u32 %v8563_v59, 16  ;;  %v6748_v5 = vrot.slane %v6746_v52, 6 }
 0x2b3   : > { %v4360_v37 = vpack.c.bf16 %v4356_v63, %v4356_v63  ;;  %4364 = vst [vmem:[#allocation2 + $0x20] sm:$0x3] %v4359_v2  ;;  %v6704_v57 = vshrl.u32 %v8561_v50, 16  ;;  %v6707_v58 = vshll.u32 %v8561_v50, 16  ;;  %v6734_v7 = vrot.slane %v6732_v56, 6  ;;  %v10362_v31 = vld [vmem:[#allocation3 + $0x140] sm:$0xff]  }
 0x2b4   : > { %v6737_v8 = vrot.slane %v6735_v32, 7  ;;  %v6678_v18 = vcombine.high %v8561_v50, %v8561_v50  ;;  %v10363_v52 = vld [vmem:[#allocation3 + $0x1f8] sm:$0xff]   ;;  %v10366_v32 = vld [vmem:[#allocation3 + $0x1e0] sm:$0xff]  }
 0x2b5   : > { %4365 = vst [vmem:[#allocation2 + $0x24] sm:$0x3] %v4360_v37  ;;  %v6720_v37 = vrot.slane %v6718_v60, 6  ;;  %v6706_v11 = vrot.slane %v6704_v57, 6  ;;  %v6709_v13 = vrot.slane %v6707_v58, 7  ;;  %v10364_v60 = vld [vmem:[#allocation3 + $0x1f0] sm:$0xff]  }
 0x2b6   : > { %v10481_v6 = vld.sshfl [vmem:[#allocation2 + $0x14] sm:$0xf pattern:$0x76325410] }
 0x2ba   : > { %v10482_v10 = vld.sshfl [vmem:[#allocation2 + $0x1c] sm:$0xf pattern:$0x76325410] }
 0x2bb   : > { %v6080_v15 = vcombine.low %v10481_v6, %v10482_v10  ;;  %v6723_v6 = vrot.slane %v6721_v40, 7 }
 0x2bd   : > { %9781 = vmatmul.mubr.bf16.vlgmr.msra.gmra.mxu1 %v6080_v15 }
 0x2be   : > { %9805 = vmatpush3.bf16.msra.mxu1 %v10345_v14  ;;  %9820 = vmatprep.mubr.msk.bf16.mxu1 %vm10619_vm0, %v10618_v0  ;;  %v6752_v14 = vor.u32 %v6751_v62, %v6748_v5 }
 0x2bf   : > { %9806 = vmatprep.subr.bf16.mxu1 %v10618_v0 }
 0x2c2   : > { %9807 = vmatpush3.bf16.msra.mxu1 %v10346_v17  ;;  %v10359_v17 = vld [vmem:[#allocation3 + $0x158] sm:$0xff]  }
 0x2c3   : > { %9808 = vmatprep.subr.bf16.mxu1 %v10618_v0 }
 0x2c6   : > { %9809 = vmatpush3.bf16.msra.mxu1 %v10347_v1  ;;  %v6724_v1 = vor.u32 %v6723_v6, %v6720_v37  ;;  %v10367_v37 = vld [vmem:[#allocation3 + $0x1d8] sm:$0xff]   ;;  %v10368_v6 = vld [vmem:[#allocation3 + $0x1d0] sm:$0xff]  }
 0x2c7   : > { %9810 = vmatprep.subr.bf16.mxu1 %v10618_v0 }
 0x2c8   : > { %v4623_v21 = vpop.f32.mrf.mxu0  ;;  %v4844_v23 = vpop.f32.mrf.mxu1 }
 0x2c9   : > { %v4630_v51 = vadd.f32 %v4623_v21, %v4497_v39  ;;  %v6738_v39 = vor.u32 %v6737_v8, %v6734_v7  ;;  %v10369_v7 = vld [vmem:[#allocation3 + $0x1c8] sm:$0xff]   ;;  %v10485_v8 = vld.sshfl [vmem:[#allocation2 + $0x20] sm:$0xf pattern:$0x76325410] }
 0x2ca   : > { %v9602_v25 = vpop.f32.mrf.mxu0  ;;  %v9622_v26 = vpop.f32.mrf.mxu1  ;;  %9811 = vmatpush3.bf16.msra.mxu1 %v10348_v24  ;;  %v6727_v24 = vshll.u32 %v6686_v54, 16 }
 0x2cb   : > { %v12354_v29 = vadd.f32 %v4844_v23, %v4630_v51  ;;  %9812 = vmatprep.subr.bf16.mxu1 %v10618_v0  ;;  %v6710_v51 = vor.u32 %v6709_v13, %v6706_v11  ;;  %v6741_v25 = vshll.u32 %v6694_v12, 16  ;;  %v6753_v26 = vrot.slane %v6752_v14, 2 }
 0x2cc   : > { %v4626_v30 = vpop.f32.mrf.mxu0  ;;  %v4847_v33 = vpop.f32.mrf.mxu1 }
 0x2cd   : > { %v4631_v36 = vadd.f32 %v4626_v30, %v4498_v28  ;;  %v10360_v28 = vld [vmem:[#allocation3 + $0x150] sm:$0xff]   ;;  %v6713_v30 = vshll.u32 %v6678_v18, 16 }
 0x2ce   : > { %v9603_v41 = vpop.f32.mrf.mxu0  ;;  %v9623_v61 = vpop.f32.mrf.mxu1  ;;  %9813 = vmatpush3.bf16.msra.mxu1 %v10349_v38  ;;  %v6757_v38 = vrot.slane %v6755_v20, 7 }
 0x2cf   : > { %v12358_v42 = vadd.f32 %v4847_v33, %v4631_v36  ;;  %9814 = vmatprep.subr.bf16.mxu1 %v10618_v0  ;;  %v6725_v33 = vrot.slane %v6724_v1, 2  ;;  %v6739_v36 = vrot.slane %v6738_v39, 2  ;;  %v6711_v41 = vrot.slane %v6710_v51, 2 }
 0x2d0   : > { %v6729_v61 = vrot.slane %v6727_v24, 7  ;;  %v6715_v45 = vrot.slane %v6713_v30, 7 }
 0x2d2   : > { %9815 = vmatpush3.bf16.msra.mxu1 %v10350_v43  ;;  %v6743_v43 = vrot.slane %v6741_v25, 7  ;;  %v6716_v4 = vsel %vm11152_vm10, %v6711_v41, %v6715_v45 }
 0x2d3   : > { %9816 = vmatprep.subr.bf16.mxu1 %v10618_v0 }
 0x2d6   : > { %9817 = vmatpush3.bf16.msra.mxu1 %v10351_v22  ;;  %v6758_v22 = vsel %vm11152_vm10, %v6753_v26, %v6757_v38 }
 0x2d7   : > { %9818 = vmatprep.subr.bf16.mxu1 %v10618_v0 }
 0x2da   : > { %9819 = vmatpush3.bf16.msra.mxu1 %v10352_v46  ;;  %v6730_v46 = vsel %vm11152_vm10, %v6725_v33, %v6729_v61 }
 0x2db   : > { %9844 = vmatprep.subr.bf16.mxu1 %v10618_v0 }
 0x2dd   : > { %9821 = vmatmul.mubr.bf16.vlgmr.msra.gmra.mxu1 %v6436_v35 }
 0x2de   : > { %9845 = vmatpush3.bf16.msra.mxu1 %v10355_v47  ;;  %9860 = vmatprep.mubr.msk.bf16.mxu1 %vm10619_vm0, %v10618_v0  ;;  %v6744_v47 = vsel %vm11152_vm10, %v6739_v36, %v6743_v43 }
 0x2df   : > { %9846 = vmatprep.subr.bf16.mxu1 %v10618_v0  ;;  %v6777_v35 = vcombine.low %v6744_v47, %v6758_v22 }
 0x2e1   : > { %v6791_v59 = vrot.slane %v6777_v35, %v10800_v27 }
 0x2e2   : > { %9847 = vmatpush3.bf16.msra.mxu1 %v10356_v49  ;;  %v6776_v49 = vcombine.low %v6716_v4, %v6730_v46  ;;  %v5893_v46 = vld [vmem:[#allocation2 + $0x4] sm:$0x7] }
 0x2e3   : > { %9848 = vmatprep.subr.bf16.mxu1 %v10618_v0 }
 0x2e4   : > { %v6784_v50 = vrot.slane %v6776_v49, %v10800_v27 }
 0x2e6   : > { %9849 = vmatpush3.bf16.msra.mxu1 %v10357_v55  ;;  %v6792_v53 = vcombine.low %v6784_v50, %v6791_v59  ;;  %v10365_v55 = vld [vmem:[#allocation3 + $0x1e8] sm:$0xff]   ;;  %v5896_v59 = vld [vmem:[#allocation2 + $0x8] sm:$0x7] }
 0x2e7   : > { %9850 = vmatprep.subr.bf16.mxu1 %v10618_v0 }
 0x2e8   : > { %v12368_v63 = vpop.f32.mrf.mxu0  ;;  %v12370_v2 = vpop.f32.mrf.mxu1 }
 0x2e9   : > { %v4984_v11 = vadd.f32 %v12368_v63, %v12354_v29 }
 0x2ea   : > { %v9642_v9 = vpop.f32.mrf.mxu0  ;;  %v9662_v10 = vpop.f32.mrf.mxu1  ;;  %9851 = vmatpush3.bf16.msra.mxu1 %v10358_v3 }
 0x2eb   : > { %9852 = vmatprep.subr.bf16.mxu1 %v10618_v0  ;;  %v10486_v9 = vld.sshfl [vmem:[#allocation2 + $0x18] sm:$0xf pattern:$0x76325410]  ;;  %v10370_v10 = vld [vmem:[#allocation3 + $0x1c0] sm:$0xff]   ;;  %v5118_v12 = vadd.f32 %v12370_v2, %v4984_v11 }
 0x2ec   : > { %v12373_v15 = vpop.f32.mrf.mxu0  ;;  %v12375_v16 = vpop.f32.mrf.mxu1  ;;  %v7060_v54 = vcombine.low %v10486_v9, %v10485_v8 }
 0x2ed   : > { %v4985_v13 = vadd.f32 %v12373_v15, %v12358_v42 }
 0x2ee   : > { %v9643_v21 = vpop.f32.mrf.mxu0  ;;  %v9663_v23 = vpop.f32.mrf.mxu1  ;;  %9853 = vmatpush3.bf16.msra.mxu1 %v10359_v17 }
 0x2ef   : > { %9854 = vmatprep.subr.bf16.mxu1 %v10618_v0  ;;  %v5119_v17 = vadd.f32 %v12375_v16, %v4985_v13 }
 0x2f2   : > { %9855 = vmatpush3.bf16.msra.mxu1 %v10360_v28 }
 0x2f3   : > { %9856 = vmatprep.subr.bf16.mxu1 %v10618_v0 }
 0x2f6   : > { %9857 = vmatpush3.bf16.msra.mxu1 %v10361_v44 }
 0x2f7   : > { %9858 = vmatprep.subr.bf16.mxu1 %v10618_v0 }
 0x2fa   : > { %9859 = vmatpush3.bf16.msra.mxu1 %v10362_v31 }
 0x2fb   : > { %9884 = vmatprep.subr.bf16.mxu1 %v10618_v0 }
 0x2fd   : > { %9861 = vmatmul.mubr.bf16.vlgmr.msra.gmra.mxu1 %v6792_v53 }
 0x2fe   : > { %9885 = vmatpush3.bf16.msra.mxu1 %v10363_v52  ;;  %9900 = vmatprep.mubr.msk.bf16.mxu1 %vm10619_vm0, %v10618_v0 }
 0x2ff   : > { %9886 = vmatprep.subr.bf16.mxu1 %v10618_v0 }
 0x302   : > { %9887 = vmatpush3.bf16.msra.mxu1 %v10364_v60 }
 0x303   : > { %9888 = vmatprep.subr.bf16.mxu1 %v10618_v0 }
 0x306   : > { %9889 = vmatpush3.bf16.msra.mxu1 %v10365_v55 }
 0x307   : > { %9890 = vmatprep.subr.bf16.mxu1 %v10618_v0 }
 0x308   : > { %v5332_v40 = vpop.f32.mrf.mxu0  ;;  %v5465_v56 = vpop.f32.mrf.mxu1 }
 0x309   : > { %v5339_v14 = vadd.f32 %v5332_v40, %v5118_v12 }
 0x30a   : > { %v9682_v57 = vpop.f32.mrf.mxu0  ;;  %v9702_v58 = vpop.f32.mrf.mxu1  ;;  %9891 = vmatpush3.bf16.msra.mxu1 %v10366_v32 }
 0x30b   : > { %9892 = vmatprep.subr.bf16.mxu1 %v10618_v0  ;;  %v5472_v18 = vadd.f32 %v5465_v56, %v5339_v14  ;;  %v5899_v58 = vld [vmem:[#allocation2 + $0xc] sm:$0x7] }
 0x30c   : > { %v5335_v5 = vpop.f32.mrf.mxu0  ;;  %v5468_v62 = vpop.f32.mrf.mxu1 }
 0x30d   : > { %v5340_v1 = vadd.f32 %v5335_v5, %v5119_v17 }
 0x30e   : > { %v9683_v3 = vpop.f32.mrf.mxu0  ;;  %v9703_v19 = vpop.f32.mrf.mxu1  ;;  %9893 = vmatpush3.bf16.msra.mxu1 %v10367_v37 }
 0x30f   : > { %9894 = vmatprep.subr.bf16.mxu1 %v10618_v0  ;;  %v5473_v63 = vadd.f32 %v5468_v62, %v5340_v1  ;;  %v5902_v62 = vld [vmem:[#allocation2 + $0x10] sm:$0x7] }
 0x312   : > { %9895 = vmatpush3.bf16.msra.mxu1 %v10368_v6 }
 0x313   : > { %9896 = vmatprep.subr.bf16.mxu1 %v10618_v0 }
 0x316   : > { %9897 = vmatpush3.bf16.msra.mxu1 %v10369_v7 }
 0x317   : > { %9898 = vmatprep.subr.bf16.mxu1 %v10618_v0 }
 0x31a   : > { %9899 = vmatpush3.bf16.msra.mxu1 %v10370_v10 }
 0x31d   : > { %9901 = vmatmul.mubr.bf16.vlgmr.msra.gmra.mxu1 %v7060_v54 }
 0x328   : > { %v5599_v39 = vpop.f32.mrf.mxu0  ;;  %v5820_v20 = vpop.f32.mrf.mxu1 }
 0x329   : > { %v5606_v21 = vadd.f32 %v5599_v39, %v5472_v18 }
 0x32a   : > { %v9722_v23 = vpop.f32.mrf.mxu0  ;;  %v9742_v29 = vpop.f32.mrf.mxu1 }
 0x32b   : > { %v5827_v51 = vadd.f32 %v5820_v20, %v5606_v21 }
 0x32c   : > { %v5602_v24 = vpop.f32.mrf.mxu0  ;;  %v5823_v2 = vpop.f32.mrf.mxu1 }
 0x32d   : > { %v5831_v25 = vcombine.high %v5827_v51, %v5827_v51  ;;  %8509 = vst [vmem:[%s11676_s20 + $0x30] sm:$0xf] %v5827_v51  ;;  %v5840_v26 = vmax.f32 %v5827_v51, 0.0  ;;  %v5607_v42 = vadd.f32 %v5602_v24, %v5473_v63 }
 0x32e   : > { %v9723_v15 = vpop.f32.mrf.mxu0  ;;  %v9743_v16 = vpop.f32.mrf.mxu1 }
 0x32f   : > { %8510 = vst [vmem:[%s11676_s20 + $0x34] sm:$0xf] %v5831_v25  ;;  %v5841_v28 = vmax.f32 %v5831_v25, 0.0  ;;  %v8613_v30 = vpack.c.bf16 %v5840_v26, %v5840_v26  ;;  %v5828_v33 = vadd.f32 %v5823_v2, %v5607_v42 }
 0x331   : > { %v8614_v36 = vpack.c.bf16 %v5841_v28, %v5841_v28  ;;  %v5861_v38 = vshrl.u32 %v8613_v30, 16  ;;  %v5832_v41 = vcombine.high %v5828_v33, %v5828_v33  ;;  %8511 = vst [vmem:[%s11676_s20 + $0x38] sm:$0xf] %v5828_v33  ;;  %v5842_v61 = vmax.f32 %v5828_v33, 0.0 }
 0x332   : > { %v5864_v22 = vshll.u32 %v8613_v30, 16 }
 0x333   : > { %v5863_v43 = vrot.slane %v5861_v38, 7  ;;  %v5868_v44 = vshrl.u32 %v8614_v36, 16  ;;  %8512 = vst [vmem:[%s11676_s20 + $0x3c] sm:$0xf] %v5832_v41  ;;  %v5843_v45 = vmax.f32 %v5832_v41, 0.0  ;;  %v8615_v47 = vpack.c.bf16 %v5842_v61, %v5842_v61  ;;  %v10384_v38 = vld [vmem:[#allocation3 + $0xb0] sm:$0xff]  }
 0x334   : > { %v5871_v49 = vshll.u32 %v8614_v36, 16  ;;  %v8533_v61 = vld.sshfl [vmem:[#allocation2] sm:$0x13 pattern:$0x76325410]  ;;  %s10525_s20 = scalar_lea.vmem %s10524_s19, 2048 }
 0x335   : > { %v5866_v35 = vor.u32 %v5864_v22, %v5863_v43  ;;  %v5870_v4 = vrot.slane %v5868_v44, 7  ;;  %v8616_v31 = vpack.c.bf16 %v5843_v45, %v5843_v45  ;;  %v5875_v50 = vshrl.u32 %v8615_v47, 16  ;;  %p10527_p12 = scmp.lt.s32.totalorder %s10525_s20, %s10519_s17 }
 0x336   : > { %v5878_v40 = vshll.u32 %v8615_v47, 16 }
 0x337   : > { %v5873_v52 = vor.u32 %v5871_v49, %v5870_v4  ;;  %v5894_v53 = vsel %vm12053_vm12, %v5866_v35, %v5893_v46  ;;  %v5882_v60 = vshrl.u32 %v8616_v31, 16  ;;  %v5877_v55 = vrot.slane %v5875_v50, 7  ;;  %p10528_p13 = por %p10527_p12, %p10526_p11 }
 0x338   : > { %5895 = vst [vmem:[#allocation2 + $0x4] sm:$0x7] %v5894_v53  ;;  %v5885_v57 = vshll.u32 %v8616_v31, 16  ;;  %v10385_v31 = vld [vmem:[#allocation3 + $0xa8] sm:$0xff]   ;;  %v6217_v50 = vshll.u32 %v8533_v61, 16 }
 0x339   : > { %v5897_v56 = vsel %vm12053_vm12, %v5873_v52, %v5896_v59  ;;  %v5884_v32 = vrot.slane %v5882_v60, 7  ;;  %v5880_v5 = vor.u32 %v5878_v40, %v5877_v55  ;;  %v6214_v59 = vshrl.u32 %v8533_v61, 16  ;;  %p10529_p0 = pnand %p10528_p13, %p10522_p10 }
 0x33a   : > { %5898 = vst [vmem:[#allocation2 + $0x8] sm:$0x7] %v5897_v56  ;;  %v10386_v56 = vld [vmem:[#allocation3 + $0xa0] sm:$0xff]  }
 0x33b   : > { %v5887_v37 = vor.u32 %v5885_v57, %v5884_v32  ;;  %v5900_v3 = vsel %vm12053_vm12, %v5880_v5, %v5899_v58  ;;  %v6188_v32 = vcombine.high %v8533_v61, %v8533_v61  ;;  %v6216_v57 = vrot.slane %v6214_v59, 6  ;;  %v10407_v61 = vld [vmem:[#allocation3 + $0x188] sm:$0xff]  }
 0x33c   : > { %5901 = vst [vmem:[#allocation2 + $0xc] sm:$0x7] %v5900_v3  ;;  %v6219_v58 = vrot.slane %v6217_v50, 7  ;;  %v10387_v3 = vld [vmem:[#allocation3 + $0x98] sm:$0xff]   ;;  %v10413_v59 = vld [vmem:[#allocation3 + $0x228] sm:$0xff]   ;;  %v10414_v50 = vld [vmem:[#allocation3 + $0x220] sm:$0xff]  }
 0x33d   : > { %v5903_v19 = vsel %vm12053_vm12, %v5887_v37, %v5902_v62 }
 0x33e   : > { %5904 = vst [vmem:[#allocation2 + $0x10] sm:$0x7] %v5903_v19  ;;  %v6220_v19 = vor.u32 %v6219_v58, %v6216_v57 }
 0x33f   : > { %v10487_v6 = vld.sshfl [vmem:[#allocation2] sm:$0xf pattern:$0x76325410] }
 0x340   : > { %v8534_v7 = vld.sshfl [vmem:[#allocation2 + $0x4] sm:$0x13 pattern:$0x76325410] }
 0x341   : > { %v8535_v8 = vld.sshfl [vmem:[#allocation2 + $0x8] sm:$0x13 pattern:$0x76325410]  ;;  %v6196_v9 = vcombine.high %v8534_v7, %v8534_v7  ;;  %v6228_v10 = vshrl.u32 %v8534_v7, 16  ;;  %v6231_v11 = vshll.u32 %v8534_v7, 16 }
 0x342   : > { %v6242_v54 = vshrl.u32 %v8535_v8, 16  ;;  %v6204_v12 = vcombine.high %v8535_v8, %v8535_v8  ;;  %v6245_v13 = vshll.u32 %v8535_v8, 16 }
 0x343   : > { %v10488_v14 = vld.sshfl [vmem:[#allocation2 + $0x8] sm:$0xf pattern:$0x76325410]  ;;  %v6230_v17 = vrot.slane %v6228_v10, 6  ;;  %v6233_v18 = vrot.slane %v6231_v11, 7 }
 0x344   : > { %v8536_v1 = vld.sshfl [vmem:[#allocation2 + $0xc] sm:$0x13 pattern:$0x76325410]  ;;  %v6237_v39 = vshll.u32 %v6196_v9, 16  ;;  %v6244_v20 = vrot.slane %v6242_v54, 6  ;;  %v5945_v24 = vcombine.low %v10487_v6, %v10488_v14 }
 0x345   : > { %v6234_v21 = vor.u32 %v6233_v18, %v6230_v17  ;;  %v6247_v23 = vrot.slane %v6245_v13, 7  ;;  %v6251_v29 = vshll.u32 %v6204_v12, 16  ;;  %v6256_v63 = vshrl.u32 %v8536_v1, 16  ;;  %v10388_v10 = vld [vmem:[#allocation3 + $0x90] sm:$0xff]   ;;  %v10389_v12 = vld [vmem:[#allocation3 + $0x88] sm:$0xff]   ;;  %v10390_v18 = vld [vmem:[#allocation3 + $0x80] sm:$0xff]  }
 0x346   : > { %v6259_v51 = vshll.u32 %v8536_v1, 16  ;;  %v8592_v26 = vld.sshfl [vmem:[#allocation2 + $0x10] sm:$0x13 pattern:$0x76325410]  ;;  %v6239_v42 = vrot.slane %v6237_v39, 7  ;;  %9761 = vmatmul.mubr.bf16.vlgmr.msra.gmra.mxu0 %v5945_v24  ;;  %v6212_v28 = vcombine.high %v8536_v1, %v8536_v1 }
 0x347   : > { %v6235_v2 = vrot.slane %v6234_v21, 2  ;;  %v6248_v25 = vor.u32 %v6247_v23, %v6244_v20  ;;  %v6258_v15 = vrot.slane %v6256_v63, 6  ;;  %v6253_v33 = vrot.slane %v6251_v29, 7  ;;  %9785 = vmatpush3.bf16.msra.mxu0 %v10383_v34  ;;  %9800 = vmatprep.mubr.msk.bf16.mxu0 %vm10619_vm0, %v10618_v0  ;;  %v10391_v20 = vld [vmem:[#allocation3 + $0x138] sm:$0xff]   ;;  %v10393_v23 = vld [vmem:[#allocation3 + $0x128] sm:$0xff]   ;;  %v10394_v34 = vld [vmem:[#allocation3 + $0x120] sm:$0xff]  }
 0x348   : > { %v6261_v16 = vrot.slane %v6259_v51, 7  ;;  %v7192_v36 = vcombine.high %v8592_v26, %v8592_v26  ;;  %v7236_v41 = vshrl.u32 %v8592_v26, 16  ;;  %9786 = vmatprep.subr.bf16.mxu0 %v10618_v0  ;;  %v7239_v45 = vshll.u32 %v8592_v26, 16  ;;  %v10396_v29 = vld [vmem:[#allocation3 + $0x110] sm:$0xff]   ;;  %v10397_v63 = vld [vmem:[#allocation3 + $0x108] sm:$0xff]   ;;  %v10398_v26 = vld [vmem:[#allocation3 + $0x100] sm:$0xff]  }
 0x349   : > { %v6249_v30 = vrot.slane %v6248_v25, 2  ;;  %v6240_v43 = vsel %vm11152_vm10, %v6235_v2, %v6239_v42  ;;  %v6265_v35 = vshll.u32 %v6212_v28, 16  ;;  %v6223_v6 = vshll.u32 %v6188_v32, 16 }
 0x34a   : > { %v6262_v44 = vor.u32 %v6261_v16, %v6258_v15  ;;  %v7238_v46 = vrot.slane %v7236_v41, 6  ;;  %v7241_v4 = vrot.slane %v7239_v45, 7  ;;  %v7245_v49 = vshll.u32 %v7192_v36, 16  ;;  %v10401_v16 = vld [vmem:[#allocation3 + $0x1b8] sm:$0xff]   ;;  %v10404_v36 = vld [vmem:[#allocation3 + $0x1a0] sm:$0xff]   ;;  %v10406_v41 = vld [vmem:[#allocation3 + $0x190] sm:$0xff]  }
 0x34b   : > { %v6254_v22 = vsel %vm11152_vm10, %v6249_v30, %v6253_v33  ;;  %9787 = vmatpush3.bf16.msra.mxu0 %v10384_v38  ;;  %v6267_v60 = vrot.slane %v6265_v35, 7  ;;  %v6221_v11 = vrot.slane %v6220_v19, 2  ;;  %v6225_v54 = vrot.slane %v6223_v6, 7  ;;  %v10402_v30 = vld [vmem:[#allocation3 + $0x1b0] sm:$0xff]   ;;  %v10403_v33 = vld [vmem:[#allocation3 + $0x1a8] sm:$0xff]   ;;  %v10405_v38 = vld [vmem:[#allocation3 + $0x198] sm:$0xff]  }
 0x34c   : > { %v7266_v47 = vcombine.low %v6240_v43, %v6254_v22  ;;  %9788 = vmatprep.subr.bf16.mxu0 %v10618_v0  ;;  %v6263_v52 = vrot.slane %v6262_v44, 2  ;;  %v7242_v53 = vor.u32 %v7241_v4, %v7238_v46  ;;  %v7247_v40 = vrot.slane %v7245_v49, 7  ;;  %v10489_v24 = vld.sshfl [vmem:[#allocation2 + $0x44] sm:$0xf pattern:$0x76325410] }
 0x34d   : > { %v6226_v13 = vsel %vm11152_vm10, %v6221_v11, %v6225_v54  ;;  %v10490_v25 = vld.sshfl [vmem:[#allocation2 + $0x3c] sm:$0xf pattern:$0x76325410]  ;;  %v10408_v46 = vld [vmem:[#allocation3 + $0x180] sm:$0xff]   ;;  %v10411_v4 = vld [vmem:[#allocation3 + $0x238] sm:$0xff]  }
 0x34e   : > { %v7243_v55 = vrot.slane %v7242_v53, 2  ;;  %v6268_v5 = vsel %vm11152_vm10, %v6263_v52, %v6267_v60  ;;  %v12433_v7 = vrot.slane %v7266_v47, %v10800_v27  ;;  %v6286_v17 = vcombine.low %v6226_v13, %v6240_v43  ;;  %v10492_v45 = vld.sshfl [vmem:[#allocation2 + $0x4] sm:$0xf pattern:$0x76325410]  ;;  %v10417_v60 = vld [vmem:[#allocation3 + $0x208] sm:$0xff]  }
 0x34f   : > { %9789 = vmatpush3.bf16.msra.mxu0 %v10385_v31  ;;  %v6287_v14 = vcombine.low %v6254_v22, %v6268_v5  ;;  %v6570_v28 = vcombine.low %v10490_v25, %v10489_v24  ;;  %v10491_v22 = vld.sshfl [vmem:[#allocation2 + $0xc] sm:$0xf pattern:$0x76325410]  ;;  %v10412_v31 = vld [vmem:[#allocation3 + $0x230] sm:$0xff]  }
 0x350   : > { %9790 = vmatprep.subr.bf16.mxu0 %v10618_v0  ;;  %v7248_v62 = vsel %vm11152_vm10, %v7243_v55, %v7247_v40  ;;  %v6294_v39 = vrot.slane %v6286_v17, %v10800_v27  ;;  %v6926_v49 = vcombine.low %v10492_v45, %v10491_v22  ;;  %v10415_v52 = vld [vmem:[#allocation3 + $0x218] sm:$0xff]   ;;  %v10416_v53 = vld [vmem:[#allocation3 + $0x210] sm:$0xff]  }
 0x351   : > { %v7267_v37 = vcombine.low %v6268_v5, %v7248_v62  ;;  %v6301_v1 = vrot.slane %v6287_v14, %v10800_v27 }
 0x353   : > { %9791 = vmatpush3.bf16.msra.mxu0 %v10386_v56  ;;  %v12436_v8 = vrot.slane %v7267_v37, %v10800_v27  ;;  %v6302_v21 = vcombine.low %v6294_v39, %v6301_v1  ;;  %v10395_v27 = vld [vmem:[#allocation3 + $0x118] sm:$0xff]   ;;  %v10418_v56 = vld [vmem:[#allocation3 + $0x200] sm:$0xff]  }
 0x354   : > { %9792 = vmatprep.subr.bf16.mxu0 %v10618_v0 }
 0x355   : > { %v7282_v9 = vcombine.low %v12433_v7, %v12436_v8 }
 0x357   : > { %9793 = vmatpush3.bf16.msra.mxu0 %v10387_v3 }
 0x358   : > { %9794 = vmatprep.subr.bf16.mxu0 %v10618_v0 }
 0x35b   : > { %9795 = vmatpush3.bf16.msra.mxu0 %v10388_v10 }
 0x35c   : > { %9796 = vmatprep.subr.bf16.mxu0 %v10618_v0 }
 0x35f   : > { %9797 = vmatpush3.bf16.msra.mxu0 %v10389_v12 }
 0x360   : > { %9798 = vmatprep.subr.bf16.mxu0 %v10618_v0 }
 0x363   : > { %9799 = vmatpush3.bf16.msra.mxu0 %v10390_v18 }
 0x364   : > { %9824 = vmatprep.subr.bf16.mxu0 %v10618_v0 }
 0x366   : > { %9801 = vmatmul.mubr.bf16.vlgmr.msra.gmra.mxu0 %v6302_v21 }
 0x367   : > { %9825 = vmatpush3.bf16.msra.mxu0 %v10391_v20  ;;  %9840 = vmatprep.mubr.msk.bf16.mxu0 %vm10619_vm0, %v10618_v0 }
 0x368   : > { %9826 = vmatprep.subr.bf16.mxu0 %v10618_v0 }
 0x36b   : > { %9827 = vmatpush3.bf16.msra.mxu0 %v10392_v48 }
 0x36c   : > { %9828 = vmatprep.subr.bf16.mxu0 %v10618_v0 }
 0x36f   : > { %9829 = vmatpush3.bf16.msra.mxu0 %v10393_v23 }
 0x370   : > { %9830 = vmatprep.subr.bf16.mxu0 %v10618_v0 }
 0x373   : > { %9831 = vmatpush3.bf16.msra.mxu0 %v10394_v34 }
 0x374   : > { %9832 = vmatprep.subr.bf16.mxu0 %v10618_v0 }
 0x377   : > { %9833 = vmatpush3.bf16.msra.mxu0 %v10395_v27 }
 0x378   : > { %9834 = vmatprep.subr.bf16.mxu0 %v10618_v0 }
 0x37b   : > { %9835 = vmatpush3.bf16.msra.mxu0 %v10396_v29 }
 0x37c   : > { %9836 = vmatprep.subr.bf16.mxu0 %v10618_v0 }
 0x37d   : > { %v12456_v51 = vpop.f32.mrf.mxu1 }
 0x37f   : > { %v9782_v2 = vpop.f32.mrf.mxu1  ;;  %9837 = vmatpush3.bf16.msra.mxu0 %v10397_v63 }
 0x380   : > { %9838 = vmatprep.subr.bf16.mxu0 %v10618_v0 }
 0x381   : > { %v12459_v42 = vpop.f32.mrf.mxu1 }
 0x383   : > { %v9783_v15 = vpop.f32.mrf.mxu1  ;;  %9839 = vmatpush3.bf16.msra.mxu0 %v10398_v26 }
 0x384   : > { %9864 = vmatprep.subr.bf16.mxu0 %v10618_v0 }
 0x386   : > { %9841 = vmatmul.mubr.bf16.vlgmr.msra.gmra.mxu0 %v6570_v28 }
 0x387   : > { %9865 = vmatpush3.bf16.msra.mxu0 %v10401_v16  ;;  %9880 = vmatprep.mubr.msk.bf16.mxu0 %vm10619_vm0, %v10618_v0 }
 0x388   : > { %9866 = vmatprep.subr.bf16.mxu0 %v10618_v0 }
 0x38b   : > { %9867 = vmatpush3.bf16.msra.mxu0 %v10402_v30 }
 0x38c   : > { %9868 = vmatprep.subr.bf16.mxu0 %v10618_v0 }
 0x38f   : > { %9869 = vmatpush3.bf16.msra.mxu0 %v10403_v33 }
 0x390   : > { %9870 = vmatprep.subr.bf16.mxu0 %v10618_v0 }
 0x393   : > { %9871 = vmatpush3.bf16.msra.mxu0 %v10404_v36 }
 0x394   : > { %9872 = vmatprep.subr.bf16.mxu0 %v10618_v0 }
 0x397   : > { %9873 = vmatpush3.bf16.msra.mxu0 %v10405_v38 }
 0x398   : > { %9874 = vmatprep.subr.bf16.mxu0 %v10618_v0 }
 0x39b   : > { %9875 = vmatpush3.bf16.msra.mxu0 %v10406_v41 }
 0x39c   : > { %9876 = vmatprep.subr.bf16.mxu0 %v10618_v0 }
 0x39d   : > { %v12470_v43 = vpop.f32.mrf.mxu1 }
 0x39f   : > { %v9822_v44 = vpop.f32.mrf.mxu1  ;;  %9877 = vmatpush3.bf16.msra.mxu0 %v10407_v61 }
 0x3a0   : > { %9878 = vmatprep.subr.bf16.mxu0 %v10618_v0 }
 0x3a1   : > { %v12473_v47 = vpop.f32.mrf.mxu1 }
 0x3a3   : > { %v9823_v35 = vpop.f32.mrf.mxu1  ;;  %9879 = vmatpush3.bf16.msra.mxu0 %v10408_v46 }
 0x3a4   : > { %9904 = vmatprep.subr.bf16.mxu0 %v10618_v0 }
 0x3a6   : > { %9881 = vmatmul.mubr.bf16.vlgmr.msra.gmra.mxu0 %v6926_v49 }
 0x3a7   : > { %9905 = vmatpush3.bf16.msra.mxu0 %v10411_v4  ;;  %9920 = vmatprep.mubr.msk.bf16.mxu0 %vm10619_vm0, %v10618_v0 }
 0x3a8   : > { %9906 = vmatprep.subr.bf16.mxu0 %v10618_v0 }
 0x3ab   : > { %9907 = vmatpush3.bf16.msra.mxu0 %v10412_v31 }
 0x3ac   : > { %9908 = vmatprep.subr.bf16.mxu0 %v10618_v0 }
 0x3af   : > { %9909 = vmatpush3.bf16.msra.mxu0 %v10413_v59 }
 0x3b0   : > { %9910 = vmatprep.subr.bf16.mxu0 %v10618_v0 }
 0x3b3   : > { %9911 = vmatpush3.bf16.msra.mxu0 %v10414_v50 }
 0x3b4   : > { %9912 = vmatprep.subr.bf16.mxu0 %v10618_v0 }
 0x3b7   : > { %9913 = vmatpush3.bf16.msra.mxu0 %v10415_v52 }
 0x3b8   : > { %9914 = vmatprep.subr.bf16.mxu0 %v10618_v0 }
 0x3bb   : > { %9915 = vmatpush3.bf16.msra.mxu0 %v10416_v53 }
 0x3bc   : > { %9916 = vmatprep.subr.bf16.mxu0 %v10618_v0 }
 0x3bd   : > { %v12484_v55 = vpop.f32.mrf.mxu1 }
 0x3bf   : > { %v9862_v40 = vpop.f32.mrf.mxu1  ;;  %9917 = vmatpush3.bf16.msra.mxu0 %v10417_v60 }
 0x3c0   : > { %9918 = vmatprep.subr.bf16.mxu0 %v10618_v0 }
 0x3c1   : > { %v12487_v32 = vpop.f32.mrf.mxu1 }
 0x3c3   : > { %v9863_v57 = vpop.f32.mrf.mxu1  ;;  %9919 = vmatpush3.bf16.msra.mxu0 %v10418_v56 }
 0x3c6   : > { %9921 = vmatmul.mubr.bf16.vlgmr.msra.gmra.mxu0 %v7282_v9 }
 0x3dd   : > { %v12493_v58 = vpop.f32.mrf.mxu1 }
 0x3df   : > { %v9902_v5 = vpop.f32.mrf.mxu1 }
 0x3e1   : > { %v12495_v62 = vpop.f32.mrf.mxu1 }
 0x3e3   : > { %v9903_v37 = vpop.f32.mrf.mxu1 }
 0x406   : > { %v6029_v3 = vpop.f32.mrf.mxu0 }
 0x408   : > { %v9762_v19 = vpop.f32.mrf.mxu0 }
 0x40a   : > { %v6032_v6 = vpop.f32.mrf.mxu0 }
 0x40c   : > { %v9763_v10 = vpop.f32.mrf.mxu0 }
 0x40d   : > { %10532 = shalt.err (!%p10529_p0)
}
 0x40e   : > { %s10533_s11 = scalar_lea.hbm %s12502_s15, 1024  ;;  %s10537_s9 = scalar_lea.hbm %s12598_s5, 2048 }
 0x40f   : > { %p10534_p1 = scmp.ne.s32.totalorder %s12502_s15, %s10533_s11  ;;  %p10538_p4 = scmp.lt.s32.totalorder %s12502_s15, %s12598_s5 }
 0x410   : > { %p10539_p7 = scmp.lt.s32.totalorder %s10537_s9, %s10533_s11 }
 0x411   : > { %p10535_p2 = pnand %p10534_p1, %p10698_p5 }
 0x412   : > { %p10540_p6 = por %p10539_p7, %p10538_p4 }
 0x413   : > { %p10536_p3 = pneg %p10535_p2 }
 0x415   : > { %p10541_p8 = pnand %p10540_p6, %p10536_p3 }
 0x417   : > { %10544 = shalt.err (!%p10541_p8)
}
 0x418   : > { %s10622_s14 = smov 64   ;;  %s10623_s17 = smov 4   ;;  %v7536_v0 = vld [vmem:[%s12597_s4] ss:$0 sm:$0xff] }
 0x419   : > { %9929 = dma.vmem_to_hbm [thread:$0]  (%p10698_p5), %s12504_s12, 1024, %s12502_s15, %s7386_s16, %s10622_s14, %s10622_s14, %s10623_s17   ;;  %v6036_v7 = vadd.f32 %v7536_v0, %v6029_v3  ;;  %v6037_v8 = vadd.f32 %v7536_v0, %v6032_v6 }
 0x41a   : > { %s7533_s12 = sshll.u32 %s11638_s28, 4  ;;  %s8618_s20 = sshll.u32 %s10681_s25, 8 }
 0x41b   : > { %v6171_v9 = vadd.f32 %v12456_v51, %v6036_v7  ;;  %v6172_v13 = vadd.f32 %v12459_v42, %v6037_v8  ;;  %s270_s15 = scalar_lea.vmem [#allocation7], %s7533_s12  ;;  %s12550_s29 = scalar_lea.hbm %s12599_s6, %s8618_s20 }
 0x41c   : > { %s7420_s16 = sshll.u32 %s270_s15, 4  ;;  %s7391_s9 = scalar_lea.sflag [#allocation8], %s11638_s28  ;;  %s12545_s16 = int_to_ptr.vmem [resolvable:$true] %s7420_s16 }
 0x41d   : > { %s10545_s10 = scalar_lea.vmem %s12545_s16, 256  ;;  %s10624_s25 = smov [#allocation7]  }
 0x41e   : > { %p10546_p9 = scmp.ne.s32.totalorder %s12545_s16, %s10545_s10  ;;  %s10549_s13 = sshll.u32 %s10624_s25, 4  ;;  %s10550_s13 = int_to_ptr.vmem [resolvable:$false] %s10549_s13 }
 0x41f   : > { %s10551_s18 = scalar_lea.vmem %s10550_s13, 512  ;;  %p10552_p12 = scmp.lt.s32.totalorder %s12545_s16, %s10550_s13 }
 0x420   : > { %p10547_p10 = pnand %p10546_p9, %p10698_p5  ;;  %p10553_p13 = scmp.lt.s32.totalorder %s10551_s18, %s10545_s10 }
 0x422   : > { %p10548_p11 = pneg %p10547_p10  ;;  %p10554_p0 = por %p10553_p13, %p10552_p12 }
 0x424   : > { %p10555_p1 = pnand %p10554_p0, %p10548_p11 }
 0x426   : > { %v6386_v11 = vpop.f32.mrf.mxu0 }
 0x427   : > { %v6393_v54 = vadd.f32 %v6386_v11, %v6171_v9 }
 0x428   : > { %v9802_v12 = vpop.f32.mrf.mxu0 }
 0x429   : > { %v6527_v29 = vadd.f32 %v12470_v43, %v6393_v54 }
 0x42a   : > { %v6389_v14 = vpop.f32.mrf.mxu0 }
 0x42b   : > { %v6394_v17 = vadd.f32 %v6389_v14, %v6172_v13 }
 0x42c   : > { %v9803_v18 = vpop.f32.mrf.mxu0 }
 0x42d   : > { %v6528_v51 = vadd.f32 %v12473_v47, %v6394_v17 }
 0x446   : > { %v6654_v1 = vpop.f32.mrf.mxu0 }
 0x447   : > { %v6661_v63 = vadd.f32 %v6654_v1, %v6527_v29 }
 0x448   : > { %v9842_v39 = vpop.f32.mrf.mxu0 }
 0x449   : > { %v6883_v2 = vadd.f32 %v12484_v55, %v6661_v63 }
 0x44a   : > { %v6657_v20 = vpop.f32.mrf.mxu0 }
 0x44b   : > { %v6662_v24 = vadd.f32 %v6657_v20, %v6528_v51 }
 0x44c   : > { %v9843_v21 = vpop.f32.mrf.mxu0 }
 0x44d   : > { %v6884_v26 = vadd.f32 %v12487_v32, %v6662_v24 }
 0x466   : > { %v7010_v48 = vpop.f32.mrf.mxu0 }
 0x467   : > { %v7017_v25 = vadd.f32 %v7010_v48, %v6883_v2 }
 0x468   : > { %v9882_v23 = vpop.f32.mrf.mxu0 }
 0x469   : > { %v7151_v15 = vadd.f32 %v12493_v58, %v7017_v25 }
 0x46a   : > { %v7013_v34 = vpop.f32.mrf.mxu0 }
 0x46b   : > { %v7018_v42 = vadd.f32 %v7013_v34, %v6884_v26 }
 0x46c   : > { %v9883_v27 = vpop.f32.mrf.mxu0 }
 0x46d   : > { %v7152_v36 = vadd.f32 %v12495_v62, %v7018_v42 }
 0x486   : > { %v7366_v16 = vpop.f32.mrf.mxu0 }
 0x487   : > { %v7373_v28 = vadd.f32 %v7366_v16, %v7151_v15 }
 0x488   : > { %v9922_v30 = vpop.f32.mrf.mxu0 }
 0x489   : > { %v7377_v33 = vcombine.high %v7373_v28, %v7373_v28  ;;  %7381 = vst [vmem:[%s270_s15] sm:$0xf] %v7373_v28 }
 0x48a   : > { %v7369_v38 = vpop.f32.mrf.mxu0 }
 0x48b   : > { %7382 = vst [vmem:[%s270_s15 + $0x4] sm:$0xf] %v7377_v33  ;;  %v7374_v41 = vadd.f32 %v7369_v38, %v7152_v36 }
 0x48c   : > { %v9923_v61 = vpop.f32.mrf.mxu0 }
 0x48d   : > { %v7378_v43 = vcombine.high %v7374_v41, %v7374_v41  ;;  %7383 = vst [vmem:[%s270_s15 + $0x8] sm:$0xf] %v7374_v41 }
 0x48f   : > { %7384 = vst [vmem:[%s270_s15 + $0xc] sm:$0xf] %v7378_v43 }
 0x490   : > { %10558 = shalt.err (!%p10555_p1)
}
 0x491   : > { %s10559_s19 = scalar_lea.hbm %s12550_s29, 256  ;;  %s10563_s15 = scalar_lea.hbm %s12599_s6, 512 }
 0x492   : > { %p10560_p2 = scmp.ne.s32.totalorder %s12550_s29, %s10559_s19  ;;  %p10564_p7 = scmp.lt.s32.totalorder %s12550_s29, %s12599_s6 }
 0x493   : > { %p10565_p6 = scmp.lt.s32.totalorder %s10563_s15, %s10559_s19 }
 0x494   : > { %p10561_p3 = pnand %p10560_p2, %p10698_p5 }
 0x495   : > { %p10566_p8 = por %p10565_p6, %p10564_p7 }
 0x496   : > { %p10562_p4 = pneg %p10561_p3 }
 0x498   : > { %p10567_p9 = pnand %p10566_p8, %p10562_p4 }
 0x49a   : > { %10570 = shalt.err (!%p10567_p9)
}
 0x49b   : > { %9930 = dma.vmem_to_hbm [thread:$0]  (%p10698_p5), %s12545_s16, 256, %s12550_s29, %s7391_s9, %s10622_s14, %s10622_s14, %s10623_s17  }
 0x49c PF: > { %p9946_p10 = scmp.ge.s32.totalorder %s10613_s24, 2  ;;  %s7435_s26 = sand.u32 1, %s10601_s21  }
 0x49d   : > { %p12609_p11 = scmp.ne.s32.totalorder %s12601_s8, 0  ;;  %s7436_s10 = scalar_lea.sflag [#allocation5], %s7435_s26 }
 0x49f   : > { %p9938_p12 = pnand %p9946_p10, %p12609_p11 }
 0x4a1   : > { %p9939_p13 = pneg %p9938_p12 }
 0x4a3   : > { %10592 = dma.done.wait (%p9939_p13), %s7436_s10, 1024  }
 0x4a4   : > { %10594 = vsyncadd (%p9939_p13), %s7436_s10, 4294966272  ;;  %s7445_s25 = scalar_lea.sflag [#allocation8], %s7435_s26 }
 0x4a5   : > { %10596 = dma.done.wait (%p9939_p13), %s7445_s25, 256  }
 0x4a6   : > { %10598 = vsyncadd (%p9939_p13), %s7445_s25, 4294967040  ;;  %p21_p5 = scmp.ge.s32.totalorder %s10685_s27, 4   ;;  %s12610_s21 = smov %s10605_s22 }
 0x4a7   : > { %s12611_s22 = smov %s10609_s23  ;;  %s12612_s23 = smov %s10696_s30 }
 0x4a8   : > { %s12613_s24 = smov %s10685_s27  ;;  %23 = sbr.rel (!%p21_p5) target bundleno = 6 (0x6), region = 140 }
 0x4ad   :  { %7450 = vsyncpa [#allocation4], 1 }
 0x4ae   :  { %7452 = vsyncpa [#allocation4 + $0x1], 1 }
 0x4af   :  { %7453 = vsyncpa [#allocation5], 1 }
 0x4b0   :  { %7455 = vsyncpa [#allocation5 + $0x1], 1 }
 0x4b1   :  { %7456 = vsyncpa [#allocation8], 1 }
 0x4b2   :  { %7458 = vsyncpa [#allocation8 + $0x1], 1 }

</bundles_post_ra>
